<compile_context>
chip_gen: v6e
topology: v6e:2x2x1
jax: 0.10.0
libtpu: 0.0.40
codegen_flags: <defaults>
</compile_context>

<pallas_src>
import functools

import jax
import jax.numpy as jnp
from jax.experimental import pallas as pl
from jax.experimental.pallas import tpu as pltpu


def decoder_kernel(x_ref, emb_wt_ref, emb_b_ref,
                   w_ih_ref, w_hh_ref, b_ref,
                   h0_ref, c0_ref,
                   out_ref, hn_ref, cn_ref,
                   *, n_layers, seq_len, hidden):
    H = hidden
    L = seq_len
    bf16 = jnp.bfloat16
    f32 = jnp.float32

    # --- embedding: relu(x @ W_e^T + b_e); dropout == identity (eval mode) ---
    seq0 = jnp.maximum(
        jnp.dot(x_ref[...].astype(bf16), emb_wt_ref[...],
                preferred_element_type=f32) + emb_b_ref[...],
        0.0,
    )  # [L, E] f32 (kernel assumes E == H)

    # Layer-0 input-to-hidden pre-activations for every timestep in one batched MXU
    # matmul (bias b[0] fused; i/f/o columns pre-scaled by 1/2 in prepare_params).
    xg0 = (jnp.dot(seq0.astype(bf16), w_ih_ref[0],
                   preferred_element_type=f32) + b_ref[0])       # [L, 4H] f32

    # Per-layer recurrent state, kept as register/VMEM-resident [1, H] f32 values.
    h = [h0_ref[l:l + 1, :] for l in range(n_layers)]
    c = [c0_ref[l:l + 1, :] for l in range(n_layers)]
    # y[l]: most recent output row of layer l (input to layer l+1 on the next wave).
    y = [None] * n_layers

    # --- wavefront (diagonal) schedule over (layer, timestep) ---
    for s in range(L + n_layers - 1):
        active = [(l, s - l) for l in range(n_layers) if 0 <= s - l < L]

        # 1) Gate pre-activations for every active layer.  These matmuls only depend on
        #    the *previous* wave's state, so they are mutually independent and the MXU
        #    pipelines their RHS pushes back-to-back within the wave.
        zs = {}
        for (l, t) in active:
            if l == 0:
                zs[l] = xg0[t:t + 1, :] + jnp.dot(
                    h[0].astype(bf16), w_hh_ref[0], preferred_element_type=f32)
            else:
                zs[l] = (b_ref[l]
                         + jnp.dot(y[l - 1].astype(bf16), w_ih_ref[l],
                                   preferred_element_type=f32)
                         + jnp.dot(h[l].astype(bf16), w_hh_ref[l],
                                   preferred_element_type=f32))   # [1, 4H] f32

        # 2) Non-linearities + state update (f32 elementwise; 2 tanh per layer-step:
        #    sigmoid(z) = 0.5*(1 + tanh(z/2)) thanks to the 1/2 column pre-scale).
        for (l, t) in active:
            tg = jnp.tanh(zs[l])
            i_g = 0.5 + 0.5 * tg[:, 0 * H:1 * H]
            f_g = 0.5 + 0.5 * tg[:, 1 * H:2 * H]
            g_g = tg[:, 2 * H:3 * H]
            o_g = 0.5 + 0.5 * tg[:, 3 * H:4 * H]
            c[l] = f_g * c[l] + i_g * g_g
            h[l] = o_g * jnp.tanh(c[l])
            if l == n_layers - 1:
                out_ref[t:t + 1, :] = h[l]       # static row, lane-dense [1, H] store
            else:
                y[l] = h[l]                      # feeds layer l+1 on the next wave

    for l in range(n_layers):
        hn_ref[l:l + 1, :] = h[l]
        cn_ref[l:l + 1, :] = c[l]


def prepare_params(params, n_layers, hidden):
    """One-time weight prep: transpose, stack per layer, fuse biases, pre-scale the
    i/f/o gate columns by 1/2 (sigmoid-via-tanh), and downcast matmul weights to bf16.
    Done outside the per-call path."""
    H = hidden
    # PyTorch gate order (i, f, g, o) along the 4H axis.
    col_scale = jnp.concatenate([
        jnp.full((H,), 0.5, jnp.float32),   # i
        jnp.full((H,), 0.5, jnp.float32),   # f
        jnp.ones((H,), jnp.float32),        # g (tanh, unscaled)
        jnp.full((H,), 0.5, jnp.float32),   # o
    ])
    bf16 = jnp.bfloat16

    emb_wt = params["emb_w"].T.astype(bf16)                        # [E, E] bf16
    emb_b = params["emb_b"][None, :].astype(jnp.float32)           # [1, E] f32
    w_ih = jnp.stack([(params[f"w_ih_{l}"].T * col_scale[None, :]).astype(bf16)
                      for l in range(n_layers)])                   # [n_layers, E, 4H] bf16
    w_hh = jnp.stack([(params[f"w_hh_{l}"].T * col_scale[None, :]).astype(bf16)
                      for l in range(n_layers)])                   # [n_layers, H, 4H] bf16
    b = jnp.stack([((params[f"b_ih_{l}"] + params[f"b_hh_{l}"]) * col_scale)[None, :]
                   for l in range(n_layers)]).astype(jnp.float32)  # [n_layers, 1, 4H] f32
    return {"emb_wt": emb_wt, "emb_b": emb_b, "w_ih": w_ih, "w_hh": w_hh, "b": b}


def decoder_forward(x, hidden, cell, prepped):
    L, E = x.shape
    n_layers, H = hidden.shape
    assert E == H, "kernel assumes embedding_size == hidden_size (module defaults: 512/512)"

    kernel = functools.partial(decoder_kernel, n_layers=n_layers, seq_len=L, hidden=H)
    vmem = pl.BlockSpec(memory_space=pltpu.MemorySpace.VMEM)

    out, hn, cn = pl.pallas_call(
        kernel,
        out_shape=(
            jax.ShapeDtypeStruct((L, H), jnp.float32),
            jax.ShapeDtypeStruct((n_layers, H), jnp.float32),
            jax.ShapeDtypeStruct((n_layers, H), jnp.float32),
        ),
        in_specs=[vmem] * 8,
        out_specs=(vmem, vmem, vmem),
    )(x, prepped["emb_wt"], prepped["emb_b"], prepped["w_ih"], prepped["w_hh"],
      prepped["b"], hidden, cell)

    return out, hn, cn


def decoder_ref(x, hidden, cell, params, n_layers):
    """Pure-JAX f32 reference mirroring the PyTorch forward (eval mode)."""
    H = hidden.shape[-1]
    seq = jax.nn.relu(x @ params["emb_w"].T + params["emb_b"])
    hs, cs = [], []
    for l in range(n_layers):
        h, c = hidden[l], cell[l]
        outs = []
        for t in range(seq.shape[0]):
            gates = (seq[t] @ params[f"w_ih_{l}"].T + params[f"b_ih_{l}"]
                     + h @ params[f"w_hh_{l}"].T + params[f"b_hh_{l}"])
            i_g = jax.nn.sigmoid(gates[0 * H:1 * H])
            f_g = jax.nn.sigmoid(gates[1 * H:2 * H])
            g_g = jnp.tanh(gates[2 * H:3 * H])
            o_g = jax.nn.sigmoid(gates[3 * H:4 * H])
            c = f_g * c + i_g * g_g
            h = o_g * jnp.tanh(c)
            outs.append(h)
        seq = jnp.stack(outs)
        hs.append(h)
        cs.append(c)
    return seq, jnp.stack(hs), jnp.stack(cs)


if __name__ == "__main__":
    # Small shapes consistent with the module (embedding_size == hidden_size).
    L = 8            # unbatched sequence length the LSTM actually sees
    E = 128          # embedding_size
    H = 128          # hidden_size
    N_LAYERS = 2

    key = jax.random.PRNGKey(0)
    keys = jax.random.split(key, 3 + 4 * N_LAYERS)
    scale = 0.1

    params = {
        "emb_w": jax.random.uniform(keys[0], (E, E), jnp.float32, -scale, scale),
        "emb_b": jax.random.uniform(keys[1], (E,), jnp.float32, -scale, scale),
    }
    kidx = 2
    for l in range(N_LAYERS):
        in_sz = E if l == 0 else H
        params[f"w_ih_{l}"] = jax.random.uniform(keys[kidx + 0], (4 * H, in_sz), jnp.float32, -scale, scale)
        params[f"w_hh_{l}"] = jax.random.uniform(keys[kidx + 1], (4 * H, H), jnp.float32, -scale, scale)
        params[f"b_ih_{l}"] = jax.random.uniform(keys[kidx + 2], (4 * H,), jnp.float32, -scale, scale)
        params[f"b_hh_{l}"] = jax.random.uniform(keys[kidx + 3], (4 * H,), jnp.float32, -scale, scale)
        kidx += 4

    xk, hk, ck = jax.random.split(keys[-1], 3)
    x = jax.random.normal(xk, (L, E), jnp.float32)
    hidden = jax.random.normal(hk, (N_LAYERS, H), jnp.float32) * 0.1
    cell = jax.random.normal(ck, (N_LAYERS, H), jnp.float32) * 0.1

    # One-time weight prep (transpose / stack / gate pre-scale / bias fusion / bf16 cast),
    # then the kernel call.
    prepped = prepare_params(params, N_LAYERS, H)
    out, hn, cn = decoder_forward(x, hidden, cell, prepped)
    jax.block_until_ready((out, hn, cn))

    out_r, hn_r, cn_r = decoder_ref(x, hidden, cell, params, N_LAYERS)
    assert out.shape == (L, H) and hn.shape == (N_LAYERS, H) and cn.shape == (N_LAYERS, H)
    # Tolerance relaxed (was 1e-3 for the all-f32 kernel): MXU operands are now bf16,
    # and the 8-step recurrent accumulation amplifies the ~0.4% bf16 rounding of the dots.
    assert jnp.allclose(out, out_r, rtol=2e-2, atol=2e-2)
    assert jnp.allclose(hn, hn_r, rtol=2e-2, atol=2e-2)
    assert jnp.allclose(cn, cn_r, rtol=2e-2, atol=2e-2)

    print("KERNEL_OK")
</pallas_src>

<mosaic_0001>
module attributes {stable_mosaic.version = 11 : i64} {
  func.func @decoder_kernel(%arg0: memref<8x128xf32, #tpu.memory_space<vmem>>, %arg1: memref<128x128xbf16, #tpu.memory_space<vmem>>, %arg2: memref<1x128xf32, #tpu.memory_space<vmem>>, %arg3: memref<2x128x512xbf16, #tpu.memory_space<vmem>>, %arg4: memref<2x128x512xbf16, #tpu.memory_space<vmem>>, %arg5: memref<2x1x512xf32, #tpu.memory_space<vmem>>, %arg6: memref<2x128xf32, #tpu.memory_space<vmem>>, %arg7: memref<2x128xf32, #tpu.memory_space<vmem>>, %arg8: memref<8x128xf32, #tpu.memory_space<vmem>>, %arg9: memref<2x128xf32, #tpu.memory_space<vmem>>, %arg10: memref<2x128xf32, #tpu.memory_space<vmem>>) attributes {dimension_semantics = [], scalar_prefetch = 0 : i64, scratch_operands = 0 : i64, tpu.core_type = #tpu.core_type<tc>} {
    %c0 = arith.constant 0 : index
    %c0_0 = arith.constant 0 : index
    %0 = vector.load %arg0[%c0, %c0_0] : memref<8x128xf32, #tpu.memory_space<vmem>>, vector<8x128xf32>
    %1 = arith.truncf %0 : vector<8x128xf32> to vector<8x128xbf16>
    %c0_1 = arith.constant 0 : index
    %c0_2 = arith.constant 0 : index
    %2 = vector.load %arg1[%c0_1, %c0_2] : memref<128x128xbf16, #tpu.memory_space<vmem>>, vector<128x128xbf16>
    %cst = arith.constant dense<0.000000e+00> : vector<8x128xf32>
    %3 = tpu.matmul %1, %2, %cst {dimension_numbers = #tpu.dot_dimension_numbers<[1], [0], [0], [1], [0, 0, 1, 1], [], []>} : vector<8x128xbf16>, vector<128x128xbf16>, vector<8x128xf32> -> vector<8x128xf32>
    %c0_3 = arith.constant 0 : index
    %c0_4 = arith.constant 0 : index
    %4 = vector.load %arg2[%c0_3, %c0_4] : memref<1x128xf32, #tpu.memory_space<vmem>>, vector<1x128xf32>
    %5 = vector.broadcast %4 : vector<1x128xf32> to vector<8x128xf32>
    %6 = arith.addf %3, %5 : vector<8x128xf32>
    %cst_5 = arith.constant 0.000000e+00 : f32
    %7 = vector.broadcast %cst_5 : f32 to vector<8x128xf32>
    %8 = arith.maximumf %6, %7 : vector<8x128xf32>
    %9 = arith.truncf %8 : vector<8x128xf32> to vector<8x128xbf16>
    %c0_6 = arith.constant 0 : index
    %c0_7 = arith.constant 0 : index
    %c0_8 = arith.constant 0 : index
    %10 = vector.load %arg3[%c0_6, %c0_7, %c0_8] : memref<2x128x512xbf16, #tpu.memory_space<vmem>>, vector<1x128x512xbf16>
    %11 = vector.shape_cast %10 : vector<1x128x512xbf16> to vector<128x512xbf16>
    %cst_9 = arith.constant dense<0.000000e+00> : vector<8x512xf32>
    %12 = tpu.matmul %9, %11, %cst_9 {dimension_numbers = #tpu.dot_dimension_numbers<[1], [0], [0], [1], [0, 0, 1, 1], [], []>} : vector<8x128xbf16>, vector<128x512xbf16>, vector<8x512xf32> -> vector<8x512xf32>
    %c0_10 = arith.constant 0 : index
    %c0_11 = arith.constant 0 : index
    %c0_12 = arith.constant 0 : index
    %13 = vector.load %arg5[%c0_10, %c0_11, %c0_12] : memref<2x1x512xf32, #tpu.memory_space<vmem>>, vector<1x1x512xf32>
    %14 = vector.shape_cast %13 : vector<1x1x512xf32> to vector<1x512xf32>
    %15 = vector.broadcast %14 : vector<1x512xf32> to vector<8x512xf32>
    %16 = arith.addf %12, %15 : vector<8x512xf32>
    %c0_13 = arith.constant 0 : index
    %c0_14 = arith.constant 0 : index
    %17 = vector.load %arg6[%c0_13, %c0_14] : memref<2x128xf32, #tpu.memory_space<vmem>>, vector<1x128xf32>
    %c1 = arith.constant 1 : index
    %c0_15 = arith.constant 0 : index
    %18 = vector.load %arg6[%c1, %c0_15] : memref<2x128xf32, #tpu.memory_space<vmem>>, vector<1x128xf32>
    %c0_16 = arith.constant 0 : index
    %c0_17 = arith.constant 0 : index
    %19 = vector.load %arg7[%c0_16, %c0_17] : memref<2x128xf32, #tpu.memory_space<vmem>>, vector<1x128xf32>
    %c1_18 = arith.constant 1 : index
    %c0_19 = arith.constant 0 : index
    %20 = vector.load %arg7[%c1_18, %c0_19] : memref<2x128xf32, #tpu.memory_space<vmem>>, vector<1x128xf32>
    %21 = vector.extract_strided_slice %16 {offsets = [0, 0], sizes = [1, 512], strides = [1, 1]} : vector<8x512xf32> to vector<1x512xf32>
    %22 = arith.truncf %17 : vector<1x128xf32> to vector<1x128xbf16>
    %c0_20 = arith.constant 0 : index
    %c0_21 = arith.constant 0 : index
    %c0_22 = arith.constant 0 : index
    %23 = vector.load %arg4[%c0_20, %c0_21, %c0_22] : memref<2x128x512xbf16, #tpu.memory_space<vmem>>, vector<1x128x512xbf16>
    %24 = vector.shape_cast %23 : vector<1x128x512xbf16> to vector<128x512xbf16>
    %cst_23 = arith.constant dense<0.000000e+00> : vector<1x512xf32>
    %25 = tpu.matmul %22, %24, %cst_23 {dimension_numbers = #tpu.dot_dimension_numbers<[1], [0], [0], [1], [0, 0, 1, 1], [], []>} : vector<1x128xbf16>, vector<128x512xbf16>, vector<1x512xf32> -> vector<1x512xf32>
    %26 = arith.addf %21, %25 : vector<1x512xf32>
    %27 = math.tanh %26 : vector<1x512xf32>
    %28 = vector.extract_strided_slice %27 {offsets = [0, 0], sizes = [1, 128], strides = [1, 1]} : vector<1x512xf32> to vector<1x128xf32>
    %cst_24 = arith.constant 5.000000e-01 : f32
    %29 = vector.broadcast %cst_24 : f32 to vector<1x128xf32>
    %30 = arith.mulf %29, %28 : vector<1x128xf32>
    %cst_25 = arith.constant 5.000000e-01 : f32
    %31 = vector.broadcast %cst_25 : f32 to vector<1x128xf32>
    %32 = arith.addf %31, %30 : vector<1x128xf32>
    %33 = vector.extract_strided_slice %27 {offsets = [0, 128], sizes = [1, 128], strides = [1, 1]} : vector<1x512xf32> to vector<1x128xf32>
    %cst_26 = arith.constant 5.000000e-01 : f32
    %34 = vector.broadcast %cst_26 : f32 to vector<1x128xf32>
    %35 = arith.mulf %34, %33 : vector<1x128xf32>
    %cst_27 = arith.constant 5.000000e-01 : f32
    %36 = vector.broadcast %cst_27 : f32 to vector<1x128xf32>
    %37 = arith.addf %36, %35 : vector<1x128xf32>
    %38 = vector.extract_strided_slice %27 {offsets = [0, 256], sizes = [1, 128], strides = [1, 1]} : vector<1x512xf32> to vector<1x128xf32>
    %39 = vector.extract_strided_slice %27 {offsets = [0, 384], sizes = [1, 128], strides = [1, 1]} : vector<1x512xf32> to vector<1x128xf32>
    %cst_28 = arith.constant 5.000000e-01 : f32
    %40 = vector.broadcast %cst_28 : f32 to vector<1x128xf32>
    %41 = arith.mulf %40, %39 : vector<1x128xf32>
    %cst_29 = arith.constant 5.000000e-01 : f32
    %42 = vector.broadcast %cst_29 : f32 to vector<1x128xf32>
    %43 = arith.addf %42, %41 : vector<1x128xf32>
    %44 = arith.mulf %37, %19 : vector<1x128xf32>
    %45 = arith.mulf %32, %38 : vector<1x128xf32>
    %46 = arith.addf %44, %45 : vector<1x128xf32>
    %47 = math.tanh %46 : vector<1x128xf32>
    %48 = arith.mulf %43, %47 : vector<1x128xf32>
    %49 = vector.extract_strided_slice %16 {offsets = [1, 0], sizes = [1, 512], strides = [1, 1]} : vector<8x512xf32> to vector<1x512xf32>
    %50 = arith.truncf %48 : vector<1x128xf32> to vector<1x128xbf16>
    %c0_30 = arith.constant 0 : index
    %c0_31 = arith.constant 0 : index
    %c0_32 = arith.constant 0 : index
    %51 = vector.load %arg4[%c0_30, %c0_31, %c0_32] : memref<2x128x512xbf16, #tpu.memory_space<vmem>>, vector<1x128x512xbf16>
    %52 = vector.shape_cast %51 : vector<1x128x512xbf16> to vector<128x512xbf16>
    %cst_33 = arith.constant dense<0.000000e+00> : vector<1x512xf32>
    %53 = tpu.matmul %50, %52, %cst_33 {dimension_numbers = #tpu.dot_dimension_numbers<[1], [0], [0], [1], [0, 0, 1, 1], [], []>} : vector<1x128xbf16>, vector<128x512xbf16>, vector<1x512xf32> -> vector<1x512xf32>
    %54 = arith.addf %49, %53 : vector<1x512xf32>
    %c1_34 = arith.constant 1 : index
    %c0_35 = arith.constant 0 : index
    %c0_36 = arith.constant 0 : index
    %55 = vector.load %arg5[%c1_34, %c0_35, %c0_36] : memref<2x1x512xf32, #tpu.memory_space<vmem>>, vector<1x1x512xf32>
    %56 = vector.shape_cast %55 : vector<1x1x512xf32> to vector<1x512xf32>
    %57 = arith.truncf %48 : vector<1x128xf32> to vector<1x128xbf16>
    %c1_37 = arith.constant 1 : index
    %c0_38 = arith.constant 0 : index
    %c0_39 = arith.constant 0 : index
    %58 = vector.load %arg3[%c1_37, %c0_38, %c0_39] : memref<2x128x512xbf16, #tpu.memory_space<vmem>>, vector<1x128x512xbf16>
    %59 = vector.shape_cast %58 : vector<1x128x512xbf16> to vector<128x512xbf16>
    %cst_40 = arith.constant dense<0.000000e+00> : vector<1x512xf32>
    %60 = tpu.matmul %57, %59, %cst_40 {dimension_numbers = #tpu.dot_dimension_numbers<[1], [0], [0], [1], [0, 0, 1, 1], [], []>} : vector<1x128xbf16>, vector<128x512xbf16>, vector<1x512xf32> -> vector<1x512xf32>
    %61 = arith.addf %56, %60 : vector<1x512xf32>
    %62 = arith.truncf %18 : vector<1x128xf32> to vector<1x128xbf16>
    %c1_41 = arith.constant 1 : index
    %c0_42 = arith.constant 0 : index
    %c0_43 = arith.constant 0 : index
    %63 = vector.load %arg4[%c1_41, %c0_42, %c0_43] : memref<2x128x512xbf16, #tpu.memory_space<vmem>>, vector<1x128x512xbf16>
    %64 = vector.shape_cast %63 : vector<1x128x512xbf16> to vector<128x512xbf16>
    %cst_44 = arith.constant dense<0.000000e+00> : vector<1x512xf32>
    %65 = tpu.matmul %62, %64, %cst_44 {dimension_numbers = #tpu.dot_dimension_numbers<[1], [0], [0], [1], [0, 0, 1, 1], [], []>} : vector<1x128xbf16>, vector<128x512xbf16>, vector<1x512xf32> -> vector<1x512xf32>
    %66 = arith.addf %61, %65 : vector<1x512xf32>
    %67 = math.tanh %54 : vector<1x512xf32>
    %68 = vector.extract_strided_slice %67 {offsets = [0, 0], sizes = [1, 128], strides = [1, 1]} : vector<1x512xf32> to vector<1x128xf32>
    %cst_45 = arith.constant 5.000000e-01 : f32
    %69 = vector.broadcast %cst_45 : f32 to vector<1x128xf32>
    %70 = arith.mulf %69, %68 : vector<1x128xf32>
    %cst_46 = arith.constant 5.000000e-01 : f32
    %71 = vector.broadcast %cst_46 : f32 to vector<1x128xf32>
    %72 = arith.addf %71, %70 : vector<1x128xf32>
    %73 = vector.extract_strided_slice %67 {offsets = [0, 128], sizes = [1, 128], strides = [1, 1]} : vector<1x512xf32> to vector<1x128xf32>
    %cst_47 = arith.constant 5.000000e-01 : f32
    %74 = vector.broadcast %cst_47 : f32 to vector<1x128xf32>
    %75 = arith.mulf %74, %73 : vector<1x128xf32>
    %cst_48 = arith.constant 5.000000e-01 : f32
    %76 = vector.broadcast %cst_48 : f32 to vector<1x128xf32>
    %77 = arith.addf %76, %75 : vector<1x128xf32>
    %78 = vector.extract_strided_slice %67 {offsets = [0, 256], sizes = [1, 128], strides = [1, 1]} : vector<1x512xf32> to vector<1x128xf32>
    %79 = vector.extract_strided_slice %67 {offsets = [0, 384], sizes = [1, 128], strides = [1, 1]} : vector<1x512xf32> to vector<1x128xf32>
    %cst_49 = arith.constant 5.000000e-01 : f32
    %80 = vector.broadcast %cst_49 : f32 to vector<1x128xf32>
    %81 = arith.mulf %80, %79 : vector<1x128xf32>
    %cst_50 = arith.constant 5.000000e-01 : f32
    %82 = vector.broadcast %cst_50 : f32 to vector<1x128xf32>
    %83 = arith.addf %82, %81 : vector<1x128xf32>
    %84 = arith.mulf %77, %46 : vector<1x128xf32>
    %85 = arith.mulf %72, %78 : vector<1x128xf32>
    %86 = arith.addf %84, %85 : vector<1x128xf32>
    %87 = math.tanh %86 : vector<1x128xf32>
    %88 = arith.mulf %83, %87 : vector<1x128xf32>
    %89 = math.tanh %66 : vector<1x512xf32>
    %90 = vector.extract_strided_slice %89 {offsets = [0, 0], sizes = [1, 128], strides = [1, 1]} : vector<1x512xf32> to vector<1x128xf32>
    %cst_51 = arith.constant 5.000000e-01 : f32
    %91 = vector.broadcast %cst_51 : f32 to vector<1x128xf32>
    %92 = arith.mulf %91, %90 : vector<1x128xf32>
    %cst_52 = arith.constant 5.000000e-01 : f32
    %93 = vector.broadcast %cst_52 : f32 to vector<1x128xf32>
    %94 = arith.addf %93, %92 : vector<1x128xf32>
    %95 = vector.extract_strided_slice %89 {offsets = [0, 128], sizes = [1, 128], strides = [1, 1]} : vector<1x512xf32> to vector<1x128xf32>
    %cst_53 = arith.constant 5.000000e-01 : f32
    %96 = vector.broadcast %cst_53 : f32 to vector<1x128xf32>
    %97 = arith.mulf %96, %95 : vector<1x128xf32>
    %cst_54 = arith.constant 5.000000e-01 : f32
    %98 = vector.broadcast %cst_54 : f32 to vector<1x128xf32>
    %99 = arith.addf %98, %97 : vector<1x128xf32>
    %100 = vector.extract_strided_slice %89 {offsets = [0, 256], sizes = [1, 128], strides = [1, 1]} : vector<1x512xf32> to vector<1x128xf32>
    %101 = vector.extract_strided_slice %89 {offsets = [0, 384], sizes = [1, 128], strides = [1, 1]} : vector<1x512xf32> to vector<1x128xf32>
    %cst_55 = arith.constant 5.000000e-01 : f32
    %102 = vector.broadcast %cst_55 : f32 to vector<1x128xf32>
    %103 = arith.mulf %102, %101 : vector<1x128xf32>
    %cst_56 = arith.constant 5.000000e-01 : f32
    %104 = vector.broadcast %cst_56 : f32 to vector<1x128xf32>
    %105 = arith.addf %104, %103 : vector<1x128xf32>
    %106 = arith.mulf %99, %20 : vector<1x128xf32>
    %107 = arith.mulf %94, %100 : vector<1x128xf32>
    %108 = arith.addf %106, %107 : vector<1x128xf32>
    %109 = math.tanh %108 : vector<1x128xf32>
    %110 = arith.mulf %105, %109 : vector<1x128xf32>
    %c0_57 = arith.constant 0 : index
    %c0_58 = arith.constant 0 : index
    %111 = vector.load %arg8[%c0_57, %c0_58] : memref<8x128xf32, #tpu.memory_space<vmem>>, vector<1x128xf32>
    tpu.vector_store %arg8[%c0_57, %c0_58], %110 {strides = array<i32>} : memref<8x128xf32, #tpu.memory_space<vmem>>, vector<1x128xf32>,
    %112 = vector.extract_strided_slice %16 {offsets = [2, 0], sizes = [1, 512], strides = [1, 1]} : vector<8x512xf32> to vector<1x512xf32>
    %113 = arith.truncf %88 : vector<1x128xf32> to vector<1x128xbf16>
    %c0_59 = arith.constant 0 : index
    %c0_60 = arith.constant 0 : index
    %c0_61 = arith.constant 0 : index
    %114 = vector.load %arg4[%c0_59, %c0_60, %c0_61] : memref<2x128x512xbf16, #tpu.memory_space<vmem>>, vector<1x128x512xbf16>
    %115 = vector.shape_cast %114 : vector<1x128x512xbf16> to vector<128x512xbf16>
    %cst_62 = arith.constant dense<0.000000e+00> : vector<1x512xf32>
    %116 = tpu.matmul %113, %115, %cst_62 {dimension_numbers = #tpu.dot_dimension_numbers<[1], [0], [0], [1], [0, 0, 1, 1], [], []>} : vector<1x128xbf16>, vector<128x512xbf16>, vector<1x512xf32> -> vector<1x512xf32>
    %117 = arith.addf %112, %116 : vector<1x512xf32>
    %c1_63 = arith.constant 1 : index
    %c0_64 = arith.constant 0 : index
    %c0_65 = arith.constant 0 : index
    %118 = vector.load %arg5[%c1_63, %c0_64, %c0_65] : memref<2x1x512xf32, #tpu.memory_space<vmem>>, vector<1x1x512xf32>
    %119 = vector.shape_cast %118 : vector<1x1x512xf32> to vector<1x512xf32>
    %120 = arith.truncf %88 : vector<1x128xf32> to vector<1x128xbf16>
    %c1_66 = arith.constant 1 : index
    %c0_67 = arith.constant 0 : index
    %c0_68 = arith.constant 0 : index
    %121 = vector.load %arg3[%c1_66, %c0_67, %c0_68] : memref<2x128x512xbf16, #tpu.memory_space<vmem>>, vector<1x128x512xbf16>
    %122 = vector.shape_cast %121 : vector<1x128x512xbf16> to vector<128x512xbf16>
    %cst_69 = arith.constant dense<0.000000e+00> : vector<1x512xf32>
    %123 = tpu.matmul %120, %122, %cst_69 {dimension_numbers = #tpu.dot_dimension_numbers<[1], [0], [0], [1], [0, 0, 1, 1], [], []>} : vector<1x128xbf16>, vector<128x512xbf16>, vector<1x512xf32> -> vector<1x512xf32>
    %124 = arith.addf %119, %123 : vector<1x512xf32>
    %125 = arith.truncf %110 : vector<1x128xf32> to vector<1x128xbf16>
    %c1_70 = arith.constant 1 : index
    %c0_71 = arith.constant 0 : index
    %c0_72 = arith.constant 0 : index
    %126 = vector.load %arg4[%c1_70, %c0_71, %c0_72] : memref<2x128x512xbf16, #tpu.memory_space<vmem>>, vector<1x128x512xbf16>
    %127 = vector.shape_cast %126 : vector<1x128x512xbf16> to vector<128x512xbf16>
    %cst_73 = arith.constant dense<0.000000e+00> : vector<1x512xf32>
    %128 = tpu.matmul %125, %127, %cst_73 {dimension_numbers = #tpu.dot_dimension_numbers<[1], [0], [0], [1], [0, 0, 1, 1], [], []>} : vector<1x128xbf16>, vector<128x512xbf16>, vector<1x512xf32> -> vector<1x512xf32>
    %129 = arith.addf %124, %128 : vector<1x512xf32>
    %130 = math.tanh %117 : vector<1x512xf32>
    %131 = vector.extract_strided_slice %130 {offsets = [0, 0], sizes = [1, 128], strides = [1, 1]} : vector<1x512xf32> to vector<1x128xf32>
    %cst_74 = arith.constant 5.000000e-01 : f32
    %132 = vector.broadcast %cst_74 : f32 to vector<1x128xf32>
    %133 = arith.mulf %132, %131 : vector<1x128xf32>
    %cst_75 = arith.constant 5.000000e-01 : f32
    %134 = vector.broadcast %cst_75 : f32 to vector<1x128xf32>
    %135 = arith.addf %134, %133 : vector<1x128xf32>
    %136 = vector.extract_strided_slice %130 {offsets = [0, 128], sizes = [1, 128], strides = [1, 1]} : vector<1x512xf32> to vector<1x128xf32>
    %cst_76 = arith.constant 5.000000e-01 : f32
    %137 = vector.broadcast %cst_76 : f32 to vector<1x128xf32>
    %138 = arith.mulf %137, %136 : vector<1x128xf32>
    %cst_77 = arith.constant 5.000000e-01 : f32
    %139 = vector.broadcast %cst_77 : f32 to vector<1x128xf32>
    %140 = arith.addf %139, %138 : vector<1x128xf32>
    %141 = vector.extract_strided_slice %130 {offsets = [0, 256], sizes = [1, 128], strides = [1, 1]} : vector<1x512xf32> to vector<1x128xf32>
    %142 = vector.extract_strided_slice %130 {offsets = [0, 384], sizes = [1, 128], strides = [1, 1]} : vector<1x512xf32> to vector<1x128xf32>
    %cst_78 = arith.constant 5.000000e-01 : f32
    %143 = vector.broadcast %cst_78 : f32 to vector<1x128xf32>
    %144 = arith.mulf %143, %142 : vector<1x128xf32>
    %cst_79 = arith.constant 5.000000e-01 : f32
    %145 = vector.broadcast %cst_79 : f32 to vector<1x128xf32>
    %146 = arith.addf %145, %144 : vector<1x128xf32>
    %147 = arith.mulf %140, %86 : vector<1x128xf32>
    %148 = arith.mulf %135, %141 : vector<1x128xf32>
    %149 = arith.addf %147, %148 : vector<1x128xf32>
    %150 = math.tanh %149 : vector<1x128xf32>
    %151 = arith.mulf %146, %150 : vector<1x128xf32>
    %152 = math.tanh %129 : vector<1x512xf32>
    %153 = vector.extract_strided_slice %152 {offsets = [0, 0], sizes = [1, 128], strides = [1, 1]} : vector<1x512xf32> to vector<1x128xf32>
    %cst_80 = arith.constant 5.000000e-01 : f32
    %154 = vector.broadcast %cst_80 : f32 to vector<1x128xf32>
    %155 = arith.mulf %154, %153 : vector<1x128xf32>
    %cst_81 = arith.constant 5.000000e-01 : f32
    %156 = vector.broadcast %cst_81 : f32 to vector<1x128xf32>
    %157 = arith.addf %156, %155 : vector<1x128xf32>
    %158 = vector.extract_strided_slice %152 {offsets = [0, 128], sizes = [1, 128], strides = [1, 1]} : vector<1x512xf32> to vector<1x128xf32>
    %cst_82 = arith.constant 5.000000e-01 : f32
    %159 = vector.broadcast %cst_82 : f32 to vector<1x128xf32>
    %160 = arith.mulf %159, %158 : vector<1x128xf32>
    %cst_83 = arith.constant 5.000000e-01 : f32
    %161 = vector.broadcast %cst_83 : f32 to vector<1x128xf32>
    %162 = arith.addf %161, %160 : vector<1x128xf32>
    %163 = vector.extract_strided_slice %152 {offsets = [0, 256], sizes = [1, 128], strides = [1, 1]} : vector<1x512xf32> to vector<1x128xf32>
    %164 = vector.extract_strided_slice %152 {offsets = [0, 384], sizes = [1, 128], strides = [1, 1]} : vector<1x512xf32> to vector<1x128xf32>
    %cst_84 = arith.constant 5.000000e-01 : f32
    %165 = vector.broadcast %cst_84 : f32 to vector<1x128xf32>
    %166 = arith.mulf %165, %164 : vector<1x128xf32>
    %cst_85 = arith.constant 5.000000e-01 : f32
    %167 = vector.broadcast %cst_85 : f32 to vector<1x128xf32>
    %168 = arith.addf %167, %166 : vector<1x128xf32>
    %169 = arith.mulf %162, %108 : vector<1x128xf32>
    %170 = arith.mulf %157, %163 : vector<1x128xf32>
    %171 = arith.addf %169, %170 : vector<1x128xf32>
    %172 = math.tanh %171 : vector<1x128xf32>
    %173 = arith.mulf %168, %172 : vector<1x128xf32>
    %c1_86 = arith.constant 1 : index
    %c0_87 = arith.constant 0 : index
    %174 = vector.load %arg8[%c1_86, %c0_87] : memref<8x128xf32, #tpu.memory_space<vmem>>, vector<1x128xf32>
    tpu.vector_store %arg8[%c1_86, %c0_87], %173 {strides = array<i32>} : memref<8x128xf32, #tpu.memory_space<vmem>>, vector<1x128xf32>,
    %175 = vector.extract_strided_slice %16 {offsets = [3, 0], sizes = [1, 512], strides = [1, 1]} : vector<8x512xf32> to vector<1x512xf32>
    %176 = arith.truncf %151 : vector<1x128xf32> to vector<1x128xbf16>
    %c0_88 = arith.constant 0 : index
    %c0_89 = arith.constant 0 : index
    %c0_90 = arith.constant 0 : index
    %177 = vector.load %arg4[%c0_88, %c0_89, %c0_90] : memref<2x128x512xbf16, #tpu.memory_space<vmem>>, vector<1x128x512xbf16>
    %178 = vector.shape_cast %177 : vector<1x128x512xbf16> to vector<128x512xbf16>
    %cst_91 = arith.constant dense<0.000000e+00> : vector<1x512xf32>
    %179 = tpu.matmul %176, %178, %cst_91 {dimension_numbers = #tpu.dot_dimension_numbers<[1], [0], [0], [1], [0, 0, 1, 1], [], []>} : vector<1x128xbf16>, vector<128x512xbf16>, vector<1x512xf32> -> vector<1x512xf32>
    %180 = arith.addf %175, %179 : vector<1x512xf32>
    %c1_92 = arith.constant 1 : index
    %c0_93 = arith.constant 0 : index
    %c0_94 = arith.constant 0 : index
    %181 = vector.load %arg5[%c1_92, %c0_93, %c0_94] : memref<2x1x512xf32, #tpu.memory_space<vmem>>, vector<1x1x512xf32>
    %182 = vector.shape_cast %181 : vector<1x1x512xf32> to vector<1x512xf32>
    %183 = arith.truncf %151 : vector<1x128xf32> to vector<1x128xbf16>
    %c1_95 = arith.constant 1 : index
    %c0_96 = arith.constant 0 : index
    %c0_97 = arith.constant 0 : index
    %184 = vector.load %arg3[%c1_95, %c0_96, %c0_97] : memref<2x128x512xbf16, #tpu.memory_space<vmem>>, vector<1x128x512xbf16>
    %185 = vector.shape_cast %184 : vector<1x128x512xbf16> to vector<128x512xbf16>
    %cst_98 = arith.constant dense<0.000000e+00> : vector<1x512xf32>
    %186 = tpu.matmul %183, %185, %cst_98 {dimension_numbers = #tpu.dot_dimension_numbers<[1], [0], [0], [1], [0, 0, 1, 1], [], []>} : vector<1x128xbf16>, vector<128x512xbf16>, vector<1x512xf32> -> vector<1x512xf32>
    %187 = arith.addf %182, %186 : vector<1x512xf32>
    %188 = arith.truncf %173 : vector<1x128xf32> to vector<1x128xbf16>
    %c1_99 = arith.constant 1 : index
    %c0_100 = arith.constant 0 : index
    %c0_101 = arith.constant 0 : index
    %189 = vector.load %arg4[%c1_99, %c0_100, %c0_101] : memref<2x128x512xbf16, #tpu.memory_space<vmem>>, vector<1x128x512xbf16>
    %190 = vector.shape_cast %189 : vector<1x128x512xbf16> to vector<128x512xbf16>
    %cst_102 = arith.constant dense<0.000000e+00> : vector<1x512xf32>
    %191 = tpu.matmul %188, %190, %cst_102 {dimension_numbers = #tpu.dot_dimension_numbers<[1], [0], [0], [1], [0, 0, 1, 1], [], []>} : vector<1x128xbf16>, vector<128x512xbf16>, vector<1x512xf32> -> vector<1x512xf32>
    %192 = arith.addf %187, %191 : vector<1x512xf32>
    %193 = math.tanh %180 : vector<1x512xf32>
    %194 = vector.extract_strided_slice %193 {offsets = [0, 0], sizes = [1, 128], strides = [1, 1]} : vector<1x512xf32> to vector<1x128xf32>
    %cst_103 = arith.constant 5.000000e-01 : f32
    %195 = vector.broadcast %cst_103 : f32 to vector<1x128xf32>
    %196 = arith.mulf %195, %194 : vector<1x128xf32>
    %cst_104 = arith.constant 5.000000e-01 : f32
    %197 = vector.broadcast %cst_104 : f32 to vector<1x128xf32>
    %198 = arith.addf %197, %196 : vector<1x128xf32>
    %199 = vector.extract_strided_slice %193 {offsets = [0, 128], sizes = [1, 128], strides = [1, 1]} : vector<1x512xf32> to vector<1x128xf32>
    %cst_105 = arith.constant 5.000000e-01 : f32
    %200 = vector.broadcast %cst_105 : f32 to vector<1x128xf32>
    %201 = arith.mulf %200, %199 : vector<1x128xf32>
    %cst_106 = arith.constant 5.000000e-01 : f32
    %202 = vector.broadcast %cst_106 : f32 to vector<1x128xf32>
    %203 = arith.addf %202, %201 : vector<1x128xf32>
    %204 = vector.extract_strided_slice %193 {offsets = [0, 256], sizes = [1, 128], strides = [1, 1]} : vector<1x512xf32> to vector<1x128xf32>
    %205 = vector.extract_strided_slice %193 {offsets = [0, 384], sizes = [1, 128], strides = [1, 1]} : vector<1x512xf32> to vector<1x128xf32>
    %cst_107 = arith.constant 5.000000e-01 : f32
    %206 = vector.broadcast %cst_107 : f32 to vector<1x128xf32>
    %207 = arith.mulf %206, %205 : vector<1x128xf32>
    %cst_108 = arith.constant 5.000000e-01 : f32
    %208 = vector.broadcast %cst_108 : f32 to vector<1x128xf32>
    %209 = arith.addf %208, %207 : vector<1x128xf32>
    %210 = arith.mulf %203, %149 : vector<1x128xf32>
    %211 = arith.mulf %198, %204 : vector<1x128xf32>
    %212 = arith.addf %210, %211 : vector<1x128xf32>
    %213 = math.tanh %212 : vector<1x128xf32>
    %214 = arith.mulf %209, %213 : vector<1x128xf32>
    %215 = math.tanh %192 : vector<1x512xf32>
    %216 = vector.extract_strided_slice %215 {offsets = [0, 0], sizes = [1, 128], strides = [1, 1]} : vector<1x512xf32> to vector<1x128xf32>
    %cst_109 = arith.constant 5.000000e-01 : f32
    %217 = vector.broadcast %cst_109 : f32 to vector<1x128xf32>
    %218 = arith.mulf %217, %216 : vector<1x128xf32>
    %cst_110 = arith.constant 5.000000e-01 : f32
    %219 = vector.broadcast %cst_110 : f32 to vector<1x128xf32>
    %220 = arith.addf %219, %218 : vector<1x128xf32>
    %221 = vector.extract_strided_slice %215 {offsets = [0, 128], sizes = [1, 128], strides = [1, 1]} : vector<1x512xf32> to vector<1x128xf32>
    %cst_111 = arith.constant 5.000000e-01 : f32
    %222 = vector.broadcast %cst_111 : f32 to vector<1x128xf32>
    %223 = arith.mulf %222, %221 : vector<1x128xf32>
    %cst_112 = arith.constant 5.000000e-01 : f32
    %224 = vector.broadcast %cst_112 : f32 to vector<1x128xf32>
    %225 = arith.addf %224, %223 : vector<1x128xf32>
    %226 = vector.extract_strided_slice %215 {offsets = [0, 256], sizes = [1, 128], strides = [1, 1]} : vector<1x512xf32> to vector<1x128xf32>
    %227 = vector.extract_strided_slice %215 {offsets = [0, 384], sizes = [1, 128], strides = [1, 1]} : vector<1x512xf32> to vector<1x128xf32>
    %cst_113 = arith.constant 5.000000e-01 : f32
    %228 = vector.broadcast %cst_113 : f32 to vector<1x128xf32>
    %229 = arith.mulf %228, %227 : vector<1x128xf32>
    %cst_114 = arith.constant 5.000000e-01 : f32
    %230 = vector.broadcast %cst_114 : f32 to vector<1x128xf32>
    %231 = arith.addf %230, %229 : vector<1x128xf32>
    %232 = arith.mulf %225, %171 : vector<1x128xf32>
    %233 = arith.mulf %220, %226 : vector<1x128xf32>
    %234 = arith.addf %232, %233 : vector<1x128xf32>
    %235 = math.tanh %234 : vector<1x128xf32>
    %236 = arith.mulf %231, %235 : vector<1x128xf32>
    %c2 = arith.constant 2 : index
    %c0_115 = arith.constant 0 : index
    %237 = vector.load %arg8[%c2, %c0_115] : memref<8x128xf32, #tpu.memory_space<vmem>>, vector<1x128xf32>
    tpu.vector_store %arg8[%c2, %c0_115], %236 {strides = array<i32>} : memref<8x128xf32, #tpu.memory_space<vmem>>, vector<1x128xf32>,
    %238 = vector.extract_strided_slice %16 {offsets = [4, 0], sizes = [1, 512], strides = [1, 1]} : vector<8x512xf32> to vector<1x512xf32>
    %239 = arith.truncf %214 : vector<1x128xf32> to vector<1x128xbf16>
    %c0_116 = arith.constant 0 : index
    %c0_117 = arith.constant 0 : index
    %c0_118 = arith.constant 0 : index
    %240 = vector.load %arg4[%c0_116, %c0_117, %c0_118] : memref<2x128x512xbf16, #tpu.memory_space<vmem>>, vector<1x128x512xbf16>
    %241 = vector.shape_cast %240 : vector<1x128x512xbf16> to vector<128x512xbf16>
    %cst_119 = arith.constant dense<0.000000e+00> : vector<1x512xf32>
    %242 = tpu.matmul %239, %241, %cst_119 {dimension_numbers = #tpu.dot_dimension_numbers<[1], [0], [0], [1], [0, 0, 1, 1], [], []>} : vector<1x128xbf16>, vector<128x512xbf16>, vector<1x512xf32> -> vector<1x512xf32>
    %243 = arith.addf %238, %242 : vector<1x512xf32>
    %c1_120 = arith.constant 1 : index
    %c0_121 = arith.constant 0 : index
    %c0_122 = arith.constant 0 : index
    %244 = vector.load %arg5[%c1_120, %c0_121, %c0_122] : memref<2x1x512xf32, #tpu.memory_space<vmem>>, vector<1x1x512xf32>
    %245 = vector.shape_cast %244 : vector<1x1x512xf32> to vector<1x512xf32>
    %246 = arith.truncf %214 : vector<1x128xf32> to vector<1x128xbf16>
    %c1_123 = arith.constant 1 : index
    %c0_124 = arith.constant 0 : index
    %c0_125 = arith.constant 0 : index
    %247 = vector.load %arg3[%c1_123, %c0_124, %c0_125] : memref<2x128x512xbf16, #tpu.memory_space<vmem>>, vector<1x128x512xbf16>
    %248 = vector.shape_cast %247 : vector<1x128x512xbf16> to vector<128x512xbf16>
    %cst_126 = arith.constant dense<0.000000e+00> : vector<1x512xf32>
    %249 = tpu.matmul %246, %248, %cst_126 {dimension_numbers = #tpu.dot_dimension_numbers<[1], [0], [0], [1], [0, 0, 1, 1], [], []>} : vector<1x128xbf16>, vector<128x512xbf16>, vector<1x512xf32> -> vector<1x512xf32>
    %250 = arith.addf %245, %249 : vector<1x512xf32>
    %251 = arith.truncf %236 : vector<1x128xf32> to vector<1x128xbf16>
    %c1_127 = arith.constant 1 : index
    %c0_128 = arith.constant 0 : index
    %c0_129 = arith.constant 0 : index
    %252 = vector.load %arg4[%c1_127, %c0_128, %c0_129] : memref<2x128x512xbf16, #tpu.memory_space<vmem>>, vector<1x128x512xbf16>
    %253 = vector.shape_cast %252 : vector<1x128x512xbf16> to vector<128x512xbf16>
    %cst_130 = arith.constant dense<0.000000e+00> : vector<1x512xf32>
    %254 = tpu.matmul %251, %253, %cst_130 {dimension_numbers = #tpu.dot_dimension_numbers<[1], [0], [0], [1], [0, 0, 1, 1], [], []>} : vector<1x128xbf16>, vector<128x512xbf16>, vector<1x512xf32> -> vector<1x512xf32>
    %255 = arith.addf %250, %254 : vector<1x512xf32>
    %256 = math.tanh %243 : vector<1x512xf32>
    %257 = vector.extract_strided_slice %256 {offsets = [0, 0], sizes = [1, 128], strides = [1, 1]} : vector<1x512xf32> to vector<1x128xf32>
    %cst_131 = arith.constant 5.000000e-01 : f32
    %258 = vector.broadcast %cst_131 : f32 to vector<1x128xf32>
    %259 = arith.mulf %258, %257 : vector<1x128xf32>
    %cst_132 = arith.constant 5.000000e-01 : f32
    %260 = vector.broadcast %cst_132 : f32 to vector<1x128xf32>
    %261 = arith.addf %260, %259 : vector<1x128xf32>
    %262 = vector.extract_strided_slice %256 {offsets = [0, 128], sizes = [1, 128], strides = [1, 1]} : vector<1x512xf32> to vector<1x128xf32>
    %cst_133 = arith.constant 5.000000e-01 : f32
    %263 = vector.broadcast %cst_133 : f32 to vector<1x128xf32>
    %264 = arith.mulf %263, %262 : vector<1x128xf32>
    %cst_134 = arith.constant 5.000000e-01 : f32
    %265 = vector.broadcast %cst_134 : f32 to vector<1x128xf32>
    %266 = arith.addf %265, %264 : vector<1x128xf32>
    %267 = vector.extract_strided_slice %256 {offsets = [0, 256], sizes = [1, 128], strides = [1, 1]} : vector<1x512xf32> to vector<1x128xf32>
    %268 = vector.extract_strided_slice %256 {offsets = [0, 384], sizes = [1, 128], strides = [1, 1]} : vector<1x512xf32> to vector<1x128xf32>
    %cst_135 = arith.constant 5.000000e-01 : f32
    %269 = vector.broadcast %cst_135 : f32 to vector<1x128xf32>
    %270 = arith.mulf %269, %268 : vector<1x128xf32>
    %cst_136 = arith.constant 5.000000e-01 : f32
    %271 = vector.broadcast %cst_136 : f32 to vector<1x128xf32>
    %272 = arith.addf %271, %270 : vector<1x128xf32>
    %273 = arith.mulf %266, %212 : vector<1x128xf32>
    %274 = arith.mulf %261, %267 : vector<1x128xf32>
    %275 = arith.addf %273, %274 : vector<1x128xf32>
    %276 = math.tanh %275 : vector<1x128xf32>
    %277 = arith.mulf %272, %276 : vector<1x128xf32>
    %278 = math.tanh %255 : vector<1x512xf32>
    %279 = vector.extract_strided_slice %278 {offsets = [0, 0], sizes = [1, 128], strides = [1, 1]} : vector<1x512xf32> to vector<1x128xf32>
    %cst_137 = arith.constant 5.000000e-01 : f32
    %280 = vector.broadcast %cst_137 : f32 to vector<1x128xf32>
    %281 = arith.mulf %280, %279 : vector<1x128xf32>
    %cst_138 = arith.constant 5.000000e-01 : f32
    %282 = vector.broadcast %cst_138 : f32 to vector<1x128xf32>
    %283 = arith.addf %282, %281 : vector<1x128xf32>
    %284 = vector.extract_strided_slice %278 {offsets = [0, 128], sizes = [1, 128], strides = [1, 1]} : vector<1x512xf32> to vector<1x128xf32>
    %cst_139 = arith.constant 5.000000e-01 : f32
    %285 = vector.broadcast %cst_139 : f32 to vector<1x128xf32>
    %286 = arith.mulf %285, %284 : vector<1x128xf32>
    %cst_140 = arith.constant 5.000000e-01 : f32
    %287 = vector.broadcast %cst_140 : f32 to vector<1x128xf32>
    %288 = arith.addf %287, %286 : vector<1x128xf32>
    %289 = vector.extract_strided_slice %278 {offsets = [0, 256], sizes = [1, 128], strides = [1, 1]} : vector<1x512xf32> to vector<1x128xf32>
    %290 = vector.extract_strided_slice %278 {offsets = [0, 384], sizes = [1, 128], strides = [1, 1]} : vector<1x512xf32> to vector<1x128xf32>
    %cst_141 = arith.constant 5.000000e-01 : f32
    %291 = vector.broadcast %cst_141 : f32 to vector<1x128xf32>
    %292 = arith.mulf %291, %290 : vector<1x128xf32>
    %cst_142 = arith.constant 5.000000e-01 : f32
    %293 = vector.broadcast %cst_142 : f32 to vector<1x128xf32>
    %294 = arith.addf %293, %292 : vector<1x128xf32>
    %295 = arith.mulf %288, %234 : vector<1x128xf32>
    %296 = arith.mulf %283, %289 : vector<1x128xf32>
    %297 = arith.addf %295, %296 : vector<1x128xf32>
    %298 = math.tanh %297 : vector<1x128xf32>
    %299 = arith.mulf %294, %298 : vector<1x128xf32>
    %c3 = arith.constant 3 : index
    %c0_143 = arith.constant 0 : index
    %300 = vector.load %arg8[%c3, %c0_143] : memref<8x128xf32, #tpu.memory_space<vmem>>, vector<1x128xf32>
    tpu.vector_store %arg8[%c3, %c0_143], %299 {strides = array<i32>} : memref<8x128xf32, #tpu.memory_space<vmem>>, vector<1x128xf32>,
    %301 = vector.extract_strided_slice %16 {offsets = [5, 0], sizes = [1, 512], strides = [1, 1]} : vector<8x512xf32> to vector<1x512xf32>
    %302 = arith.truncf %277 : vector<1x128xf32> to vector<1x128xbf16>
    %c0_144 = arith.constant 0 : index
    %c0_145 = arith.constant 0 : index
    %c0_146 = arith.constant 0 : index
    %303 = vector.load %arg4[%c0_144, %c0_145, %c0_146] : memref<2x128x512xbf16, #tpu.memory_space<vmem>>, vector<1x128x512xbf16>
    %304 = vector.shape_cast %303 : vector<1x128x512xbf16> to vector<128x512xbf16>
    %cst_147 = arith.constant dense<0.000000e+00> : vector<1x512xf32>
    %305 = tpu.matmul %302, %304, %cst_147 {dimension_numbers = #tpu.dot_dimension_numbers<[1], [0], [0], [1], [0, 0, 1, 1], [], []>} : vector<1x128xbf16>, vector<128x512xbf16>, vector<1x512xf32> -> vector<1x512xf32>
    %306 = arith.addf %301, %305 : vector<1x512xf32>
    %c1_148 = arith.constant 1 : index
    %c0_149 = arith.constant 0 : index
    %c0_150 = arith.constant 0 : index
    %307 = vector.load %arg5[%c1_148, %c0_149, %c0_150] : memref<2x1x512xf32, #tpu.memory_space<vmem>>, vector<1x1x512xf32>
    %308 = vector.shape_cast %307 : vector<1x1x512xf32> to vector<1x512xf32>
    %309 = arith.truncf %277 : vector<1x128xf32> to vector<1x128xbf16>
    %c1_151 = arith.constant 1 : index
    %c0_152 = arith.constant 0 : index
    %c0_153 = arith.constant 0 : index
    %310 = vector.load %arg3[%c1_151, %c0_152, %c0_153] : memref<2x128x512xbf16, #tpu.memory_space<vmem>>, vector<1x128x512xbf16>
    %311 = vector.shape_cast %310 : vector<1x128x512xbf16> to vector<128x512xbf16>
    %cst_154 = arith.constant dense<0.000000e+00> : vector<1x512xf32>
    %312 = tpu.matmul %309, %311, %cst_154 {dimension_numbers = #tpu.dot_dimension_numbers<[1], [0], [0], [1], [0, 0, 1, 1], [], []>} : vector<1x128xbf16>, vector<128x512xbf16>, vector<1x512xf32> -> vector<1x512xf32>
    %313 = arith.addf %308, %312 : vector<1x512xf32>
    %314 = arith.truncf %299 : vector<1x128xf32> to vector<1x128xbf16>
    %c1_155 = arith.constant 1 : index
    %c0_156 = arith.constant 0 : index
    %c0_157 = arith.constant 0 : index
    %315 = vector.load %arg4[%c1_155, %c0_156, %c0_157] : memref<2x128x512xbf16, #tpu.memory_space<vmem>>, vector<1x128x512xbf16>
    %316 = vector.shape_cast %315 : vector<1x128x512xbf16> to vector<128x512xbf16>
    %cst_158 = arith.constant dense<0.000000e+00> : vector<1x512xf32>
    %317 = tpu.matmul %314, %316, %cst_158 {dimension_numbers = #tpu.dot_dimension_numbers<[1], [0], [0], [1], [0, 0, 1, 1], [], []>} : vector<1x128xbf16>, vector<128x512xbf16>, vector<1x512xf32> -> vector<1x512xf32>
    %318 = arith.addf %313, %317 : vector<1x512xf32>
    %319 = math.tanh %306 : vector<1x512xf32>
    %320 = vector.extract_strided_slice %319 {offsets = [0, 0], sizes = [1, 128], strides = [1, 1]} : vector<1x512xf32> to vector<1x128xf32>
    %cst_159 = arith.constant 5.000000e-01 : f32
    %321 = vector.broadcast %cst_159 : f32 to vector<1x128xf32>
    %322 = arith.mulf %321, %320 : vector<1x128xf32>
    %cst_160 = arith.constant 5.000000e-01 : f32
    %323 = vector.broadcast %cst_160 : f32 to vector<1x128xf32>
    %324 = arith.addf %323, %322 : vector<1x128xf32>
    %325 = vector.extract_strided_slice %319 {offsets = [0, 128], sizes = [1, 128], strides = [1, 1]} : vector<1x512xf32> to vector<1x128xf32>
    %cst_161 = arith.constant 5.000000e-01 : f32
    %326 = vector.broadcast %cst_161 : f32 to vector<1x128xf32>
    %327 = arith.mulf %326, %325 : vector<1x128xf32>
    %cst_162 = arith.constant 5.000000e-01 : f32
    %328 = vector.broadcast %cst_162 : f32 to vector<1x128xf32>
    %329 = arith.addf %328, %327 : vector<1x128xf32>
    %330 = vector.extract_strided_slice %319 {offsets = [0, 256], sizes = [1, 128], strides = [1, 1]} : vector<1x512xf32> to vector<1x128xf32>
    %331 = vector.extract_strided_slice %319 {offsets = [0, 384], sizes = [1, 128], strides = [1, 1]} : vector<1x512xf32> to vector<1x128xf32>
    %cst_163 = arith.constant 5.000000e-01 : f32
    %332 = vector.broadcast %cst_163 : f32 to vector<1x128xf32>
    %333 = arith.mulf %332, %331 : vector<1x128xf32>
    %cst_164 = arith.constant 5.000000e-01 : f32
    %334 = vector.broadcast %cst_164 : f32 to vector<1x128xf32>
    %335 = arith.addf %334, %333 : vector<1x128xf32>
    %336 = arith.mulf %329, %275 : vector<1x128xf32>
    %337 = arith.mulf %324, %330 : vector<1x128xf32>
    %338 = arith.addf %336, %337 : vector<1x128xf32>
    %339 = math.tanh %338 : vector<1x128xf32>
    %340 = arith.mulf %335, %339 : vector<1x128xf32>
    %341 = math.tanh %318 : vector<1x512xf32>
    %342 = vector.extract_strided_slice %341 {offsets = [0, 0], sizes = [1, 128], strides = [1, 1]} : vector<1x512xf32> to vector<1x128xf32>
    %cst_165 = arith.constant 5.000000e-01 : f32
    %343 = vector.broadcast %cst_165 : f32 to vector<1x128xf32>
    %344 = arith.mulf %343, %342 : vector<1x128xf32>
    %cst_166 = arith.constant 5.000000e-01 : f32
    %345 = vector.broadcast %cst_166 : f32 to vector<1x128xf32>
    %346 = arith.addf %345, %344 : vector<1x128xf32>
    %347 = vector.extract_strided_slice %341 {offsets = [0, 128], sizes = [1, 128], strides = [1, 1]} : vector<1x512xf32> to vector<1x128xf32>
    %cst_167 = arith.constant 5.000000e-01 : f32
    %348 = vector.broadcast %cst_167 : f32 to vector<1x128xf32>
    %349 = arith.mulf %348, %347 : vector<1x128xf32>
    %cst_168 = arith.constant 5.000000e-01 : f32
    %350 = vector.broadcast %cst_168 : f32 to vector<1x128xf32>
    %351 = arith.addf %350, %349 : vector<1x128xf32>
    %352 = vector.extract_strided_slice %341 {offsets = [0, 256], sizes = [1, 128], strides = [1, 1]} : vector<1x512xf32> to vector<1x128xf32>
    %353 = vector.extract_strided_slice %341 {offsets = [0, 384], sizes = [1, 128], strides = [1, 1]} : vector<1x512xf32> to vector<1x128xf32>
    %cst_169 = arith.constant 5.000000e-01 : f32
    %354 = vector.broadcast %cst_169 : f32 to vector<1x128xf32>
    %355 = arith.mulf %354, %353 : vector<1x128xf32>
    %cst_170 = arith.constant 5.000000e-01 : f32
    %356 = vector.broadcast %cst_170 : f32 to vector<1x128xf32>
    %357 = arith.addf %356, %355 : vector<1x128xf32>
    %358 = arith.mulf %351, %297 : vector<1x128xf32>
    %359 = arith.mulf %346, %352 : vector<1x128xf32>
    %360 = arith.addf %358, %359 : vector<1x128xf32>
    %361 = math.tanh %360 : vector<1x128xf32>
    %362 = arith.mulf %357, %361 : vector<1x128xf32>
    %c4 = arith.constant 4 : index
    %c0_171 = arith.constant 0 : index
    %363 = vector.load %arg8[%c4, %c0_171] : memref<8x128xf32, #tpu.memory_space<vmem>>, vector<1x128xf32>
    tpu.vector_store %arg8[%c4, %c0_171], %362 {strides = array<i32>} : memref<8x128xf32, #tpu.memory_space<vmem>>, vector<1x128xf32>,
    %364 = vector.extract_strided_slice %16 {offsets = [6, 0], sizes = [1, 512], strides = [1, 1]} : vector<8x512xf32> to vector<1x512xf32>
    %365 = arith.truncf %340 : vector<1x128xf32> to vector<1x128xbf16>
    %c0_172 = arith.constant 0 : index
    %c0_173 = arith.constant 0 : index
    %c0_174 = arith.constant 0 : index
    %366 = vector.load %arg4[%c0_172, %c0_173, %c0_174] : memref<2x128x512xbf16, #tpu.memory_space<vmem>>, vector<1x128x512xbf16>
    %367 = vector.shape_cast %366 : vector<1x128x512xbf16> to vector<128x512xbf16>
    %cst_175 = arith.constant dense<0.000000e+00> : vector<1x512xf32>
    %368 = tpu.matmul %365, %367, %cst_175 {dimension_numbers = #tpu.dot_dimension_numbers<[1], [0], [0], [1], [0, 0, 1, 1], [], []>} : vector<1x128xbf16>, vector<128x512xbf16>, vector<1x512xf32> -> vector<1x512xf32>
    %369 = arith.addf %364, %368 : vector<1x512xf32>
    %c1_176 = arith.constant 1 : index
    %c0_177 = arith.constant 0 : index
    %c0_178 = arith.constant 0 : index
    %370 = vector.load %arg5[%c1_176, %c0_177, %c0_178] : memref<2x1x512xf32, #tpu.memory_space<vmem>>, vector<1x1x512xf32>
    %371 = vector.shape_cast %370 : vector<1x1x512xf32> to vector<1x512xf32>
    %372 = arith.truncf %340 : vector<1x128xf32> to vector<1x128xbf16>
    %c1_179 = arith.constant 1 : index
    %c0_180 = arith.constant 0 : index
    %c0_181 = arith.constant 0 : index
    %373 = vector.load %arg3[%c1_179, %c0_180, %c0_181] : memref<2x128x512xbf16, #tpu.memory_space<vmem>>, vector<1x128x512xbf16>
    %374 = vector.shape_cast %373 : vector<1x128x512xbf16> to vector<128x512xbf16>
    %cst_182 = arith.constant dense<0.000000e+00> : vector<1x512xf32>
    %375 = tpu.matmul %372, %374, %cst_182 {dimension_numbers = #tpu.dot_dimension_numbers<[1], [0], [0], [1], [0, 0, 1, 1], [], []>} : vector<1x128xbf16>, vector<128x512xbf16>, vector<1x512xf32> -> vector<1x512xf32>
    %376 = arith.addf %371, %375 : vector<1x512xf32>
    %377 = arith.truncf %362 : vector<1x128xf32> to vector<1x128xbf16>
    %c1_183 = arith.constant 1 : index
    %c0_184 = arith.constant 0 : index
    %c0_185 = arith.constant 0 : index
    %378 = vector.load %arg4[%c1_183, %c0_184, %c0_185] : memref<2x128x512xbf16, #tpu.memory_space<vmem>>, vector<1x128x512xbf16>
    %379 = vector.shape_cast %378 : vector<1x128x512xbf16> to vector<128x512xbf16>
    %cst_186 = arith.constant dense<0.000000e+00> : vector<1x512xf32>
    %380 = tpu.matmul %377, %379, %cst_186 {dimension_numbers = #tpu.dot_dimension_numbers<[1], [0], [0], [1], [0, 0, 1, 1], [], []>} : vector<1x128xbf16>, vector<128x512xbf16>, vector<1x512xf32> -> vector<1x512xf32>
    %381 = arith.addf %376, %380 : vector<1x512xf32>
    %382 = math.tanh %369 : vector<1x512xf32>
    %383 = vector.extract_strided_slice %382 {offsets = [0, 0], sizes = [1, 128], strides = [1, 1]} : vector<1x512xf32> to vector<1x128xf32>
    %cst_187 = arith.constant 5.000000e-01 : f32
    %384 = vector.broadcast %cst_187 : f32 to vector<1x128xf32>
    %385 = arith.mulf %384, %383 : vector<1x128xf32>
    %cst_188 = arith.constant 5.000000e-01 : f32
    %386 = vector.broadcast %cst_188 : f32 to vector<1x128xf32>
    %387 = arith.addf %386, %385 : vector<1x128xf32>
    %388 = vector.extract_strided_slice %382 {offsets = [0, 128], sizes = [1, 128], strides = [1, 1]} : vector<1x512xf32> to vector<1x128xf32>
    %cst_189 = arith.constant 5.000000e-01 : f32
    %389 = vector.broadcast %cst_189 : f32 to vector<1x128xf32>
    %390 = arith.mulf %389, %388 : vector<1x128xf32>
    %cst_190 = arith.constant 5.000000e-01 : f32
    %391 = vector.broadcast %cst_190 : f32 to vector<1x128xf32>
    %392 = arith.addf %391, %390 : vector<1x128xf32>
    %393 = vector.extract_strided_slice %382 {offsets = [0, 256], sizes = [1, 128], strides = [1, 1]} : vector<1x512xf32> to vector<1x128xf32>
    %394 = vector.extract_strided_slice %382 {offsets = [0, 384], sizes = [1, 128], strides = [1, 1]} : vector<1x512xf32> to vector<1x128xf32>
    %cst_191 = arith.constant 5.000000e-01 : f32
    %395 = vector.broadcast %cst_191 : f32 to vector<1x128xf32>
    %396 = arith.mulf %395, %394 : vector<1x128xf32>
    %cst_192 = arith.constant 5.000000e-01 : f32
    %397 = vector.broadcast %cst_192 : f32 to vector<1x128xf32>
    %398 = arith.addf %397, %396 : vector<1x128xf32>
    %399 = arith.mulf %392, %338 : vector<1x128xf32>
    %400 = arith.mulf %387, %393 : vector<1x128xf32>
    %401 = arith.addf %399, %400 : vector<1x128xf32>
    %402 = math.tanh %401 : vector<1x128xf32>
    %403 = arith.mulf %398, %402 : vector<1x128xf32>
    %404 = math.tanh %381 : vector<1x512xf32>
    %405 = vector.extract_strided_slice %404 {offsets = [0, 0], sizes = [1, 128], strides = [1, 1]} : vector<1x512xf32> to vector<1x128xf32>
    %cst_193 = arith.constant 5.000000e-01 : f32
    %406 = vector.broadcast %cst_193 : f32 to vector<1x128xf32>
    %407 = arith.mulf %406, %405 : vector<1x128xf32>
    %cst_194 = arith.constant 5.000000e-01 : f32
    %408 = vector.broadcast %cst_194 : f32 to vector<1x128xf32>
    %409 = arith.addf %408, %407 : vector<1x128xf32>
    %410 = vector.extract_strided_slice %404 {offsets = [0, 128], sizes = [1, 128], strides = [1, 1]} : vector<1x512xf32> to vector<1x128xf32>
    %cst_195 = arith.constant 5.000000e-01 : f32
    %411 = vector.broadcast %cst_195 : f32 to vector<1x128xf32>
    %412 = arith.mulf %411, %410 : vector<1x128xf32>
    %cst_196 = arith.constant 5.000000e-01 : f32
    %413 = vector.broadcast %cst_196 : f32 to vector<1x128xf32>
    %414 = arith.addf %413, %412 : vector<1x128xf32>
    %415 = vector.extract_strided_slice %404 {offsets = [0, 256], sizes = [1, 128], strides = [1, 1]} : vector<1x512xf32> to vector<1x128xf32>
    %416 = vector.extract_strided_slice %404 {offsets = [0, 384], sizes = [1, 128], strides = [1, 1]} : vector<1x512xf32> to vector<1x128xf32>
    %cst_197 = arith.constant 5.000000e-01 : f32
    %417 = vector.broadcast %cst_197 : f32 to vector<1x128xf32>
    %418 = arith.mulf %417, %416 : vector<1x128xf32>
    %cst_198 = arith.constant 5.000000e-01 : f32
    %419 = vector.broadcast %cst_198 : f32 to vector<1x128xf32>
    %420 = arith.addf %419, %418 : vector<1x128xf32>
    %421 = arith.mulf %414, %360 : vector<1x128xf32>
    %422 = arith.mulf %409, %415 : vector<1x128xf32>
    %423 = arith.addf %421, %422 : vector<1x128xf32>
    %424 = math.tanh %423 : vector<1x128xf32>
    %425 = arith.mulf %420, %424 : vector<1x128xf32>
    %c5 = arith.constant 5 : index
    %c0_199 = arith.constant 0 : index
    %426 = vector.load %arg8[%c5, %c0_199] : memref<8x128xf32, #tpu.memory_space<vmem>>, vector<1x128xf32>
    tpu.vector_store %arg8[%c5, %c0_199], %425 {strides = array<i32>} : memref<8x128xf32, #tpu.memory_space<vmem>>, vector<1x128xf32>,
    %427 = vector.extract_strided_slice %16 {offsets = [7, 0], sizes = [1, 512], strides = [1, 1]} : vector<8x512xf32> to vector<1x512xf32>
    %428 = arith.truncf %403 : vector<1x128xf32> to vector<1x128xbf16>
    %c0_200 = arith.constant 0 : index
    %c0_201 = arith.constant 0 : index
    %c0_202 = arith.constant 0 : index
    %429 = vector.load %arg4[%c0_200, %c0_201, %c0_202] : memref<2x128x512xbf16, #tpu.memory_space<vmem>>, vector<1x128x512xbf16>
    %430 = vector.shape_cast %429 : vector<1x128x512xbf16> to vector<128x512xbf16>
    %cst_203 = arith.constant dense<0.000000e+00> : vector<1x512xf32>
    %431 = tpu.matmul %428, %430, %cst_203 {dimension_numbers = #tpu.dot_dimension_numbers<[1], [0], [0], [1], [0, 0, 1, 1], [], []>} : vector<1x128xbf16>, vector<128x512xbf16>, vector<1x512xf32> -> vector<1x512xf32>
    %432 = arith.addf %427, %431 : vector<1x512xf32>
    %c1_204 = arith.constant 1 : index
    %c0_205 = arith.constant 0 : index
    %c0_206 = arith.constant 0 : index
    %433 = vector.load %arg5[%c1_204, %c0_205, %c0_206] : memref<2x1x512xf32, #tpu.memory_space<vmem>>, vector<1x1x512xf32>
    %434 = vector.shape_cast %433 : vector<1x1x512xf32> to vector<1x512xf32>
    %435 = arith.truncf %403 : vector<1x128xf32> to vector<1x128xbf16>
    %c1_207 = arith.constant 1 : index
    %c0_208 = arith.constant 0 : index
    %c0_209 = arith.constant 0 : index
    %436 = vector.load %arg3[%c1_207, %c0_208, %c0_209] : memref<2x128x512xbf16, #tpu.memory_space<vmem>>, vector<1x128x512xbf16>
    %437 = vector.shape_cast %436 : vector<1x128x512xbf16> to vector<128x512xbf16>
    %cst_210 = arith.constant dense<0.000000e+00> : vector<1x512xf32>
    %438 = tpu.matmul %435, %437, %cst_210 {dimension_numbers = #tpu.dot_dimension_numbers<[1], [0], [0], [1], [0, 0, 1, 1], [], []>} : vector<1x128xbf16>, vector<128x512xbf16>, vector<1x512xf32> -> vector<1x512xf32>
    %439 = arith.addf %434, %438 : vector<1x512xf32>
    %440 = arith.truncf %425 : vector<1x128xf32> to vector<1x128xbf16>
    %c1_211 = arith.constant 1 : index
    %c0_212 = arith.constant 0 : index
    %c0_213 = arith.constant 0 : index
    %441 = vector.load %arg4[%c1_211, %c0_212, %c0_213] : memref<2x128x512xbf16, #tpu.memory_space<vmem>>, vector<1x128x512xbf16>
    %442 = vector.shape_cast %441 : vector<1x128x512xbf16> to vector<128x512xbf16>
    %cst_214 = arith.constant dense<0.000000e+00> : vector<1x512xf32>
    %443 = tpu.matmul %440, %442, %cst_214 {dimension_numbers = #tpu.dot_dimension_numbers<[1], [0], [0], [1], [0, 0, 1, 1], [], []>} : vector<1x128xbf16>, vector<128x512xbf16>, vector<1x512xf32> -> vector<1x512xf32>
    %444 = arith.addf %439, %443 : vector<1x512xf32>
    %445 = math.tanh %432 : vector<1x512xf32>
    %446 = vector.extract_strided_slice %445 {offsets = [0, 0], sizes = [1, 128], strides = [1, 1]} : vector<1x512xf32> to vector<1x128xf32>
    %cst_215 = arith.constant 5.000000e-01 : f32
    %447 = vector.broadcast %cst_215 : f32 to vector<1x128xf32>
    %448 = arith.mulf %447, %446 : vector<1x128xf32>
    %cst_216 = arith.constant 5.000000e-01 : f32
    %449 = vector.broadcast %cst_216 : f32 to vector<1x128xf32>
    %450 = arith.addf %449, %448 : vector<1x128xf32>
    %451 = vector.extract_strided_slice %445 {offsets = [0, 128], sizes = [1, 128], strides = [1, 1]} : vector<1x512xf32> to vector<1x128xf32>
    %cst_217 = arith.constant 5.000000e-01 : f32
    %452 = vector.broadcast %cst_217 : f32 to vector<1x128xf32>
    %453 = arith.mulf %452, %451 : vector<1x128xf32>
    %cst_218 = arith.constant 5.000000e-01 : f32
    %454 = vector.broadcast %cst_218 : f32 to vector<1x128xf32>
    %455 = arith.addf %454, %453 : vector<1x128xf32>
    %456 = vector.extract_strided_slice %445 {offsets = [0, 256], sizes = [1, 128], strides = [1, 1]} : vector<1x512xf32> to vector<1x128xf32>
    %457 = vector.extract_strided_slice %445 {offsets = [0, 384], sizes = [1, 128], strides = [1, 1]} : vector<1x512xf32> to vector<1x128xf32>
    %cst_219 = arith.constant 5.000000e-01 : f32
    %458 = vector.broadcast %cst_219 : f32 to vector<1x128xf32>
    %459 = arith.mulf %458, %457 : vector<1x128xf32>
    %cst_220 = arith.constant 5.000000e-01 : f32
    %460 = vector.broadcast %cst_220 : f32 to vector<1x128xf32>
    %461 = arith.addf %460, %459 : vector<1x128xf32>
    %462 = arith.mulf %455, %401 : vector<1x128xf32>
    %463 = arith.mulf %450, %456 : vector<1x128xf32>
    %464 = arith.addf %462, %463 : vector<1x128xf32>
    %465 = math.tanh %464 : vector<1x128xf32>
    %466 = arith.mulf %461, %465 : vector<1x128xf32>
    %467 = math.tanh %444 : vector<1x512xf32>
    %468 = vector.extract_strided_slice %467 {offsets = [0, 0], sizes = [1, 128], strides = [1, 1]} : vector<1x512xf32> to vector<1x128xf32>
    %cst_221 = arith.constant 5.000000e-01 : f32
    %469 = vector.broadcast %cst_221 : f32 to vector<1x128xf32>
    %470 = arith.mulf %469, %468 : vector<1x128xf32>
    %cst_222 = arith.constant 5.000000e-01 : f32
    %471 = vector.broadcast %cst_222 : f32 to vector<1x128xf32>
    %472 = arith.addf %471, %470 : vector<1x128xf32>
    %473 = vector.extract_strided_slice %467 {offsets = [0, 128], sizes = [1, 128], strides = [1, 1]} : vector<1x512xf32> to vector<1x128xf32>
    %cst_223 = arith.constant 5.000000e-01 : f32
    %474 = vector.broadcast %cst_223 : f32 to vector<1x128xf32>
    %475 = arith.mulf %474, %473 : vector<1x128xf32>
    %cst_224 = arith.constant 5.000000e-01 : f32
    %476 = vector.broadcast %cst_224 : f32 to vector<1x128xf32>
    %477 = arith.addf %476, %475 : vector<1x128xf32>
    %478 = vector.extract_strided_slice %467 {offsets = [0, 256], sizes = [1, 128], strides = [1, 1]} : vector<1x512xf32> to vector<1x128xf32>
    %479 = vector.extract_strided_slice %467 {offsets = [0, 384], sizes = [1, 128], strides = [1, 1]} : vector<1x512xf32> to vector<1x128xf32>
    %cst_225 = arith.constant 5.000000e-01 : f32
    %480 = vector.broadcast %cst_225 : f32 to vector<1x128xf32>
    %481 = arith.mulf %480, %479 : vector<1x128xf32>
    %cst_226 = arith.constant 5.000000e-01 : f32
    %482 = vector.broadcast %cst_226 : f32 to vector<1x128xf32>
    %483 = arith.addf %482, %481 : vector<1x128xf32>
    %484 = arith.mulf %477, %423 : vector<1x128xf32>
    %485 = arith.mulf %472, %478 : vector<1x128xf32>
    %486 = arith.addf %484, %485 : vector<1x128xf32>
    %487 = math.tanh %486 : vector<1x128xf32>
    %488 = arith.mulf %483, %487 : vector<1x128xf32>
    %c6 = arith.constant 6 : index
    %c0_227 = arith.constant 0 : index
    %489 = vector.load %arg8[%c6, %c0_227] : memref<8x128xf32, #tpu.memory_space<vmem>>, vector<1x128xf32>
    tpu.vector_store %arg8[%c6, %c0_227], %488 {strides = array<i32>} : memref<8x128xf32, #tpu.memory_space<vmem>>, vector<1x128xf32>,
    %c1_228 = arith.constant 1 : index
    %c0_229 = arith.constant 0 : index
    %c0_230 = arith.constant 0 : index
    %490 = vector.load %arg5[%c1_228, %c0_229, %c0_230] : memref<2x1x512xf32, #tpu.memory_space<vmem>>, vector<1x1x512xf32>
    %491 = vector.shape_cast %490 : vector<1x1x512xf32> to vector<1x512xf32>
    %492 = arith.truncf %466 : vector<1x128xf32> to vector<1x128xbf16>
    %c1_231 = arith.constant 1 : index
    %c0_232 = arith.constant 0 : index
    %c0_233 = arith.constant 0 : index
    %493 = vector.load %arg3[%c1_231, %c0_232, %c0_233] : memref<2x128x512xbf16, #tpu.memory_space<vmem>>, vector<1x128x512xbf16>
    %494 = vector.shape_cast %493 : vector<1x128x512xbf16> to vector<128x512xbf16>
    %cst_234 = arith.constant dense<0.000000e+00> : vector<1x512xf32>
    %495 = tpu.matmul %492, %494, %cst_234 {dimension_numbers = #tpu.dot_dimension_numbers<[1], [0], [0], [1], [0, 0, 1, 1], [], []>} : vector<1x128xbf16>, vector<128x512xbf16>, vector<1x512xf32> -> vector<1x512xf32>
    %496 = arith.addf %491, %495 : vector<1x512xf32>
    %497 = arith.truncf %488 : vector<1x128xf32> to vector<1x128xbf16>
    %c1_235 = arith.constant 1 : index
    %c0_236 = arith.constant 0 : index
    %c0_237 = arith.constant 0 : index
    %498 = vector.load %arg4[%c1_235, %c0_236, %c0_237] : memref<2x128x512xbf16, #tpu.memory_space<vmem>>, vector<1x128x512xbf16>
    %499 = vector.shape_cast %498 : vector<1x128x512xbf16> to vector<128x512xbf16>
    %cst_238 = arith.constant dense<0.000000e+00> : vector<1x512xf32>
    %500 = tpu.matmul %497, %499, %cst_238 {dimension_numbers = #tpu.dot_dimension_numbers<[1], [0], [0], [1], [0, 0, 1, 1], [], []>} : vector<1x128xbf16>, vector<128x512xbf16>, vector<1x512xf32> -> vector<1x512xf32>
    %501 = arith.addf %496, %500 : vector<1x512xf32>
    %502 = math.tanh %501 : vector<1x512xf32>
    %503 = vector.extract_strided_slice %502 {offsets = [0, 0], sizes = [1, 128], strides = [1, 1]} : vector<1x512xf32> to vector<1x128xf32>
    %cst_239 = arith.constant 5.000000e-01 : f32
    %504 = vector.broadcast %cst_239 : f32 to vector<1x128xf32>
    %505 = arith.mulf %504, %503 : vector<1x128xf32>
    %cst_240 = arith.constant 5.000000e-01 : f32
    %506 = vector.broadcast %cst_240 : f32 to vector<1x128xf32>
    %507 = arith.addf %506, %505 : vector<1x128xf32>
    %508 = vector.extract_strided_slice %502 {offsets = [0, 128], sizes = [1, 128], strides = [1, 1]} : vector<1x512xf32> to vector<1x128xf32>
    %cst_241 = arith.constant 5.000000e-01 : f32
    %509 = vector.broadcast %cst_241 : f32 to vector<1x128xf32>
    %510 = arith.mulf %509, %508 : vector<1x128xf32>
    %cst_242 = arith.constant 5.000000e-01 : f32
    %511 = vector.broadcast %cst_242 : f32 to vector<1x128xf32>
    %512 = arith.addf %511, %510 : vector<1x128xf32>
    %513 = vector.extract_strided_slice %502 {offsets = [0, 256], sizes = [1, 128], strides = [1, 1]} : vector<1x512xf32> to vector<1x128xf32>
    %514 = vector.extract_strided_slice %502 {offsets = [0, 384], sizes = [1, 128], strides = [1, 1]} : vector<1x512xf32> to vector<1x128xf32>
    %cst_243 = arith.constant 5.000000e-01 : f32
    %515 = vector.broadcast %cst_243 : f32 to vector<1x128xf32>
    %516 = arith.mulf %515, %514 : vector<1x128xf32>
    %cst_244 = arith.constant 5.000000e-01 : f32
    %517 = vector.broadcast %cst_244 : f32 to vector<1x128xf32>
    %518 = arith.addf %517, %516 : vector<1x128xf32>
    %519 = arith.mulf %512, %486 : vector<1x128xf32>
    %520 = arith.mulf %507, %513 : vector<1x128xf32>
    %521 = arith.addf %519, %520 : vector<1x128xf32>
    %522 = math.tanh %521 : vector<1x128xf32>
    %523 = arith.mulf %518, %522 : vector<1x128xf32>
    %c7 = arith.constant 7 : index
    %c0_245 = arith.constant 0 : index
    %524 = vector.load %arg8[%c7, %c0_245] : memref<8x128xf32, #tpu.memory_space<vmem>>, vector<1x128xf32>
    tpu.vector_store %arg8[%c7, %c0_245], %523 {strides = array<i32>} : memref<8x128xf32, #tpu.memory_space<vmem>>, vector<1x128xf32>,
    %c0_246 = arith.constant 0 : index
    %c0_247 = arith.constant 0 : index
    %525 = vector.load %arg9[%c0_246, %c0_247] : memref<2x128xf32, #tpu.memory_space<vmem>>, vector<1x128xf32>
    tpu.vector_store %arg9[%c0_246, %c0_247], %466 {strides = array<i32>} : memref<2x128xf32, #tpu.memory_space<vmem>>, vector<1x128xf32>,
    %c0_248 = arith.constant 0 : index
    %c0_249 = arith.constant 0 : index
    %526 = vector.load %arg10[%c0_248, %c0_249] : memref<2x128xf32, #tpu.memory_space<vmem>>, vector<1x128xf32>
    tpu.vector_store %arg10[%c0_248, %c0_249], %464 {strides = array<i32>} : memref<2x128xf32, #tpu.memory_space<vmem>>, vector<1x128xf32>,
    %c1_250 = arith.constant 1 : index
    %c0_251 = arith.constant 0 : index
    %527 = vector.load %arg9[%c1_250, %c0_251] : memref<2x128xf32, #tpu.memory_space<vmem>>, vector<1x128xf32>
    tpu.vector_store %arg9[%c1_250, %c0_251], %523 {strides = array<i32>} : memref<2x128xf32, #tpu.memory_space<vmem>>, vector<1x128xf32>,
    %c1_252 = arith.constant 1 : index
    %c0_253 = arith.constant 0 : index
    %528 = vector.load %arg10[%c1_252, %c0_253] : memref<2x128xf32, #tpu.memory_space<vmem>>, vector<1x128xf32>
    tpu.vector_store %arg10[%c1_252, %c0_253], %521 {strides = array<i32>} : memref<2x128xf32, #tpu.memory_space<vmem>>, vector<1x128xf32>,
    return
  }
}

</mosaic_0001>

<bundles_post_ra>
// kernel: tpu_custom_call.1
= control target key start
LH: loop header
LB: loop body
LE: loop exit
PB: predicated region body
PF: predicated region fallthrough
CT: control target
= control target key end

     0   :  { %16 = vsyncpa [#allocation3], 0  ;;  %s11476_s0 = inlined_call_operand.hbm [shape: f32[8,128], index: 0, kind: input, shape index: {}]   ;;  %s11477_s1 = inlined_call_operand.hbm [shape: bf16[128,128], index: 1, kind: input, shape index: {}]   ;;  %s11478_s2 = inlined_call_operand.hbm [shape: f32[1,128], index: 2, kind: input, shape index: {}]   ;;  %s11479_s3 = inlined_call_operand.hbm [shape: bf16[2,128,512], index: 3, kind: input, shape index: {}]   ;;  %s11480_s4 = inlined_call_operand.hbm [shape: bf16[2,128,512], index: 4, kind: input, shape index: {}]   ;;  %s11481_s5 = inlined_call_operand.vmem [shape: f32[2,1,512], index: 5, kind: input, shape index: {}]   ;;  %s11482_s6 = inlined_call_operand.vmem [shape: f32[2,128], index: 6, kind: input, shape index: {}]   ;;  %s11483_s7 = inlined_call_operand.vmem [shape: f32[2,128], index: 7, kind: input, shape index: {}]   ;;  %s11484_s8 = inlined_call_operand.hbm [shape: f32[8,128], index: 8, kind: output, shape index: {0}]   ;;  %s11485_s9 = inlined_call_operand.hbm [shape: f32[2,128], index: 9, kind: output, shape index: {1}]   ;;  %s11486_s10 = inlined_call_operand.hbm [shape: f32[2,128], index: 10, kind: output, shape index: {2}]  }
   0x1   :  { %17 = vsyncpa [#allocation6], 0 }
   0x2   :  { %18 = vsyncpa [#allocation9], 0 }
   0x3   :  { %19 = vsyncpa [#allocation4], 0 }
   0x4   :  { %20 = vsyncpa [#allocation13], 0  ;;  %s9643_s13 = smov [#allocation5]  }
   0x5   :  { %s36_s14 = sshll.u32 %s9643_s13, 4  ;;  %s37_s14 = int_to_ptr.vmem [resolvable:$true] %s36_s14 }
   0x6   :  { %s9481_s15 = scalar_lea.vmem %s37_s14, 1024  ;;  %p9486_p1 = scmp.lt.s32.totalorder %s37_s14, %s37_s14 }
   0x7   :  { %p9482_p0 = scmp.ne.s32.totalorder %s37_s14, %s9481_s15  ;;  %p9487_p2 = scmp.lt.s32.totalorder %s9481_s15, %s9481_s15 }
   0x9   :  { %p9488_p3 = por %p9487_p2, %p9486_p1 }
   0xb   :  { %p9489_p4 = pnand %p9488_p3, %p9482_p0 }
   0xd   :  { %9492 = shalt.err (!%p9489_p4)
}
   0xe   :  { %s9644_s16 = smov 64   ;;  %s9645_s17 = smov 4  }
   0xf   :  { %42 = dma.hbm_to_vmem [thread:$0]  %s11477_s1, 1024, %s37_s14, [#allocation6], %s9644_s16, %s9644_s16, %s9645_s17  }
  0x10   :  { %s9646_s20 = smov [#allocation8]  }
  0x11   :  { %s58_s21 = sshll.u32 %s9646_s20, 4  ;;  %s59_s21 = int_to_ptr.vmem [resolvable:$true] %s58_s21 }
  0x12   :  { %s9501_s22 = scalar_lea.vmem %s59_s21, 8192  ;;  %p9506_p6 = scmp.lt.s32.totalorder %s59_s21, %s59_s21 }
  0x13   :  { %p9502_p5 = scmp.ne.s32.totalorder %s59_s21, %s9501_s22  ;;  %p9507_p7 = scmp.lt.s32.totalorder %s9501_s22, %s9501_s22 }
  0x15   :  { %p9508_p8 = por %p9507_p7, %p9506_p6 }
  0x17   :  { %p9509_p9 = pnand %p9508_p8, %p9502_p5 }
  0x19   :  { %9512 = shalt.err (!%p9509_p9)
}
  0x1a   :  { %s9647_s23 = smov 256   ;;  %s9648_s24 = smov 16  }
  0x1b   :  { %64 = dma.hbm_to_vmem [thread:$0]  %s11479_s3, 8192, %s59_s21, [#allocation9], %s9647_s23, %s9647_s23, %s9648_s24  }
  0x1c   :  { %s9649_s1 = smov [#allocation2]   ;;  %s9650_s28 = smov [#allocation7]  }
  0x1d   :  { %s27_s27 = sshll.u32 %s9649_s1, 4  ;;  %s49_s29 = sshll.u32 %s9650_s28, 4  ;;  %s28_s27 = int_to_ptr.vmem [resolvable:$true] %s27_s27  ;;  %s50_s29 = int_to_ptr.vmem [resolvable:$true] %s49_s29 }
  0x1e   :  { %s9521_s30 = scalar_lea.vmem %s28_s27, 128  ;;  %p9526_p11 = scmp.lt.s32.totalorder %s28_s27, %s28_s27 }
  0x1f   :  { %p9522_p10 = scmp.ne.s32.totalorder %s28_s27, %s9521_s30  ;;  %p9527_p12 = scmp.lt.s32.totalorder %s9521_s30, %s9521_s30 }
  0x21   :  { %p9528_p13 = por %p9527_p12, %p9526_p11 }
  0x23   :  { %p9529_p0 = pnand %p9528_p13, %p9522_p10 }
  0x25   :  { %9532 = shalt.err (!%p9529_p0)
}
  0x26   :  { %30 = dma.hbm_to_vmem [thread:$0]  %s11476_s0, 128, %s28_s27, [#allocation3]  }
  0x27   :  { %s9541_s13 = scalar_lea.vmem %s50_s29, 16  ;;  %s9545_s3 = scalar_lea.vmem %s50_s29, 32 }
  0x28   :  { %p9542_p1 = scmp.ne.s32.totalorder %s50_s29, %s9541_s13  ;;  %p9546_p2 = scmp.lt.s32.totalorder %s50_s29, %s50_s29 }
  0x29   :  { %p9547_p3 = scmp.lt.s32.totalorder %s9545_s3, %s9541_s13 }
  0x2b   :  { %p9548_p4 = por %p9547_p3, %p9546_p2 }
  0x2d   :  { %p9549_p5 = pnand %p9548_p4, %p9542_p1 }
  0x2f   :  { %9552 = shalt.err (!%p9549_p5)
}
  0x30   :  { %52 = dma.hbm_to_vmem [thread:$0]  %s11478_s2, 16, %s50_s29, [#allocation6]  }
  0x31   :  { %s9651_s16 = smov [#allocation10]  }
  0x32   :  { %s70_s17 = sshll.u32 %s9651_s16, 4  ;;  %s71_s17 = int_to_ptr.vmem [resolvable:$true] %s70_s17 }
  0x33   :  { %s9561_s18 = scalar_lea.vmem %s71_s17, 8192  ;;  %p9566_p7 = scmp.lt.s32.totalorder %s71_s17, %s71_s17 }
  0x34   :  { %p9562_p6 = scmp.ne.s32.totalorder %s71_s17, %s9561_s18  ;;  %p9567_p8 = scmp.lt.s32.totalorder %s9561_s18, %s9561_s18 }
  0x36   :  { %p9568_p9 = por %p9567_p8, %p9566_p7 }
  0x38   :  { %p9569_p10 = pnand %p9568_p9, %p9562_p6 }
  0x3a   :  { %9572 = shalt.err (!%p9569_p10)
}
  0x3b   :  { %76 = dma.hbm_to_vmem [thread:$0]  %s11480_s4, 8192, %s71_s17, [#allocation9], %s9647_s23, %s9647_s23, %s9648_s24  }
  0x3c   :  { %9633 = dma.done.wait [#allocation3], 128  }
  0x3d   :  { %9634 = vsyncadd [#allocation3], 4294967168 }
  0x3e   :  { %9635 = dma.done.wait [#allocation6], 1040  }
  0x3f   :  { %9636 = vsyncadd [#allocation6], 4294966256 }
  0x40   :  { %9637 = dma.done.wait [#allocation9], 16384  }
  0x41   :  { %9638 = vsyncadd [#allocation9], 4294950912  ;;  %v9652_v0 = vmov 0.0   ;;  %vm9653_vm0 = vmmov 0   ;;  %v8729_v1 = vld [vmem:[#allocation5 + $0x38] sm:$0xff]   ;;  %v8730_v2 = vld [vmem:[#allocation5 + $0x30] sm:$0xff]  }
  0x42   :  { %8693 = vmatprep.subr.bf16.mxu0 %v9652_v0  ;;  %8709 = vmatprep.mubr.msk.bf16.mxu0 %vm9653_vm0, %v9652_v0  ;;  %v8731_v3 = vld [vmem:[#allocation5 + $0x28] sm:$0xff]   ;;  %v8732_v5 = vld [vmem:[#allocation5 + $0x20] sm:$0xff]   ;;  %v8733_v8 = vld [vmem:[#allocation5 + $0x18] sm:$0xff]   ;;  %v11487_v45 = vmov 0   ;;  %s9657_s2 = smov [#allocation11]   ;;  %s9658_s20 = smov [#allocation14]  }
  0x43   :  { %8694 = vmatpush3.bf16.msra.mxu0 %v8729_v1  ;;  %v8737_v4 = vld [vmem:[#allocation8 + $0xe4] ss:$16 sps:$4 sm:$0xff]   ;;  %v8742_v6 = vld [vmem:[#allocation8 + $0xe0] ss:$16 sps:$4 sm:$0xff]   ;;  %v8741_v21 = vld [vmem:[#allocation8 + $0xec] ss:$16 sps:$4 sm:$0xff]   ;;  %460 = vmatprep.mubr.bf16.mxu1 %v11487_v45 }
  0x44   :  { %8695 = vmatprep.subr.bf16.mxu0 %v9652_v0  ;;  %428 = vmatprep.subr.bf16.mxu1 %v8737_v4  ;;  %v8743_v7 = vld [vmem:[#allocation8 + $0xc4] ss:$16 sps:$4 sm:$0xff]   ;;  %v8748_v9 = vld [vmem:[#allocation8 + $0xc0] ss:$16 sps:$4 sm:$0xff]   ;;  %v8739_v24 = vld [vmem:[#allocation8 + $0xe8] ss:$16 sps:$4 sm:$0xff]  }
  0x45   :  { %429 = vmatpush1.bf16.msra.mxu1 %v8742_v6  ;;  %v8749_v10 = vld [vmem:[#allocation8 + $0xa4] ss:$16 sps:$4 sm:$0xff]   ;;  %v8754_v11 = vld [vmem:[#allocation8 + $0xa0] ss:$16 sps:$4 sm:$0xff]   ;;  %v8747_v26 = vld [vmem:[#allocation8 + $0xcc] ss:$16 sps:$4 sm:$0xff]  }
  0x46   :  { %430 = vmatprep.subr.bf16.mxu1 %v8743_v7  ;;  %v8755_v12 = vld [vmem:[#allocation8 + $0x84] ss:$16 sps:$4 sm:$0xff]   ;;  %v8760_v14 = vld [vmem:[#allocation8 + $0x80] ss:$16 sps:$4 sm:$0xff]   ;;  %v8745_v28 = vld [vmem:[#allocation8 + $0xc8] ss:$16 sps:$4 sm:$0xff]  }
  0x47   :  { %8696 = vmatpush3.bf16.msra.mxu0 %v8730_v2  ;;  %v8734_v13 = vld [vmem:[#allocation5 + $0x10] sm:$0xff]   ;;  %v8735_v16 = vld [vmem:[#allocation5 + $0x8] sm:$0xff]   ;;  %v8736_v17 = vld [vmem:[#allocation5] sm:$0xff]   ;;  %s7861_s4 = sshll.u32 %s9657_s2, 4  ;;  %s7881_s21 = sshll.u32 %s9658_s20, 4  ;;  %s7862_s4 = int_to_ptr.vmem [resolvable:$true] %s7861_s4  ;;  %s7882_s21 = int_to_ptr.vmem [resolvable:$true] %s7881_s21 }
  0x48   :  { %8697 = vmatprep.subr.bf16.mxu0 %v9652_v0  ;;  %v8761_v15 = vld [vmem:[#allocation8 + $0x64] ss:$16 sps:$4 sm:$0xff]   ;;  %v8766_v18 = vld [vmem:[#allocation8 + $0x60] ss:$16 sps:$4 sm:$0xff]   ;;  %v8753_v29 = vld [vmem:[#allocation8 + $0xac] ss:$16 sps:$4 sm:$0xff]  }
  0x49   :  { %431 = vmatpush1.bf16.msra.mxu1 %v8748_v9  ;;  %v8767_v19 = vld [vmem:[#allocation8 + $0x44] ss:$16 sps:$4 sm:$0xff]   ;;  %v8772_v22 = vld [vmem:[#allocation8 + $0x40] ss:$16 sps:$4 sm:$0xff]   ;;  %v8751_v30 = vld [vmem:[#allocation8 + $0xa8] ss:$16 sps:$4 sm:$0xff]  }
  0x4a   :  { %432 = vmatprep.subr.bf16.mxu1 %v8749_v10  ;;  %v99_v20 = vld [vmem:[#allocation2] sm:$0xff]  ;;  %v8778_v27 = vld [vmem:[#allocation8 + $0x20] ss:$16 sps:$4 sm:$0xff]   ;;  %v7899_v46 = vld [vmem:[#allocation7] ss:$0 sm:$0xff] }
  0x4b   :  { %8698 = vmatpush3.bf16.msra.mxu0 %v8731_v3  ;;  %v8773_v23 = vld [vmem:[#allocation8 + $0x24] ss:$16 sps:$4 sm:$0xff]   ;;  %v100_v25 = vpack.c.bf16 %v99_v20, %v99_v20  ;;  %v8759_v31 = vld [vmem:[#allocation8 + $0x8c] ss:$16 sps:$4 sm:$0xff]   ;;  %v8757_v32 = vld [vmem:[#allocation8 + $0x88] ss:$16 sps:$4 sm:$0xff]  }
  0x4c   :  { %8699 = vmatprep.subr.bf16.mxu0 %v9652_v0  ;;  %v8765_v33 = vld [vmem:[#allocation8 + $0x6c] ss:$16 sps:$4 sm:$0xff]   ;;  %v8763_v34 = vld [vmem:[#allocation8 + $0x68] ss:$16 sps:$4 sm:$0xff]   ;;  %v8779_v39 = vld [vmem:[#allocation8 + $0x4] ss:$16 sps:$4 sm:$0xff]  }
  0x4d   :  { %433 = vmatpush1.bf16.msra.mxu1 %v8754_v11  ;;  %v8771_v35 = vld [vmem:[#allocation8 + $0x4c] ss:$16 sps:$4 sm:$0xff]   ;;  %v8769_v36 = vld [vmem:[#allocation8 + $0x48] ss:$16 sps:$4 sm:$0xff]   ;;  %v8784_v42 = vld [vmem:[#allocation8] ss:$16 sps:$4 sm:$0xff]  }
  0x4e   :  { %434 = vmatprep.subr.bf16.mxu1 %v8755_v12  ;;  %v8777_v37 = vld [vmem:[#allocation8 + $0x2c] ss:$16 sps:$4 sm:$0xff]   ;;  %v8775_v38 = vld [vmem:[#allocation8 + $0x28] ss:$16 sps:$4 sm:$0xff]   ;;  %v9735_v43 = vld [vmem:[#allocation10 + $0xe4] ss:$16 sps:$4 sm:$0xff]  }
  0x4f   :  { %8700 = vmatpush3.bf16.msra.mxu0 %v8732_v5  ;;  %v8783_v40 = vld [vmem:[#allocation8 + $0xc] ss:$16 sps:$4 sm:$0xff]   ;;  %v8781_v41 = vld [vmem:[#allocation8 + $0x8] ss:$16 sps:$4 sm:$0xff]   ;;  %v9743_v52 = vld [vmem:[#allocation10 + $0xe0] ss:$16 sps:$4 sm:$0xff]  }
  0x50   :  { %8701 = vmatprep.subr.bf16.mxu0 %v9652_v0  ;;  %v9737_v44 = vld [vmem:[#allocation10 + $0xec] ss:$16 sps:$4 sm:$0xff]   ;;  %v9745_v53 = vld [vmem:[#allocation10 + $0xe8] ss:$16 sps:$4 sm:$0xff]   ;;  %v9747_v55 = vld [vmem:[#allocation10 + $0xc4] ss:$16 sps:$4 sm:$0xff]  }
  0x51   :  { %435 = vmatpush1.bf16.msra.mxu1 %v8760_v14  ;;  %v9749_v56 = vld [vmem:[#allocation10 + $0xcc] ss:$16 sps:$4 sm:$0xff]   ;;  %v9753_v58 = vld [vmem:[#allocation10 + $0xc0] ss:$16 sps:$4 sm:$0xff]   ;;  %v9755_v59 = vld [vmem:[#allocation10 + $0xc8] ss:$16 sps:$4 sm:$0xff]  }
  0x52   :  { %436 = vmatprep.subr.bf16.mxu1 %v8761_v15  ;;  %v9759_v60 = vld [vmem:[#allocation10 + $0xa4] ss:$16 sps:$4 sm:$0xff]   ;;  %v9761_v61 = vld [vmem:[#allocation10 + $0xac] ss:$16 sps:$4 sm:$0xff]   ;;  %v9767_v62 = vld [vmem:[#allocation10 + $0xa0] ss:$16 sps:$4 sm:$0xff]  }
  0x53   :  { %8702 = vmatpush3.bf16.msra.mxu0 %v8733_v8  ;;  %v9769_v63 = vld [vmem:[#allocation10 + $0xa8] ss:$16 sps:$4 sm:$0xff]   ;;  %v9775_v1 = vld [vmem:[#allocation10 + $0x8c] ss:$16 sps:$4 sm:$0xff]   ;;  %v9779_v2 = vld [vmem:[#allocation10 + $0x80] ss:$16 sps:$4 sm:$0xff]  }
  0x54   :  { %8703 = vmatprep.subr.bf16.mxu0 %v9652_v0  ;;  %v9781_v3 = vld [vmem:[#allocation10 + $0x88] ss:$16 sps:$4 sm:$0xff]   ;;  %v9785_v4 = vld [vmem:[#allocation10 + $0x64] ss:$16 sps:$4 sm:$0xff]   ;;  %v9787_v5 = vld [vmem:[#allocation10 + $0x6c] ss:$16 sps:$4 sm:$0xff]  }
  0x55   :  { %437 = vmatpush1.bf16.msra.mxu1 %v8766_v18  ;;  %v9791_v6 = vld [vmem:[#allocation10 + $0x60] ss:$16 sps:$4 sm:$0xff]   ;;  %v9793_v7 = vld [vmem:[#allocation10 + $0x68] ss:$16 sps:$4 sm:$0xff]   ;;  %v9797_v8 = vld [vmem:[#allocation10 + $0x44] ss:$16 sps:$4 sm:$0xff]  }
  0x56   :  { %438 = vmatprep.subr.bf16.mxu1 %v8767_v19  ;;  %v9799_v9 = vld [vmem:[#allocation10 + $0x4c] ss:$16 sps:$4 sm:$0xff]   ;;  %v9803_v10 = vld [vmem:[#allocation10 + $0x40] ss:$16 sps:$4 sm:$0xff]   ;;  %v9805_v11 = vld [vmem:[#allocation10 + $0x48] ss:$16 sps:$4 sm:$0xff]  }
  0x57   :  { %8704 = vmatpush3.bf16.msra.mxu0 %v8734_v13  ;;  %v9809_v12 = vld [vmem:[#allocation10 + $0x24] ss:$16 sps:$4 sm:$0xff]   ;;  %v9811_v13 = vld [vmem:[#allocation10 + $0x2c] ss:$16 sps:$4 sm:$0xff]   ;;  %v9815_v14 = vld [vmem:[#allocation10 + $0x20] ss:$16 sps:$4 sm:$0xff]  }
  0x58   :  { %8705 = vmatprep.subr.bf16.mxu0 %v9652_v0  ;;  %v9817_v15 = vld [vmem:[#allocation10 + $0x28] ss:$16 sps:$4 sm:$0xff]   ;;  %v9827_v18 = vld [vmem:[#allocation10] ss:$16 sps:$4 sm:$0xff]   ;;  %v510_v20 = vld [vmem:[%s11482_s6] sm:$0x1] }
  0x59   :  { %439 = vmatpush1.bf16.msra.mxu1 %v8772_v22  ;;  %v9829_v19 = vld [vmem:[#allocation10 + $0x8] ss:$16 sps:$4 sm:$0xff]   ;;  %v9872_v22 = vld [vmem:[#allocation8 + $0x1e4] ss:$16 sps:$4 sm:$0xff]  }
  0x5a   :  { %440 = vmatprep.subr.bf16.mxu1 %v8773_v23  ;;  %v9874_v23 = vld [vmem:[#allocation8 + $0x1ec] ss:$16 sps:$4 sm:$0xff]  }
  0x5b   :  { %8706 = vmatpush3.bf16.msra.mxu0 %v8735_v16  ;;  %v9821_v16 = vld [vmem:[#allocation10 + $0x4] ss:$16 sps:$4 sm:$0xff]  }
  0x5c   :  { %8707 = vmatprep.subr.bf16.mxu0 %v9652_v0  ;;  %v9773_v0 = vld [vmem:[#allocation10 + $0x84] ss:$16 sps:$4 sm:$0xff]  }
  0x5d   :  { %441 = vmatpush1.bf16.msra.mxu1 %v8778_v27 }
  0x5e   :  { %442 = vmatprep.subr.bf16.mxu1 %v8779_v39 }
  0x5f   :  { %8708 = vmatpush3.bf16.msra.mxu0 %v8736_v17  ;;  %v9823_v17 = vld [vmem:[#allocation10 + $0xc] ss:$16 sps:$4 sm:$0xff]  }
  0x60   :  { %469 = vmatprep.subr.bf16.mxu0 %v8741_v21  ;;  %v514_v21 = vpack.c.bf16 %v510_v20, %v510_v20 }
  0x61   :  { %443 = vmatpush1.bf16.msra.mxu1 %v8784_v42 }
  0x62   :  { %8710 = vmatmul.mubr.bf16.vlgmr.msra.gmra.mxu0 %v100_v25  ;;  %707 = vmatprep.subr.bf16.mxu1 %v9735_v43 }
  0x63   :  { %470 = vmatpush1.bf16.msra.mxu0 %v8739_v24  ;;  %501 = vmatprep.mubr.bf16.mxu0 %v11487_v45 }
  0x64   :  { %471 = vmatprep.subr.bf16.mxu0 %v8747_v26 }
  0x67   :  { %472 = vmatpush1.bf16.msra.mxu0 %v8745_v28 }
  0x68   :  { %473 = vmatprep.subr.bf16.mxu0 %v8753_v29 }
  0x6b   :  { %474 = vmatpush1.bf16.msra.mxu0 %v8751_v30 }
  0x6c   :  { %475 = vmatprep.subr.bf16.mxu0 %v8759_v31 }
  0x6f   :  { %476 = vmatpush1.bf16.msra.mxu0 %v8757_v32  ;;  %v248_v32 = vlaneseq }
  0x70   :  { %477 = vmatprep.subr.bf16.mxu0 %v8765_v33 }
  0x71   :  { %v9878_v33 = vshrl.u32 %v248_v32, 7 }
  0x73   :  { %478 = vmatpush1.bf16.msra.mxu0 %v8763_v34  ;;  %v250_v34 = vsub.s32 0, %v9878_v33 }
  0x74   :  { %479 = vmatprep.subr.bf16.mxu0 %v8771_v35  ;;  %v246_v35 = vld [vmem:[%s11481_s5] sm:$0xf] }
  0x77   :  { %480 = vmatpush1.bf16.msra.mxu0 %v8769_v36  ;;  %v254_v36 = vsub.s32 1, %v9878_v33 }
  0x78   :  { %481 = vmatprep.subr.bf16.mxu0 %v8777_v37  ;;  %v251_v37 = vrot.slane %v246_v35, %v250_v34 }
  0x79   :  { %v255_v39 = vrot.slane %v246_v35, %v254_v36 }
  0x7b   :  { %482 = vmatpush1.bf16.msra.mxu0 %v8775_v38  ;;  %v258_v38 = vsub.s32 2, %v9878_v33 }
  0x7c   :  { %483 = vmatprep.subr.bf16.mxu0 %v8783_v40 }
  0x7f   :  { %484 = vmatpush1.bf16.msra.mxu0 %v8781_v41  ;;  %v259_v41 = vrot.slane %v246_v35, %v258_v38  ;;  %v512_v38 = vld [vmem:[%s11483_s7] sm:$0x1] }
  0x80   :  { %748 = vmatprep.subr.bf16.mxu0 %v9737_v44 }
 0x122   :  { %v206_v47 = vpop.f32.mrf.mxu0 }
 0x123   :  { %v207_v48 = vadd.f32 %v7899_v46, %v206_v47 }
 0x124   :  { %v8711_v49 = vpop.f32.mrf.mxu0 }
 0x125   :  { %v212_v50 = vmax.f32 %v207_v48, 0.0 }
 0x126   :  { %v209_v51 = vpop.f32.mrf.mxu0 }
 0x127   :  { %v213_v54 = vpack.c.bf16 %v212_v50, %v212_v50 }
 0x128   :  { %v8712_v57 = vpop.f32.mrf.mxu0 }
 0x129   :  { %461 = vmatmul.mubr.bf16.vlgmr.msra.gmra.mxu1 %v213_v54  ;;  %502 = vmatmul.mubr.bf16.vlgmr.msra.gmra.mxu0 %v213_v54 }
 0x12a   :  { %708 = vmatpush1.bf16.msra.mxu1 %v9743_v52  ;;  %749 = vmatpush1.bf16.msra.mxu0 %v9745_v53 }
 0x12b   :  { %709 = vmatprep.subr.bf16.mxu1 %v9747_v55  ;;  %750 = vmatprep.subr.bf16.mxu0 %v9749_v56 }
 0x12c   :  { %739 = vmatprep.mubr.bf16.mxu1 %v11487_v45  ;;  %780 = vmatprep.mubr.bf16.mxu0 %v11487_v45 }
 0x12e   :  { %710 = vmatpush1.bf16.msra.mxu1 %v9753_v58  ;;  %751 = vmatpush1.bf16.msra.mxu0 %v9755_v59 }
 0x12f   :  { %711 = vmatprep.subr.bf16.mxu1 %v9759_v60  ;;  %752 = vmatprep.subr.bf16.mxu0 %v9761_v61 }
 0x132   :  { %712 = vmatpush1.bf16.msra.mxu1 %v9767_v62  ;;  %753 = vmatpush1.bf16.msra.mxu0 %v9769_v63 }
 0x133   :  { %713 = vmatprep.subr.bf16.mxu1 %v9773_v0  ;;  %754 = vmatprep.subr.bf16.mxu0 %v9775_v1 }
 0x136   :  { %714 = vmatpush1.bf16.msra.mxu1 %v9779_v2  ;;  %755 = vmatpush1.bf16.msra.mxu0 %v9781_v3 }
 0x137   :  { %715 = vmatprep.subr.bf16.mxu1 %v9785_v4  ;;  %756 = vmatprep.subr.bf16.mxu0 %v9787_v5 }
 0x13a   :  { %716 = vmatpush1.bf16.msra.mxu1 %v9791_v6  ;;  %757 = vmatpush1.bf16.msra.mxu0 %v9793_v7 }
 0x13b   :  { %717 = vmatprep.subr.bf16.mxu1 %v9797_v8  ;;  %758 = vmatprep.subr.bf16.mxu0 %v9799_v9 }
 0x13e   :  { %718 = vmatpush1.bf16.msra.mxu1 %v9803_v10  ;;  %759 = vmatpush1.bf16.msra.mxu0 %v9805_v11 }
 0x13f   :  { %719 = vmatprep.subr.bf16.mxu1 %v9809_v12  ;;  %760 = vmatprep.subr.bf16.mxu0 %v9811_v13 }
 0x142   :  { %720 = vmatpush1.bf16.msra.mxu1 %v9815_v14  ;;  %761 = vmatpush1.bf16.msra.mxu0 %v9817_v15 }
 0x143   :  { %721 = vmatprep.subr.bf16.mxu1 %v9821_v16  ;;  %762 = vmatprep.subr.bf16.mxu0 %v9823_v17 }
 0x146   :  { %722 = vmatpush1.bf16.msra.mxu1 %v9827_v18  ;;  %763 = vmatpush1.bf16.msra.mxu0 %v9829_v19 }
 0x147   :  { %809 = vmatprep.subr.bf16.mxu1 %v9735_v43  ;;  %850 = vmatprep.subr.bf16.mxu0 %v9737_v44 }
 0x149   :  { %740 = vmatmul.mubr.bf16.vlgmr.msra.gmra.mxu1 %v514_v21  ;;  %781 = vmatmul.mubr.bf16.vlgmr.msra.gmra.mxu0 %v514_v21  ;;  %v262_v21 = vsub.s32 3, %v9878_v33 }
 0x14a   :  { %810 = vmatpush1.bf16.msra.mxu1 %v9743_v52  ;;  %851 = vmatpush1.bf16.msra.mxu0 %v9745_v53 }
 0x14b   :  { %811 = vmatprep.subr.bf16.mxu1 %v9747_v55  ;;  %852 = vmatprep.subr.bf16.mxu0 %v9749_v56 }
 0x14c   :  { %841 = vmatprep.mubr.bf16.mxu1 %v11487_v45  ;;  %882 = vmatprep.mubr.bf16.mxu0 %v11487_v45 }
 0x14e   :  { %812 = vmatpush1.bf16.msra.mxu1 %v9753_v58  ;;  %853 = vmatpush1.bf16.msra.mxu0 %v9755_v59 }
 0x14f   :  { %813 = vmatprep.subr.bf16.mxu1 %v9759_v60  ;;  %854 = vmatprep.subr.bf16.mxu0 %v9761_v61 }
 0x152   :  { %814 = vmatpush1.bf16.msra.mxu1 %v9767_v62  ;;  %855 = vmatpush1.bf16.msra.mxu0 %v9769_v63 }
 0x153   :  { %815 = vmatprep.subr.bf16.mxu1 %v9773_v0  ;;  %856 = vmatprep.subr.bf16.mxu0 %v9775_v1 }
 0x156   :  { %816 = vmatpush1.bf16.msra.mxu1 %v9779_v2  ;;  %857 = vmatpush1.bf16.msra.mxu0 %v9781_v3 }
 0x157   :  { %817 = vmatprep.subr.bf16.mxu1 %v9785_v4  ;;  %858 = vmatprep.subr.bf16.mxu0 %v9787_v5 }
 0x15a   :  { %818 = vmatpush1.bf16.msra.mxu1 %v9791_v6  ;;  %859 = vmatpush1.bf16.msra.mxu0 %v9793_v7 }
 0x15b   :  { %819 = vmatprep.subr.bf16.mxu1 %v9797_v8  ;;  %860 = vmatprep.subr.bf16.mxu0 %v9799_v9 }
 0x15e   :  { %820 = vmatpush1.bf16.msra.mxu1 %v9803_v10  ;;  %861 = vmatpush1.bf16.msra.mxu0 %v9805_v11 }
 0x15f   :  { %821 = vmatprep.subr.bf16.mxu1 %v9809_v12  ;;  %862 = vmatprep.subr.bf16.mxu0 %v9811_v13 }
 0x162   :  { %822 = vmatpush1.bf16.msra.mxu1 %v9815_v14  ;;  %863 = vmatpush1.bf16.msra.mxu0 %v9817_v15 }
 0x163   :  { %823 = vmatprep.subr.bf16.mxu1 %v9821_v16  ;;  %864 = vmatprep.subr.bf16.mxu0 %v9823_v17 }
 0x166   :  { %824 = vmatpush1.bf16.msra.mxu1 %v9827_v18  ;;  %865 = vmatpush1.bf16.msra.mxu0 %v9829_v19 }
 0x167   :  { %1102 = vmatprep.subr.bf16.mxu1 %v9872_v22  ;;  %1143 = vmatprep.subr.bf16.mxu0 %v9874_v23 }
 0x1e9   :  { %v462_v24 = vpop.f32.mrf.mxu1  ;;  %v503_v25 = vpop.f32.mrf.mxu0 }
 0x1ea   :  { %v9886_v40 = vadd.f32 %v462_v24, %v251_v37  ;;  %v9891_v51 = vadd.f32 %v503_v25, %v259_v41 }
 0x1eb   :  { %v464_v26 = vpop.f32.mrf.mxu1  ;;  %v505_v27 = vpop.f32.mrf.mxu0 }
 0x1ec   :  { %v9888_v47 = vadd.f32 %v464_v26, %v255_v39  ;;  %v263_v26 = vrot.slane %v246_v35, %v262_v21 }
 0x1ed   :  { %v466_v28 = vpop.f32.mrf.mxu1  ;;  %v507_v29 = vpop.f32.mrf.mxu0 }
 0x1ef   :  { %v467_v30 = vpop.f32.mrf.mxu1  ;;  %v508_v31 = vpop.f32.mrf.mxu0 }
 0x1f0   :  { %v9896_v30 = vadd.f32 %v505_v27, %v263_v26  ;;  %v9921_v26 = vld [vmem:[#allocation8 + $0x1c8] ss:$16 sps:$4 sm:$0xff]  }
 0x209   :  { %v741_v42 = vpop.f32.mrf.mxu1  ;;  %v782_v46 = vpop.f32.mrf.mxu0 }
 0x20a   :  { %v789_v48 = vadd.f32 %v741_v42, %v9886_v40  ;;  %v791_v24 = vadd.f32 %v782_v46, %v9891_v51 }
 0x20b   :  { %v743_v49 = vpop.f32.mrf.mxu1  ;;  %v784_v50 = vpop.f32.mrf.mxu0 }
 0x20c   :  { %9361 = vtanh.f32 %v789_v48  ;;  %v790_v54 = vadd.f32 %v743_v49, %v9888_v47  ;;  %v792_v31 = vadd.f32 %v784_v50, %v9896_v30 }
 0x20d   :  { %v745_v57 = vpop.f32.mrf.mxu1  ;;  %v786_v20 = vpop.f32.mrf.mxu0 }
 0x20e   :  { %9363 = vtanh.f32 %v790_v54  ;;  %v9905_v57 = vld [vmem:[#allocation8 + $0x1e0] ss:$16 sps:$4 sm:$0xff]   ;;  %v9907_v20 = vld [vmem:[#allocation8 + $0x1e8] ss:$16 sps:$4 sm:$0xff]  }
 0x20f   :  { %v746_v28 = vpop.f32.mrf.mxu1  ;;  %v787_v29 = vpop.f32.mrf.mxu0  ;;  %9365 = vtanh.f32 %v791_v24  ;;  %v9911_v24 = vld [vmem:[#allocation8 + $0x1c4] ss:$16 sps:$4 sm:$0xff]  }
 0x210   :  { %9367 = vtanh.f32 %v792_v31  ;;  %v9913_v28 = vld [vmem:[#allocation8 + $0x1cc] ss:$16 sps:$4 sm:$0xff]   ;;  %v9919_v29 = vld [vmem:[#allocation8 + $0x1c0] ss:$16 sps:$4 sm:$0xff]   ;;  %v9925_v31 = vld [vmem:[#allocation8 + $0x1a4] ss:$16 sps:$4 sm:$0xff]  }
 0x219   :  { %v9362_v25 = vpop.eup %9361 }
 0x21a   :  { %v797_v32 = vmul.f32 0.5, %v9362_v25  ;;  %v9927_v25 = vld [vmem:[#allocation8 + $0x1ac] ss:$16 sps:$4 sm:$0xff]  }
 0x21b   :  { %v9364_v34 = vpop.eup %9363 }
 0x21c   :  { %v798_v36 = vadd.f32 0.5, %v797_v32  ;;  %v799_v37 = vmul.f32 0.5, %v9364_v34  ;;  %v9366_v41 = vpop.eup %9365  ;;  %v9933_v32 = vld [vmem:[#allocation8 + $0x1a0] ss:$16 sps:$4 sm:$0xff]   ;;  %v9935_v34 = vld [vmem:[#allocation8 + $0x1a8] ss:$16 sps:$4 sm:$0xff]  }
 0x21d   :  { %v9368_v27 = vpop.eup %9367 }
 0x21e   :  { %v800_v39 = vadd.f32 0.5, %v799_v37  ;;  %v804_v46 = vmul.f32 %v9366_v41, %v798_v36  ;;  %v801_v48 = vmul.f32 0.5, %v9368_v27  ;;  %v9939_v36 = vld [vmem:[#allocation8 + $0x184] ss:$16 sps:$4 sm:$0xff]   ;;  %v9941_v37 = vld [vmem:[#allocation8 + $0x18c] ss:$16 sps:$4 sm:$0xff]  }
 0x21f   :  { %v9951_v41 = vld [vmem:[#allocation8 + $0x164] ss:$16 sps:$4 sm:$0xff]   ;;  %v9959_v27 = vld [vmem:[#allocation8 + $0x168] ss:$16 sps:$4 sm:$0xff]  }
 0x220   :  { %v803_v42 = vmul.f32 %v800_v39, %v512_v38  ;;  %v802_v49 = vadd.f32 0.5, %v801_v48  ;;  %v9945_v38 = vld [vmem:[#allocation8 + $0x180] ss:$16 sps:$4 sm:$0xff]   ;;  %v9947_v39 = vld [vmem:[#allocation8 + $0x188] ss:$16 sps:$4 sm:$0xff]   ;;  %11653 = vst [vmem:[#allocation20_spill] sm:$0xff] %v9951_v41 }
 0x221   :  { %11656 = vst [vmem:[#allocation23_spill] sm:$0xff] %v9959_v27  ;;  %v9963_v48 = vld [vmem:[#allocation8 + $0x144] ss:$16 sps:$4 sm:$0xff]  }
 0x222   :  { %v9902_v35 = vadd.f32 %v804_v46, %v803_v42  ;;  %v9953_v42 = vld [vmem:[#allocation8 + $0x16c] ss:$16 sps:$4 sm:$0xff]   ;;  %v9957_v46 = vld [vmem:[#allocation8 + $0x160] ss:$16 sps:$4 sm:$0xff]   ;;  %11657 = vst [vmem:[#allocation24_spill] sm:$0xff] %v9963_v48 }
 0x223   :  { %11654 = vst [vmem:[#allocation21_spill] sm:$0xff] %v9953_v42  ;;  %11655 = vst [vmem:[#allocation22_spill] sm:$0xff] %v9957_v46 }
 0x224   :  { %9369 = vtanh.f32 %v9902_v35 }
 0x231   :  { %v9370_v50 = vpop.eup %9369 }
 0x232   :  { %v807_v54 = vmul.f32 %v9370_v50, %v802_v49  ;;  %v9965_v49 = vld [vmem:[#allocation8 + $0x14c] ss:$16 sps:$4 sm:$0xff]   ;;  %v9969_v50 = vld [vmem:[#allocation8 + $0x140] ss:$16 sps:$4 sm:$0xff]  }
 0x233   :  { %11658 = vst [vmem:[#allocation25_spill] sm:$0xff] %v9965_v49  ;;  %11659 = vst [vmem:[#allocation26_spill] sm:$0xff] %v9969_v50 }
 0x234   :  { %v9909_v21 = vpack.c.bf16 %v807_v54, %v807_v54  ;;  %v9971_v54 = vld [vmem:[#allocation8 + $0x148] ss:$16 sps:$4 sm:$0xff]  }
 0x235   :  { %11660 = vst [vmem:[#allocation27_spill] sm:$0xff] %v9971_v54 }
 0x236   :  { %842 = vmatmul.mubr.bf16.vlgmr.msra.gmra.mxu1 %v9909_v21  ;;  %883 = vmatmul.mubr.bf16.vlgmr.msra.gmra.mxu0 %v9909_v21 }
 0x237   :  { %1103 = vmatpush1.bf16.msra.mxu1 %v9905_v57  ;;  %1144 = vmatpush1.bf16.msra.mxu0 %v9907_v20 }
 0x238   :  { %1104 = vmatprep.subr.bf16.mxu1 %v9911_v24  ;;  %1145 = vmatprep.subr.bf16.mxu0 %v9913_v28 }
 0x239   :  { %1134 = vmatprep.mubr.bf16.mxu1 %v11487_v45  ;;  %1175 = vmatprep.mubr.bf16.mxu0 %v11487_v45  ;;  %v9975_v45 = vld [vmem:[#allocation8 + $0x124] ss:$16 sps:$4 sm:$0xff]  }
 0x23a   :  { %11661 = vst [vmem:[#allocation28_spill] sm:$0xff] %v9975_v45 }
 0x23b   :  { %1105 = vmatpush1.bf16.msra.mxu1 %v9919_v29  ;;  %1146 = vmatpush1.bf16.msra.mxu0 %v9921_v26 }
 0x23c   :  { %1106 = vmatprep.subr.bf16.mxu1 %v9925_v31  ;;  %1147 = vmatprep.subr.bf16.mxu0 %v9927_v25 }
 0x23f   :  { %1107 = vmatpush1.bf16.msra.mxu1 %v9933_v32  ;;  %1148 = vmatpush1.bf16.msra.mxu0 %v9935_v34 }
 0x240   :  { %1108 = vmatprep.subr.bf16.mxu1 %v9939_v36  ;;  %1149 = vmatprep.subr.bf16.mxu0 %v9941_v37 }
 0x243   :  { %1109 = vmatpush1.bf16.msra.mxu1 %v9945_v38  ;;  %1150 = vmatpush1.bf16.msra.mxu0 %v9947_v39 }
 0x244   :  { %1110 = vmatprep.subr.bf16.mxu1 %v9951_v41  ;;  %1151 = vmatprep.subr.bf16.mxu0 %v9953_v42  ;;  %v9977_v41 = vld [vmem:[#allocation8 + $0x12c] ss:$16 sps:$4 sm:$0xff]   ;;  %v9981_v42 = vld [vmem:[#allocation8 + $0x120] ss:$16 sps:$4 sm:$0xff]  }
 0x245   :  { %11662 = vst [vmem:[#allocation29_spill] sm:$0xff] %v9977_v41  ;;  %11663 = vst [vmem:[#allocation30_spill] sm:$0xff] %v9981_v42 }
 0x247   :  { %1111 = vmatpush1.bf16.msra.mxu1 %v9957_v46  ;;  %1152 = vmatpush1.bf16.msra.mxu0 %v9959_v27  ;;  %v9983_v46 = vld [vmem:[#allocation8 + $0x128] ss:$16 sps:$4 sm:$0xff]   ;;  %v9987_v27 = vld [vmem:[#allocation8 + $0x104] ss:$16 sps:$4 sm:$0xff]  }
 0x248   :  { %1112 = vmatprep.subr.bf16.mxu1 %v9963_v48  ;;  %1153 = vmatprep.subr.bf16.mxu0 %v9965_v49  ;;  %11664 = vst [vmem:[#allocation31_spill] sm:$0xff] %v9983_v46  ;;  %11665 = vst [vmem:[#allocation32_spill] sm:$0xff] %v9987_v27  ;;  %v9989_v48 = vld [vmem:[#allocation8 + $0x10c] ss:$16 sps:$4 sm:$0xff]   ;;  %v9993_v49 = vld [vmem:[#allocation8 + $0x100] ss:$16 sps:$4 sm:$0xff]  }
 0x249   :  { %11666 = vst [vmem:[#allocation33_spill] sm:$0xff] %v9989_v48  ;;  %11667 = vst [vmem:[#allocation34_spill] sm:$0xff] %v9993_v49 }
 0x24b   :  { %1113 = vmatpush1.bf16.msra.mxu1 %v9969_v50  ;;  %1154 = vmatpush1.bf16.msra.mxu0 %v9971_v54  ;;  %v9995_v50 = vld [vmem:[#allocation8 + $0x108] ss:$16 sps:$4 sm:$0xff]   ;;  %v9999_v54 = vld [vmem:[#allocation10 + $0x1e4] ss:$16 sps:$4 sm:$0xff]  }
 0x24c   :  { %1114 = vmatprep.subr.bf16.mxu1 %v9975_v45  ;;  %1155 = vmatprep.subr.bf16.mxu0 %v9977_v41  ;;  %11668 = vst [vmem:[#allocation35_spill] sm:$0xff] %v9995_v50  ;;  %11669 = vst [vmem:[#allocation36_spill] sm:$0xff] %v9999_v54  ;;  %v10001_v45 = vld [vmem:[#allocation10 + $0x1ec] ss:$16 sps:$4 sm:$0xff]   ;;  %v10005_v41 = vld [vmem:[#allocation10 + $0x1e0] ss:$16 sps:$4 sm:$0xff]  }
 0x24d   :  { %11670 = vst [vmem:[#allocation37_spill] sm:$0xff] %v10001_v45  ;;  %11671 = vst [vmem:[#allocation38_spill] sm:$0xff] %v10005_v41 }
 0x24f   :  { %1115 = vmatpush1.bf16.msra.mxu1 %v9981_v42  ;;  %1156 = vmatpush1.bf16.msra.mxu0 %v9983_v46  ;;  %v10007_v42 = vld [vmem:[#allocation10 + $0x1e8] ss:$16 sps:$4 sm:$0xff]   ;;  %v10011_v46 = vld [vmem:[#allocation10 + $0x1c4] ss:$16 sps:$4 sm:$0xff]  }
 0x250   :  { %1116 = vmatprep.subr.bf16.mxu1 %v9987_v27  ;;  %1157 = vmatprep.subr.bf16.mxu0 %v9989_v48  ;;  %11672 = vst [vmem:[#allocation39_spill] sm:$0xff] %v10007_v42  ;;  %11673 = vst [vmem:[#allocation40_spill] sm:$0xff] %v10011_v46  ;;  %v10013_v27 = vld [vmem:[#allocation10 + $0x1cc] ss:$16 sps:$4 sm:$0xff]   ;;  %v11679_v48 = vmov 0  }
 0x251   :  { %11674 = vst [vmem:[#allocation41_spill] sm:$0xff] %v10013_v27 }
 0x253   :  { %1117 = vmatpush1.bf16.msra.mxu1 %v9993_v49  ;;  %1158 = vmatpush1.bf16.msra.mxu0 %v9995_v50  ;;  %v10019_v50 = vld [vmem:[#allocation10 + $0x1c0] ss:$16 sps:$4 sm:$0xff]   ;;  %v10021_v49 = vld [vmem:[#allocation10 + $0x1c8] ss:$16 sps:$4 sm:$0xff]  }
 0x254   :  { %1408 = vmatprep.subr.bf16.mxu1 %v9999_v54  ;;  %1449 = vmatprep.subr.bf16.mxu0 %v10001_v45  ;;  %11675 = vst [vmem:[#allocation42_spill] sm:$0xff] %v10019_v50  ;;  %11676 = vst [vmem:[#allocation43_spill] sm:$0xff] %v10021_v49  ;;  %v10025_v45 = vld [vmem:[#allocation10 + $0x1a4] ss:$16 sps:$4 sm:$0xff]   ;;  %v10027_v54 = vld [vmem:[#allocation10 + $0x1ac] ss:$16 sps:$4 sm:$0xff]  }
 0x255   :  { %11677 = vst [vmem:[#allocation44_spill] sm:$0xff] %v10025_v45  ;;  %11678 = vst [vmem:[#allocation45_spill] sm:$0xff] %v10027_v54 }
 0x256   :  { %1135 = vmatmul.mubr.bf16.vlgmr.msra.gmra.mxu1 %v9909_v21  ;;  %1176 = vmatmul.mubr.bf16.vlgmr.msra.gmra.mxu0 %v9909_v21  ;;  %v10033_v21 = vld [vmem:[#allocation10 + $0x1a0] ss:$16 sps:$4 sm:$0xff]  }
 0x257   :  { %1409 = vmatpush1.bf16.msra.mxu1 %v10005_v41  ;;  %1450 = vmatpush1.bf16.msra.mxu0 %v10007_v42  ;;  %11680 = vst [vmem:[#allocation46_spill] sm:$0xff] %v10033_v21  ;;  %v10035_v42 = vld [vmem:[#allocation10 + $0x1a8] ss:$16 sps:$4 sm:$0xff]   ;;  %v10045_v41 = vld [vmem:[#allocation10 + $0x180] ss:$16 sps:$4 sm:$0xff]  }
 0x258   :  { %1410 = vmatprep.subr.bf16.mxu1 %v10011_v46  ;;  %1451 = vmatprep.subr.bf16.mxu0 %v10013_v27  ;;  %11681 = vst [vmem:[#allocation47_spill] sm:$0xff] %v10035_v42  ;;  %v10039_v27 = vld [vmem:[#allocation10 + $0x184] ss:$16 sps:$4 sm:$0xff]   ;;  %v10041_v46 = vld [vmem:[#allocation10 + $0x18c] ss:$16 sps:$4 sm:$0xff]   ;;  %11684 = vst [vmem:[#allocation50_spill] sm:$0xff] %v10045_v41 }
 0x259   :  { %1440 = vmatprep.mubr.bf16.mxu1 %v11679_v48  ;;  %1481 = vmatprep.mubr.bf16.mxu0 %v11679_v48  ;;  %11682 = vst [vmem:[#allocation48_spill] sm:$0xff] %v10039_v27  ;;  %11683 = vst [vmem:[#allocation49_spill] sm:$0xff] %v10041_v46 }
 0x25b   :  { %1411 = vmatpush1.bf16.msra.mxu1 %v10019_v50  ;;  %1452 = vmatpush1.bf16.msra.mxu0 %v10021_v49  ;;  %v10047_v50 = vld [vmem:[#allocation10 + $0x188] ss:$16 sps:$4 sm:$0xff]   ;;  %v10051_v49 = vld [vmem:[#allocation10 + $0x164] ss:$16 sps:$4 sm:$0xff]  }
 0x25c   :  { %1412 = vmatprep.subr.bf16.mxu1 %v10025_v45  ;;  %1453 = vmatprep.subr.bf16.mxu0 %v10027_v54  ;;  %11685 = vst [vmem:[#allocation51_spill] sm:$0xff] %v10047_v50  ;;  %11686 = vst [vmem:[#allocation52_spill] sm:$0xff] %v10051_v49  ;;  %v10053_v45 = vld [vmem:[#allocation10 + $0x16c] ss:$16 sps:$4 sm:$0xff]   ;;  %v10057_v54 = vld [vmem:[#allocation10 + $0x160] ss:$16 sps:$4 sm:$0xff]  }
 0x25d   :  { %11687 = vst [vmem:[#allocation53_spill] sm:$0xff] %v10053_v45  ;;  %11688 = vst [vmem:[#allocation54_spill] sm:$0xff] %v10057_v54 }
 0x25f   :  { %1413 = vmatpush1.bf16.msra.mxu1 %v10033_v21  ;;  %1454 = vmatpush1.bf16.msra.mxu0 %v10035_v42  ;;  %v10059_v21 = vld [vmem:[#allocation10 + $0x168] ss:$16 sps:$4 sm:$0xff]   ;;  %v10063_v42 = vld [vmem:[#allocation10 + $0x144] ss:$16 sps:$4 sm:$0xff]  }
 0x260   :  { %1414 = vmatprep.subr.bf16.mxu1 %v10039_v27  ;;  %1455 = vmatprep.subr.bf16.mxu0 %v10041_v46  ;;  %11689 = vst [vmem:[#allocation55_spill] sm:$0xff] %v10059_v21  ;;  %11690 = vst [vmem:[#allocation56_spill] sm:$0xff] %v10063_v42  ;;  %v10065_v27 = vld [vmem:[#allocation10 + $0x14c] ss:$16 sps:$4 sm:$0xff]   ;;  %v10069_v46 = vld [vmem:[#allocation10 + $0x140] ss:$16 sps:$4 sm:$0xff]  }
 0x261   :  { %11691 = vst [vmem:[#allocation57_spill] sm:$0xff] %v10065_v27  ;;  %11692 = vst [vmem:[#allocation58_spill] sm:$0xff] %v10069_v46 }
 0x263   :  { %1415 = vmatpush1.bf16.msra.mxu1 %v10045_v41  ;;  %1456 = vmatpush1.bf16.msra.mxu0 %v10047_v50  ;;  %v10071_v41 = vld [vmem:[#allocation10 + $0x148] ss:$16 sps:$4 sm:$0xff]   ;;  %v10075_v50 = vld [vmem:[#allocation10 + $0x124] ss:$16 sps:$4 sm:$0xff]  }
 0x264   :  { %1416 = vmatprep.subr.bf16.mxu1 %v10051_v49  ;;  %1457 = vmatprep.subr.bf16.mxu0 %v10053_v45  ;;  %11693 = vst [vmem:[#allocation59_spill] sm:$0xff] %v10071_v41  ;;  %v10077_v49 = vld [vmem:[#allocation10 + $0x12c] ss:$16 sps:$4 sm:$0xff]   ;;  %v10081_v45 = vld [vmem:[#allocation10 + $0x120] ss:$16 sps:$4 sm:$0xff]  }
 0x265   :  { %11694 = vst [vmem:[#allocation60_spill] sm:$0xff] %v10077_v49 }
 0x267   :  { %1417 = vmatpush1.bf16.msra.mxu1 %v10057_v54  ;;  %1458 = vmatpush1.bf16.msra.mxu0 %v10059_v21  ;;  %v10083_v54 = vld [vmem:[#allocation10 + $0x128] ss:$16 sps:$4 sm:$0xff]   ;;  %v10087_v21 = vld [vmem:[#allocation10 + $0x104] ss:$16 sps:$4 sm:$0xff]  }
 0x268   :  { %1418 = vmatprep.subr.bf16.mxu1 %v10063_v42  ;;  %1459 = vmatprep.subr.bf16.mxu0 %v10065_v27  ;;  %v10089_v42 = vld [vmem:[#allocation10 + $0x10c] ss:$16 sps:$4 sm:$0xff]   ;;  %v10093_v27 = vld [vmem:[#allocation10 + $0x100] ss:$16 sps:$4 sm:$0xff]  }
 0x26b   :  { %1419 = vmatpush1.bf16.msra.mxu1 %v10069_v46  ;;  %1460 = vmatpush1.bf16.msra.mxu0 %v10071_v41  ;;  %v10095_v46 = vld [vmem:[#allocation10 + $0x108] ss:$16 sps:$4 sm:$0xff]   ;;  %v511_v41 = vld [vmem:[%s11482_s6 + $0x1] sm:$0x1] }
 0x26c   :  { %1420 = vmatprep.subr.bf16.mxu1 %v10075_v50  ;;  %1461 = vmatprep.subr.bf16.mxu0 %v10077_v49  ;;  %v1214_v49 = vpack.c.bf16 %v511_v41, %v511_v41 }
 0x26f   :  { %1421 = vmatpush1.bf16.msra.mxu1 %v10081_v45  ;;  %1462 = vmatpush1.bf16.msra.mxu0 %v10083_v54 }
 0x270   :  { %1422 = vmatprep.subr.bf16.mxu1 %v10087_v21  ;;  %1463 = vmatprep.subr.bf16.mxu0 %v10089_v42 }
 0x273   :  { %1423 = vmatpush1.bf16.msra.mxu1 %v10093_v27  ;;  %1464 = vmatpush1.bf16.msra.mxu0 %v10095_v46 }
 0x274   :  { %1755 = vmatprep.subr.bf16.mxu1 %v9735_v43  ;;  %1796 = vmatprep.subr.bf16.mxu0 %v9737_v44 }
 0x276   :  { %1441 = vmatmul.mubr.bf16.vlgmr.msra.gmra.mxu1 %v1214_v49  ;;  %1482 = vmatmul.mubr.bf16.vlgmr.msra.gmra.mxu0 %v1214_v49 }
 0x277   :  { %1756 = vmatpush1.bf16.msra.mxu1 %v9743_v52  ;;  %1797 = vmatpush1.bf16.msra.mxu0 %v9745_v53 }
 0x278   :  { %1757 = vmatprep.subr.bf16.mxu1 %v9747_v55  ;;  %1798 = vmatprep.subr.bf16.mxu0 %v9749_v56 }
 0x279   :  { %1787 = vmatprep.mubr.bf16.mxu1 %v11679_v48  ;;  %1828 = vmatprep.mubr.bf16.mxu0 %v11679_v48 }
 0x27b   :  { %1758 = vmatpush1.bf16.msra.mxu1 %v9753_v58  ;;  %1799 = vmatpush1.bf16.msra.mxu0 %v9755_v59 }
 0x27c   :  { %1759 = vmatprep.subr.bf16.mxu1 %v9759_v60  ;;  %1800 = vmatprep.subr.bf16.mxu0 %v9761_v61 }
 0x27f   :  { %1760 = vmatpush1.bf16.msra.mxu1 %v9767_v62  ;;  %1801 = vmatpush1.bf16.msra.mxu0 %v9769_v63 }
 0x280   :  { %1761 = vmatprep.subr.bf16.mxu1 %v9773_v0  ;;  %1802 = vmatprep.subr.bf16.mxu0 %v9775_v1 }
 0x283   :  { %1762 = vmatpush1.bf16.msra.mxu1 %v9779_v2  ;;  %1803 = vmatpush1.bf16.msra.mxu0 %v9781_v3 }
 0x284   :  { %1763 = vmatprep.subr.bf16.mxu1 %v9785_v4  ;;  %1804 = vmatprep.subr.bf16.mxu0 %v9787_v5 }
 0x287   :  { %1764 = vmatpush1.bf16.msra.mxu1 %v9791_v6  ;;  %1805 = vmatpush1.bf16.msra.mxu0 %v9793_v7 }
 0x288   :  { %1765 = vmatprep.subr.bf16.mxu1 %v9797_v8  ;;  %1806 = vmatprep.subr.bf16.mxu0 %v9799_v9 }
 0x28b   :  { %1766 = vmatpush1.bf16.msra.mxu1 %v9803_v10  ;;  %1807 = vmatpush1.bf16.msra.mxu0 %v9805_v11  ;;  %v1531_v10 = vrot.slane %v9902_v35, 7 }
 0x28c   :  { %1767 = vmatprep.subr.bf16.mxu1 %v9809_v12  ;;  %1808 = vmatprep.subr.bf16.mxu0 %v9811_v13 }
 0x28f   :  { %1768 = vmatpush1.bf16.msra.mxu1 %v9815_v14  ;;  %1809 = vmatpush1.bf16.msra.mxu0 %v9817_v15 }
 0x290   :  { %1769 = vmatprep.subr.bf16.mxu1 %v9821_v16  ;;  %1810 = vmatprep.subr.bf16.mxu0 %v9823_v17 }
 0x293   :  { %1770 = vmatpush1.bf16.msra.mxu1 %v9827_v18  ;;  %1811 = vmatpush1.bf16.msra.mxu0 %v9829_v19 }
 0x294   :  { %2046 = vmatprep.subr.bf16.mxu1 %v9872_v22  ;;  %2087 = vmatprep.subr.bf16.mxu0 %v9874_v23 }
 0x2f6   :  { %v843_v43 = vpop.f32.mrf.mxu1  ;;  %v884_v44 = vpop.f32.mrf.mxu0 }
 0x2f7   :  { %v895_v52 = vrot.slane %v843_v43, 7  ;;  %v897_v58 = vrot.slane %v884_v44, 7 }
 0x2f8   :  { %v845_v53 = vpop.f32.mrf.mxu1  ;;  %v886_v55 = vpop.f32.mrf.mxu0 }
 0x2f9   :  { %v903_v56 = vadd.f32 %v895_v52, %v9886_v40  ;;  %v896_v59 = vrot.slane %v845_v53, 7  ;;  %v905_v1 = vadd.f32 %v897_v58, %v9891_v51  ;;  %v898_v2 = vrot.slane %v886_v55, 7 }
 0x2fa   :  { %v847_v60 = vpop.f32.mrf.mxu1  ;;  %v888_v61 = vpop.f32.mrf.mxu0 }
 0x2fb   :  { %9371 = vtanh.f32 %v903_v56  ;;  %v904_v62 = vadd.f32 %v896_v59, %v9888_v47  ;;  %v906_v3 = vadd.f32 %v898_v2, %v9896_v30  ;;  %v9655_v56 = vmov 1966171168  }
 0x2fc   :  { %v848_v63 = vpop.f32.mrf.mxu1  ;;  %v889_v0 = vpop.f32.mrf.mxu0  ;;  %v1191_v58 = vunpack.c.l.s4 %v9655_v56  ;;  %v11718_v56 = vld [vmem:[#allocation43_spill] sm:$0xff] }
 0x2fd   :  { %9373 = vtanh.f32 %v904_v62  ;;  %v11699_v63 = vld [vmem:[#allocation24_spill] sm:$0xff] }
 0x2fe   :  { %9375 = vtanh.f32 %v905_v1  ;;  %v1192_v59 = vunpack.c.0.s8 %v1191_v58  ;;  %v11719_v58 = vld [vmem:[#allocation44_spill] sm:$0xff] }
 0x2ff   :  { %9377 = vtanh.f32 %v906_v3 }
 0x308   :  { %v9372_v4 = vpop.eup %9371 }
 0x309   :  { %v1524_v5 = vmul.f32 0.5, %v9372_v4  ;;  %v7972_v4 = vld [vmem:[%s11481_s5 + $0x4] sm:$0xf] }
 0x30a   :  { %v9374_v6 = vpop.eup %9373 }
 0x30b   :  { %v1525_v7 = vadd.f32 0.5, %v1524_v5  ;;  %v1526_v8 = vmul.f32 0.5, %v9374_v6  ;;  %v9376_v11 = vpop.eup %9375 }
 0x30c   :  { %v9378_v17 = vpop.eup %9377 }
 0x30d   :  { %v1527_v9 = vadd.f32 0.5, %v1526_v8  ;;  %v1534_v13 = vmul.f32 %v9376_v11, %v1525_v7  ;;  %v1528_v41 = vmul.f32 0.5, %v9378_v17  ;;  %v11701_v7 = vld [vmem:[#allocation26_spill] sm:$0xff]  ;;  %v11702_v8 = vld [vmem:[#allocation27_spill] sm:$0xff]  ;;  %v11704_v11 = vld [vmem:[#allocation29_spill] sm:$0xff] }
 0x30f   :  { %v1533_v12 = vmul.f32 %v1531_v10, %v1527_v9  ;;  %v1529_v44 = vadd.f32 0.5, %v1528_v41  ;;  %v11703_v10 = vld [vmem:[#allocation28_spill] sm:$0xff] }
 0x310   :  { %v11711_v41 = vld [vmem:[#allocation36_spill] sm:$0xff] }
 0x311   :  { %v10145_v14 = vadd.f32 %v1534_v13, %v1533_v12 }
 0x313   :  { %9379 = vtanh.f32 %v10145_v14 }
 0x316   :  { %v1136_v15 = vpop.f32.mrf.mxu1  ;;  %v1177_v16 = vpop.f32.mrf.mxu0 }
 0x318   :  { %v1138_v18 = vpop.f32.mrf.mxu1  ;;  %v1179_v19 = vpop.f32.mrf.mxu0 }
 0x31a   :  { %v1140_v22 = vpop.f32.mrf.mxu1  ;;  %v1181_v23 = vpop.f32.mrf.mxu0 }
 0x31b   :  { %v11709_v22 = vld [vmem:[#allocation34_spill] sm:$0xff]  ;;  %v11710_v23 = vld [vmem:[#allocation35_spill] sm:$0xff] }
 0x31c   :  { %v1141_v49 = vpop.f32.mrf.mxu1  ;;  %v1182_v43 = vpop.f32.mrf.mxu0 }
 0x31d   :  { %v11712_v49 = vld [vmem:[#allocation37_spill] sm:$0xff]  ;;  %v11713_v43 = vld [vmem:[#allocation38_spill] sm:$0xff] }
 0x320   :  { %v9380_v52 = vpop.eup %9379 }
 0x321   :  { %v1537_v35 = vmul.f32 %v9380_v52, %v1529_v44  ;;  %v11714_v44 = vld [vmem:[#allocation39_spill] sm:$0xff]  ;;  %v11715_v52 = vld [vmem:[#allocation40_spill] sm:$0xff] }
 0x323   :  { %v1558_v53 = vpack.c.bf16 %v1537_v35, %v1537_v35  ;;  %v11716_v35 = vld [vmem:[#allocation41_spill] sm:$0xff] }
 0x325   :  { %v10148_v55 = vshrl.u32 %v1558_v53, 16  ;;  %v11717_v53 = vld [vmem:[#allocation42_spill] sm:$0xff] }
 0x327   :  { %1788 = vmatmul.mubr.bf16.vlgmr.msra.gmra.mxu1 %v10148_v55  ;;  %1829 = vmatmul.mubr.bf16.vlgmr.msra.gmra.mxu0 %v10148_v55 }
 0x328   :  { %2047 = vmatpush1.bf16.msra.mxu1 %v9905_v57  ;;  %2088 = vmatpush1.bf16.msra.mxu0 %v9907_v20  ;;  %v10163_v57 = vsub.s32 %v1192_v59, %v9878_v33  ;;  %v1188_v20 = vcombine.low %v1136_v15, %v1138_v18  ;;  %v11695_v33 = vld [vmem:[#allocation20_spill] sm:$0xff]  ;;  %v11705_v15 = vld [vmem:[#allocation30_spill] sm:$0xff]  ;;  %v11720_v59 = vld [vmem:[#allocation45_spill] sm:$0xff] }
 0x329   :  { %2048 = vmatprep.subr.bf16.mxu1 %v9911_v24  ;;  %2089 = vmatprep.subr.bf16.mxu0 %v9913_v28  ;;  %v1189_v24 = vcombine.low %v1177_v16, %v1179_v19  ;;  %v11706_v16 = vld [vmem:[#allocation31_spill] sm:$0xff]  ;;  %v11707_v18 = vld [vmem:[#allocation32_spill] sm:$0xff]  ;;  %v11708_v19 = vld [vmem:[#allocation33_spill] sm:$0xff] }
 0x32a   :  { %2078 = vmatprep.mubr.bf16.mxu1 %v11679_v48  ;;  %2119 = vmatprep.mubr.bf16.mxu0 %v11679_v48  ;;  %v1196_v28 = vrot.slane %v1188_v20, %v10163_v57  ;;  %v11721_v20 = vld [vmem:[#allocation46_spill] sm:$0xff] }
 0x32c   :  { %2049 = vmatpush1.bf16.msra.mxu1 %v9919_v29  ;;  %2090 = vmatpush1.bf16.msra.mxu0 %v9921_v26  ;;  %v1203_v29 = vrot.slane %v1189_v24, %v10163_v57  ;;  %v11696_v26 = vld [vmem:[#allocation21_spill] sm:$0xff]  ;;  %v11722_v24 = vld [vmem:[#allocation47_spill] sm:$0xff] }
 0x32d   :  { %2050 = vmatprep.subr.bf16.mxu1 %v9925_v31  ;;  %2091 = vmatprep.subr.bf16.mxu0 %v9927_v25 }
 0x330   :  { %2051 = vmatpush1.bf16.msra.mxu1 %v9933_v32  ;;  %2092 = vmatpush1.bf16.msra.mxu0 %v9935_v34  ;;  %v1204_v32 = vcombine.low %v1196_v28, %v1203_v29  ;;  %v11723_v28 = vld [vmem:[#allocation48_spill] sm:$0xff]  ;;  %v11724_v29 = vld [vmem:[#allocation49_spill] sm:$0xff] }
 0x331   :  { %2052 = vmatprep.subr.bf16.mxu1 %v9939_v36  ;;  %2093 = vmatprep.subr.bf16.mxu0 %v9941_v37  ;;  %v11697_v36 = vld [vmem:[#allocation22_spill] sm:$0xff]  ;;  %v11698_v37 = vld [vmem:[#allocation23_spill] sm:$0xff] }
 0x332   :  { %v1211_v1 = vrot.slane %v1204_v32, %v10163_v57  ;;  %v11725_v32 = vld [vmem:[#allocation50_spill] sm:$0xff] }
 0x334   :  { %2053 = vmatpush1.bf16.msra.mxu1 %v9945_v38  ;;  %2094 = vmatpush1.bf16.msra.mxu0 %v9947_v39  ;;  %v11700_v38 = vld [vmem:[#allocation25_spill] sm:$0xff]  ;;  %v1213_v12 = vadd.f32 %v7972_v4, %v1211_v1  ;;  %v11731_v1 = vld [vmem:[#allocation56_spill] sm:$0xff]  ;;  %v11733_v4 = vld [vmem:[#allocation58_spill] sm:$0xff] }
 0x335   :  { %2054 = vmatprep.subr.bf16.mxu1 %v11695_v33  ;;  %2095 = vmatprep.subr.bf16.mxu0 %v11696_v26 }
 0x336   :  { %v1442_v31 = vpop.f32.mrf.mxu1  ;;  %v1483_v25 = vpop.f32.mrf.mxu0 }
 0x338   :  { %v1444_v34 = vpop.f32.mrf.mxu1  ;;  %v1485_v60 = vpop.f32.mrf.mxu0  ;;  %2055 = vmatpush1.bf16.msra.mxu1 %v11697_v36  ;;  %2096 = vmatpush1.bf16.msra.mxu0 %v11698_v37  ;;  %v11727_v36 = vld [vmem:[#allocation52_spill] sm:$0xff]  ;;  %v11728_v37 = vld [vmem:[#allocation53_spill] sm:$0xff] }
 0x339   :  { %v1494_v61 = vcombine.low %v1442_v31, %v1444_v34  ;;  %v1495_v62 = vcombine.low %v1483_v25, %v1485_v60  ;;  %2056 = vmatprep.subr.bf16.mxu1 %v11699_v63  ;;  %2097 = vmatprep.subr.bf16.mxu0 %v11700_v38  ;;  %v11726_v34 = vld [vmem:[#allocation51_spill] sm:$0xff]  ;;  %v513_v60 = vld [vmem:[%s11483_s7 + $0x1] sm:$0x1] }
 0x33a   :  { %v1446_v39 = vpop.f32.mrf.mxu1  ;;  %v1487_v0 = vpop.f32.mrf.mxu0 }
 0x33b   :  { %v1502_v2 = vrot.slane %v1494_v61, %v10163_v57  ;;  %v1509_v3 = vrot.slane %v1495_v62, %v10163_v57  ;;  %v11729_v39 = vld [vmem:[#allocation54_spill] sm:$0xff]  ;;  %v11730_v0 = vld [vmem:[#allocation55_spill] sm:$0xff] }
 0x33c   :  { %v1447_v5 = vpop.f32.mrf.mxu1  ;;  %v1488_v6 = vpop.f32.mrf.mxu0  ;;  %2057 = vmatpush1.bf16.msra.mxu1 %v11701_v7  ;;  %2098 = vmatpush1.bf16.msra.mxu0 %v11702_v8 }
 0x33d   :  { %v1510_v9 = vcombine.low %v1502_v2, %v1509_v3  ;;  %2058 = vmatprep.subr.bf16.mxu1 %v11703_v10  ;;  %2099 = vmatprep.subr.bf16.mxu0 %v11704_v11  ;;  %v11732_v2 = vld [vmem:[#allocation57_spill] sm:$0xff]  ;;  %v11734_v5 = vld [vmem:[#allocation59_spill] sm:$0xff]  ;;  %v11735_v6 = vld [vmem:[#allocation60_spill] sm:$0xff] }
 0x33f   :  { %v1517_v13 = vrot.slane %v1510_v9, %v10163_v57 }
 0x340   :  { %2059 = vmatpush1.bf16.msra.mxu1 %v11705_v15  ;;  %2100 = vmatpush1.bf16.msra.mxu0 %v11706_v16  ;;  %v10264_v15 = vld [vmem:[#allocation10 + $0xa4] ss:$16 sps:$4 sm:$0xff]   ;;  %v10266_v16 = vld [vmem:[#allocation10 + $0xac] ss:$16 sps:$4 sm:$0xff]  }
 0x341   :  { %v1519_v17 = vadd.f32 %v1517_v13, %v1213_v12  ;;  %2060 = vmatprep.subr.bf16.mxu1 %v11707_v18  ;;  %2101 = vmatprep.subr.bf16.mxu0 %v11708_v19  ;;  %v10256_v12 = vld [vmem:[#allocation10 + $0xc0] ss:$16 sps:$4 sm:$0xff]   ;;  %v10258_v13 = vld [vmem:[#allocation10 + $0xc8] ss:$16 sps:$4 sm:$0xff]   ;;  %v10276_v19 = vld [vmem:[#allocation10 + $0x84] ss:$16 sps:$4 sm:$0xff]  }
 0x342   :  { %v10270_v18 = vld [vmem:[#allocation10 + $0xa8] ss:$16 sps:$4 sm:$0xff]  }
 0x343   :  { %9381 = vtanh.f32 %v1519_v17  ;;  %v10268_v17 = vld [vmem:[#allocation10 + $0xa0] ss:$16 sps:$4 sm:$0xff]  }
 0x344   :  { %2061 = vmatpush1.bf16.msra.mxu1 %v11709_v22  ;;  %2102 = vmatpush1.bf16.msra.mxu0 %v11710_v23  ;;  %v10278_v22 = vld [vmem:[#allocation10 + $0x8c] ss:$16 sps:$4 sm:$0xff]   ;;  %v10280_v23 = vld [vmem:[#allocation10 + $0x80] ss:$16 sps:$4 sm:$0xff]  }
 0x345   :  { %2351 = vmatprep.subr.bf16.mxu1 %v11711_v41  ;;  %2392 = vmatprep.subr.bf16.mxu0 %v11712_v49  ;;  %v10282_v41 = vld [vmem:[#allocation10 + $0x88] ss:$16 sps:$4 sm:$0xff]   ;;  %v10288_v49 = vld [vmem:[#allocation10 + $0x64] ss:$16 sps:$4 sm:$0xff]  }
 0x347   :  { %2079 = vmatmul.mubr.bf16.vlgmr.msra.gmra.mxu1 %v10148_v55  ;;  %2120 = vmatmul.mubr.bf16.vlgmr.msra.gmra.mxu0 %v10148_v55 }
 0x348   :  { %2352 = vmatpush1.bf16.msra.mxu1 %v11713_v43  ;;  %2393 = vmatpush1.bf16.msra.mxu0 %v11714_v44  ;;  %v10290_v43 = vld [vmem:[#allocation10 + $0x6c] ss:$16 sps:$4 sm:$0xff]   ;;  %v10292_v44 = vld [vmem:[#allocation10 + $0x60] ss:$16 sps:$4 sm:$0xff]  }
 0x349   :  { %2353 = vmatprep.subr.bf16.mxu1 %v11715_v52  ;;  %2394 = vmatprep.subr.bf16.mxu0 %v11716_v35  ;;  %v10294_v52 = vld [vmem:[#allocation10 + $0x68] ss:$16 sps:$4 sm:$0xff]   ;;  %v10300_v35 = vld [vmem:[#allocation10 + $0x44] ss:$16 sps:$4 sm:$0xff]  }
 0x34a   :  { %2383 = vmatprep.mubr.bf16.mxu1 %v11679_v48  ;;  %2424 = vmatprep.mubr.bf16.mxu0 %v11679_v48 }
 0x34c   :  { %2354 = vmatpush1.bf16.msra.mxu1 %v11717_v53  ;;  %2395 = vmatpush1.bf16.msra.mxu0 %v11718_v56  ;;  %v10302_v53 = vld [vmem:[#allocation10 + $0x4c] ss:$16 sps:$4 sm:$0xff]   ;;  %v10304_v56 = vld [vmem:[#allocation10 + $0x40] ss:$16 sps:$4 sm:$0xff]  }
 0x34d   :  { %2355 = vmatprep.subr.bf16.mxu1 %v11719_v58  ;;  %2396 = vmatprep.subr.bf16.mxu0 %v11720_v59  ;;  %v10306_v58 = vld [vmem:[#allocation10 + $0x48] ss:$16 sps:$4 sm:$0xff]   ;;  %v10312_v59 = vld [vmem:[#allocation10 + $0x24] ss:$16 sps:$4 sm:$0xff]  }
 0x350   :  { %v9382_v55 = vpop.eup %9381  ;;  %2356 = vmatpush1.bf16.msra.mxu1 %v11721_v20  ;;  %2397 = vmatpush1.bf16.msra.mxu0 %v11722_v24  ;;  %v10316_v20 = vld [vmem:[#allocation10 + $0x20] ss:$16 sps:$4 sm:$0xff]   ;;  %v10318_v24 = vld [vmem:[#allocation10 + $0x28] ss:$16 sps:$4 sm:$0xff]  }
 0x351   :  { %2357 = vmatprep.subr.bf16.mxu1 %v11723_v28  ;;  %2398 = vmatprep.subr.bf16.mxu0 %v11724_v29  ;;  %v1539_v33 = vmul.f32 0.5, %v9382_v55  ;;  %v1542_v26 = vrot.slane %v9382_v55, 1  ;;  %v1551_v62 = vrot.slane %v9382_v55, 2  ;;  %v1546_v7 = vrot.slane %v9382_v55, 3  ;;  %v10314_v55 = vld [vmem:[#allocation10 + $0x2c] ss:$16 sps:$4 sm:$0xff]  }
 0x352   :  { %v10324_v28 = vld [vmem:[#allocation10] ss:$16 sps:$4 sm:$0xff]   ;;  %v10326_v29 = vld [vmem:[#allocation10 + $0x4] ss:$16 sps:$4 sm:$0xff]  }
 0x353   :  { %v1540_v31 = vadd.f32 0.5, %v1539_v33  ;;  %v1544_v25 = vmul.f32 0.5, %v1542_v26  ;;  %v1548_v8 = vmul.f32 0.5, %v1546_v7  ;;  %v10328_v33 = vld [vmem:[#allocation10 + $0x8] ss:$16 sps:$4 sm:$0xff]  }
 0x354   :  { %2358 = vmatpush1.bf16.msra.mxu1 %v11725_v32  ;;  %2399 = vmatpush1.bf16.msra.mxu0 %v11726_v34  ;;  %v10330_v26 = vld [vmem:[#allocation10 + $0xc] ss:$16 sps:$4 sm:$0xff]  }
 0x355   :  { %2359 = vmatprep.subr.bf16.mxu1 %v11727_v36  ;;  %2400 = vmatprep.subr.bf16.mxu0 %v11728_v37  ;;  %v1545_v61 = vadd.f32 0.5, %v1544_v25  ;;  %v1553_v38 = vmul.f32 %v1551_v62, %v1540_v31  ;;  %v1549_v9 = vadd.f32 0.5, %v1548_v8  ;;  %v10332_v31 = vld [vmem:[#allocation8 + $0x1e4] ss:$16 sps:$4 sm:$0xff]   ;;  %v10335_v25 = vld [vmem:[#allocation8 + $0x1ec] ss:$16 sps:$4 sm:$0xff]  }
 0x357   :  { %v1550_v63 = vmul.f32 %v1545_v61, %v513_v60 }
 0x358   :  { %2360 = vmatpush1.bf16.msra.mxu1 %v11729_v39  ;;  %2401 = vmatpush1.bf16.msra.mxu0 %v11730_v0 }
 0x359   :  { %2361 = vmatprep.subr.bf16.mxu1 %v11731_v1  ;;  %2402 = vmatprep.subr.bf16.mxu0 %v11732_v2  ;;  %v10225_v3 = vadd.f32 %v1553_v38, %v1550_v63 }
 0x35b   :  { %9383 = vtanh.f32 %v10225_v3 }
 0x35c   :  { %2362 = vmatpush1.bf16.msra.mxu1 %v11733_v4  ;;  %2403 = vmatpush1.bf16.msra.mxu0 %v11734_v5 }
 0x35d   :  { %2363 = vmatprep.subr.bf16.mxu1 %v10075_v50  ;;  %2404 = vmatprep.subr.bf16.mxu0 %v11735_v6 }
 0x360   :  { %2364 = vmatpush1.bf16.msra.mxu1 %v10081_v45  ;;  %2405 = vmatpush1.bf16.msra.mxu0 %v10083_v54  ;;  %v10240_v45 = vld [vmem:[#allocation10 + $0xe4] ss:$16 sps:$4 sm:$0xff]   ;;  %v10242_v54 = vld [vmem:[#allocation10 + $0xec] ss:$16 sps:$4 sm:$0xff]  }
 0x361   :  { %2365 = vmatprep.subr.bf16.mxu1 %v10087_v21  ;;  %2406 = vmatprep.subr.bf16.mxu0 %v10089_v42  ;;  %v10244_v42 = vld [vmem:[#allocation10 + $0xe0] ss:$16 sps:$4 sm:$0xff]   ;;  %v10254_v21 = vld [vmem:[#allocation10 + $0xcc] ss:$16 sps:$4 sm:$0xff]  }
 0x364   :  { %2366 = vmatpush1.bf16.msra.mxu1 %v10093_v27  ;;  %2407 = vmatpush1.bf16.msra.mxu0 %v10095_v46  ;;  %v10246_v27 = vld [vmem:[#allocation10 + $0xe8] ss:$16 sps:$4 sm:$0xff]   ;;  %v10252_v46 = vld [vmem:[#allocation10 + $0xc4] ss:$16 sps:$4 sm:$0xff]  }
 0x365   :  { %2697 = vmatprep.subr.bf16.mxu1 %v10240_v45  ;;  %2738 = vmatprep.subr.bf16.mxu0 %v10242_v54 }
 0x368   :  { %v9384_v10 = vpop.eup %9383 }
 0x369   :  { %v1556_v11 = vmul.f32 %v9384_v10, %v1549_v9 }
 0x36b   :  { %1557 = vst [vmem:[#allocation11] sm:$0x1] %v1556_v11  ;;  %v2158_v50 = vpack.c.bf16 %v1556_v11, %v1556_v11 }
 0x36d   :  { %2384 = vmatmul.mubr.bf16.vlgmr.msra.gmra.mxu1 %v2158_v50  ;;  %2425 = vmatmul.mubr.bf16.vlgmr.msra.gmra.mxu0 %v2158_v50 }
 0x36e   :  { %2729 = vmatprep.mubr.bf16.mxu1 %v11679_v48  ;;  %2770 = vmatprep.mubr.bf16.mxu0 %v11679_v48 }
 0x36f   :  { %2698 = vmatpush1.bf16.msra.mxu1 %v10244_v42  ;;  %2739 = vmatpush1.bf16.msra.mxu0 %v10246_v27 }
 0x370   :  { %2699 = vmatprep.subr.bf16.mxu1 %v10252_v46  ;;  %2740 = vmatprep.subr.bf16.mxu0 %v10254_v21 }
 0x373   :  { %2700 = vmatpush1.bf16.msra.mxu1 %v10256_v12  ;;  %2741 = vmatpush1.bf16.msra.mxu0 %v10258_v13 }
 0x374   :  { %2701 = vmatprep.subr.bf16.mxu1 %v10264_v15  ;;  %2742 = vmatprep.subr.bf16.mxu0 %v10266_v16 }
 0x377   :  { %2702 = vmatpush1.bf16.msra.mxu1 %v10268_v17  ;;  %2743 = vmatpush1.bf16.msra.mxu0 %v10270_v18 }
 0x378   :  { %2703 = vmatprep.subr.bf16.mxu1 %v10276_v19  ;;  %2744 = vmatprep.subr.bf16.mxu0 %v10278_v22 }
 0x37b   :  { %2704 = vmatpush1.bf16.msra.mxu1 %v10280_v23  ;;  %2745 = vmatpush1.bf16.msra.mxu0 %v10282_v41 }
 0x37c   :  { %2705 = vmatprep.subr.bf16.mxu1 %v10288_v49  ;;  %2746 = vmatprep.subr.bf16.mxu0 %v10290_v43 }
 0x37f   :  { %2706 = vmatpush1.bf16.msra.mxu1 %v10292_v44  ;;  %2747 = vmatpush1.bf16.msra.mxu0 %v10294_v52 }
 0x380   :  { %2707 = vmatprep.subr.bf16.mxu1 %v10300_v35  ;;  %2748 = vmatprep.subr.bf16.mxu0 %v10302_v53 }
 0x383   :  { %2708 = vmatpush1.bf16.msra.mxu1 %v10304_v56  ;;  %2749 = vmatpush1.bf16.msra.mxu0 %v10306_v58 }
 0x384   :  { %2709 = vmatprep.subr.bf16.mxu1 %v10312_v59  ;;  %2750 = vmatprep.subr.bf16.mxu0 %v10314_v55 }
 0x387   :  { %2710 = vmatpush1.bf16.msra.mxu1 %v10316_v20  ;;  %2751 = vmatpush1.bf16.msra.mxu0 %v10318_v24 }
 0x388   :  { %2711 = vmatprep.subr.bf16.mxu1 %v10326_v29  ;;  %2752 = vmatprep.subr.bf16.mxu0 %v10330_v26 }
 0x38b   :  { %2712 = vmatpush1.bf16.msra.mxu1 %v10324_v28  ;;  %2753 = vmatpush1.bf16.msra.mxu0 %v10328_v33 }
 0x38c   :  { %2988 = vmatprep.subr.bf16.mxu1 %v10332_v31  ;;  %3029 = vmatprep.subr.bf16.mxu0 %v10335_v25 }
 0x3e7   :  { %v1789_v32 = vpop.f32.mrf.mxu1  ;;  %v1830_v34 = vpop.f32.mrf.mxu0 }
 0x3e8   :  { %v1841_v60 = vrot.slane %v1789_v32, 6  ;;  %v1843_v62 = vrot.slane %v1830_v34, 6  ;;  %v2474_v32 = vrot.slane %v10145_v14, 7 }
 0x3e9   :  { %v1791_v36 = vpop.f32.mrf.mxu1  ;;  %v1832_v37 = vpop.f32.mrf.mxu0 }
 0x3ea   :  { %v1849_v61 = vadd.f32 %v1841_v60, %v9886_v40  ;;  %v1842_v63 = vrot.slane %v1791_v36, 6  ;;  %v1851_v4 = vadd.f32 %v1843_v62, %v9891_v51  ;;  %v1844_v5 = vrot.slane %v1832_v37, 6 }
 0x3eb   :  { %v1793_v38 = vpop.f32.mrf.mxu1  ;;  %v1834_v39 = vpop.f32.mrf.mxu0 }
 0x3ec   :  { %9385 = vtanh.f32 %v1849_v61  ;;  %v1850_v0 = vadd.f32 %v1842_v63, %v9888_v47  ;;  %v1852_v6 = vadd.f32 %v1844_v5, %v9896_v30 }
 0x3ed   :  { %v1794_v1 = vpop.f32.mrf.mxu1  ;;  %v1835_v2 = vpop.f32.mrf.mxu0 }
 0x3ee   :  { %9387 = vtanh.f32 %v1850_v0 }
 0x3ef   :  { %9389 = vtanh.f32 %v1851_v4 }
 0x3f0   :  { %9391 = vtanh.f32 %v1852_v6 }
 0x3f9   :  { %v9386_v7 = vpop.eup %9385 }
 0x3fa   :  { %v2467_v8 = vmul.f32 0.5, %v9386_v7 }
 0x3fb   :  { %v9388_v9 = vpop.eup %9387 }
 0x3fc   :  { %v2468_v10 = vadd.f32 0.5, %v2467_v8  ;;  %v2469_v11 = vmul.f32 0.5, %v9388_v9  ;;  %v9390_v34 = vpop.eup %9389  ;;  %v10350_v9 = vld [vmem:[#allocation8 + $0x1e0] ss:$16 sps:$4 sm:$0xff]  }
 0x3fd   :  { %v9392_v63 = vpop.eup %9391 }
 0x3fe   :  { %v2470_v50 = vadd.f32 0.5, %v2469_v11  ;;  %v2477_v36 = vmul.f32 %v9390_v34, %v2468_v10  ;;  %v2471_v2 = vmul.f32 0.5, %v9392_v63  ;;  %v10352_v10 = vld [vmem:[#allocation8 + $0x1e8] ss:$16 sps:$4 sm:$0xff]   ;;  %v10364_v34 = vld [vmem:[#allocation8 + $0x1c0] ss:$16 sps:$4 sm:$0xff]  }
 0x3ff   :  { %11737 = vst [vmem:[#allocation21_spill] sm:$0xff] %v10364_v34  ;;  %v10372_v63 = vld [vmem:[#allocation8 + $0x1ac] ss:$16 sps:$4 sm:$0xff]  }
 0x400   :  { %v2476_v60 = vmul.f32 %v2474_v32, %v2470_v50  ;;  %v2472_v6 = vadd.f32 0.5, %v2471_v2  ;;  %v10356_v50 = vld [vmem:[#allocation8 + $0x1c4] ss:$16 sps:$4 sm:$0xff]   ;;  %v10358_v32 = vld [vmem:[#allocation8 + $0x1cc] ss:$16 sps:$4 sm:$0xff]   ;;  %11740 = vst [vmem:[#allocation24_spill] sm:$0xff] %v10372_v63 }
 0x401   :  { %11736 = vst [vmem:[#allocation20_spill] sm:$0xff] %v10358_v32  ;;  %v10384_v2 = vld [vmem:[#allocation8 + $0x184] ss:$16 sps:$4 sm:$0xff]  }
 0x402   :  { %v10347_v61 = vadd.f32 %v2477_v36, %v2476_v60  ;;  %v10366_v60 = vld [vmem:[#allocation8 + $0x1c8] ss:$16 sps:$4 sm:$0xff]   ;;  %v10370_v36 = vld [vmem:[#allocation8 + $0x1a4] ss:$16 sps:$4 sm:$0xff]   ;;  %11743 = vst [vmem:[#allocation27_spill] sm:$0xff] %v10384_v2 }
 0x403   :  { %11738 = vst [vmem:[#allocation22_spill] sm:$0xff] %v10366_v60  ;;  %11739 = vst [vmem:[#allocation23_spill] sm:$0xff] %v10370_v36 }
 0x404   :  { %9393 = vtanh.f32 %v10347_v61 }
 0x407   :  { %v2080_v62 = vpop.f32.mrf.mxu1  ;;  %v2121_v37 = vpop.f32.mrf.mxu0 }
 0x409   :  { %v2082_v38 = vpop.f32.mrf.mxu1  ;;  %v2123_v39 = vpop.f32.mrf.mxu0 }
 0x40b   :  { %v2084_v0 = vpop.f32.mrf.mxu1  ;;  %v2125_v1 = vpop.f32.mrf.mxu0 }
 0x40c   :  { %v10378_v0 = vld [vmem:[#allocation8 + $0x1a0] ss:$16 sps:$4 sm:$0xff]   ;;  %v10380_v1 = vld [vmem:[#allocation8 + $0x1a8] ss:$16 sps:$4 sm:$0xff]  }
 0x40d   :  { %v2085_v4 = vpop.f32.mrf.mxu1  ;;  %v2126_v5 = vpop.f32.mrf.mxu0  ;;  %11741 = vst [vmem:[#allocation25_spill] sm:$0xff] %v10378_v0  ;;  %11742 = vst [vmem:[#allocation26_spill] sm:$0xff] %v10380_v1 }
 0x40e   :  { %v10386_v4 = vld [vmem:[#allocation8 + $0x18c] ss:$16 sps:$4 sm:$0xff]   ;;  %v10390_v5 = vld [vmem:[#allocation8 + $0x180] ss:$16 sps:$4 sm:$0xff]  }
 0x40f   :  { %11744 = vst [vmem:[#allocation28_spill] sm:$0xff] %v10386_v4  ;;  %11745 = vst [vmem:[#allocation29_spill] sm:$0xff] %v10390_v5 }
 0x411   :  { %v9394_v7 = vpop.eup %9393 }
 0x412   :  { %v2480_v14 = vmul.f32 %v9394_v7, %v2472_v6  ;;  %v10392_v6 = vld [vmem:[#allocation8 + $0x188] ss:$16 sps:$4 sm:$0xff]   ;;  %v10396_v7 = vld [vmem:[#allocation8 + $0x164] ss:$16 sps:$4 sm:$0xff]  }
 0x413   :  { %11746 = vst [vmem:[#allocation30_spill] sm:$0xff] %v10392_v6  ;;  %11747 = vst [vmem:[#allocation31_spill] sm:$0xff] %v10396_v7 }
 0x414   :  { %v2501_v8 = vpack.c.bf16 %v2480_v14, %v2480_v14  ;;  %v10398_v14 = vld [vmem:[#allocation8 + $0x16c] ss:$16 sps:$4 sm:$0xff]  }
 0x415   :  { %11748 = vst [vmem:[#allocation32_spill] sm:$0xff] %v10398_v14 }
 0x416   :  { %v10354_v11 = vrot.slane %v2501_v8, 1  ;;  %v10402_v8 = vld [vmem:[#allocation8 + $0x160] ss:$16 sps:$4 sm:$0xff]  }
 0x417   :  { %11749 = vst [vmem:[#allocation33_spill] sm:$0xff] %v10402_v8 }
 0x418   :  { %2730 = vmatmul.mubr.bf16.vlgmr.msra.gmra.mxu1 %v10354_v11  ;;  %2771 = vmatmul.mubr.bf16.vlgmr.msra.gmra.mxu0 %v10354_v11 }
 0x419   :  { %2989 = vmatpush1.bf16.msra.mxu1 %v10350_v9  ;;  %3030 = vmatpush1.bf16.msra.mxu0 %v10352_v10 }
 0x41a   :  { %2990 = vmatprep.subr.bf16.mxu1 %v10356_v50  ;;  %3031 = vmatprep.subr.bf16.mxu0 %v10358_v32 }
 0x41b   :  { %3020 = vmatprep.mubr.bf16.mxu1 %v11679_v48  ;;  %3061 = vmatprep.mubr.bf16.mxu0 %v11679_v48 }
 0x41d   :  { %2991 = vmatpush1.bf16.msra.mxu1 %v10364_v34  ;;  %3032 = vmatpush1.bf16.msra.mxu0 %v10366_v60 }
 0x41e   :  { %2992 = vmatprep.subr.bf16.mxu1 %v10370_v36  ;;  %3033 = vmatprep.subr.bf16.mxu0 %v10372_v63  ;;  %v2133_v63 = vcombine.low %v2121_v37, %v2123_v39  ;;  %v10422_v37 = vld [vmem:[#allocation8 + $0x124] ss:$16 sps:$4 sm:$0xff]  }
 0x41f   :  { %11755 = vst [vmem:[#allocation39_spill] sm:$0xff] %v10422_v37 }
 0x421   :  { %2993 = vmatpush1.bf16.msra.mxu1 %v10378_v0  ;;  %3034 = vmatpush1.bf16.msra.mxu0 %v10380_v1  ;;  %v10404_v0 = vld [vmem:[#allocation8 + $0x168] ss:$16 sps:$4 sm:$0xff]   ;;  %v2132_v1 = vcombine.low %v2080_v62, %v2082_v38  ;;  %v2147_v62 = vrot.slane %v2133_v63, %v10163_v57  ;;  %v10424_v38 = vld [vmem:[#allocation8 + $0x12c] ss:$16 sps:$4 sm:$0xff]   ;;  %v10434_v63 = vld [vmem:[#allocation8 + $0x104] ss:$16 sps:$4 sm:$0xff]  }
 0x422   :  { %2994 = vmatprep.subr.bf16.mxu1 %v10384_v2  ;;  %3035 = vmatprep.subr.bf16.mxu0 %v10386_v4  ;;  %11750 = vst [vmem:[#allocation34_spill] sm:$0xff] %v10404_v0  ;;  %v10408_v2 = vld [vmem:[#allocation8 + $0x144] ss:$16 sps:$4 sm:$0xff]   ;;  %v10410_v4 = vld [vmem:[#allocation8 + $0x14c] ss:$16 sps:$4 sm:$0xff]   ;;  %11756 = vst [vmem:[#allocation40_spill] sm:$0xff] %v10424_v38 }
 0x423   :  { %11751 = vst [vmem:[#allocation35_spill] sm:$0xff] %v10408_v2  ;;  %11752 = vst [vmem:[#allocation36_spill] sm:$0xff] %v10410_v4  ;;  %v2140_v36 = vrot.slane %v2132_v1, %v10163_v57 }
 0x424   :  { %11757 = vst [vmem:[#allocation41_spill] sm:$0xff] %v10434_v63 }
 0x425   :  { %2995 = vmatpush1.bf16.msra.mxu1 %v10390_v5  ;;  %3036 = vmatpush1.bf16.msra.mxu0 %v10392_v6  ;;  %v10414_v5 = vld [vmem:[#allocation8 + $0x140] ss:$16 sps:$4 sm:$0xff]   ;;  %v10416_v6 = vld [vmem:[#allocation8 + $0x148] ss:$16 sps:$4 sm:$0xff]   ;;  %v2148_v1 = vcombine.low %v2140_v36, %v2147_v62 }
 0x426   :  { %2996 = vmatprep.subr.bf16.mxu1 %v10396_v7  ;;  %3037 = vmatprep.subr.bf16.mxu0 %v10398_v14  ;;  %11753 = vst [vmem:[#allocation37_spill] sm:$0xff] %v10414_v5  ;;  %11754 = vst [vmem:[#allocation38_spill] sm:$0xff] %v10416_v6  ;;  %v10430_v14 = vld [vmem:[#allocation8 + $0x128] ss:$16 sps:$4 sm:$0xff]  }
 0x427   :  { %v10442_v36 = vld [vmem:[#allocation8 + $0x108] ss:$16 sps:$4 sm:$0xff]   ;;  %v2155_v62 = vrot.slane %v2148_v1, %v10163_v57 }
 0x429   :  { %2997 = vmatpush1.bf16.msra.mxu1 %v10402_v8  ;;  %3038 = vmatpush1.bf16.msra.mxu0 %v10404_v0  ;;  %v10428_v0 = vld [vmem:[#allocation8 + $0x120] ss:$16 sps:$4 sm:$0xff]  }
 0x42a   :  { %2998 = vmatprep.subr.bf16.mxu1 %v10408_v2  ;;  %3039 = vmatprep.subr.bf16.mxu0 %v10410_v4  ;;  %v10436_v4 = vld [vmem:[#allocation8 + $0x10c] ss:$16 sps:$4 sm:$0xff]  }
 0x42b   :  { %11758 = vst [vmem:[#allocation42_spill] sm:$0xff] %v10436_v4 }
 0x42d   :  { %v2385_v39 = vpop.f32.mrf.mxu1  ;;  %v2426_v8 = vpop.f32.mrf.mxu0  ;;  %2999 = vmatpush1.bf16.msra.mxu1 %v10414_v5  ;;  %3040 = vmatpush1.bf16.msra.mxu0 %v10416_v6  ;;  %v10440_v6 = vld [vmem:[#allocation8 + $0x100] ss:$16 sps:$4 sm:$0xff]  }
 0x42e   :  { %3000 = vmatprep.subr.bf16.mxu1 %v10422_v37  ;;  %3041 = vmatprep.subr.bf16.mxu0 %v10424_v38 }
 0x42f   :  { %v2387_v2 = vpop.f32.mrf.mxu1  ;;  %v2428_v7 = vpop.f32.mrf.mxu0 }
 0x430   :  { %v2437_v60 = vcombine.low %v2385_v39, %v2387_v2  ;;  %v2438_v34 = vcombine.low %v2426_v8, %v2428_v7  ;;  %v10449_v2 = vld [vmem:[#allocation10 + $0x1e4] ss:$16 sps:$4 sm:$0xff]  }
 0x431   :  { %v2389_v5 = vpop.f32.mrf.mxu1  ;;  %v2430_v32 = vpop.f32.mrf.mxu0  ;;  %3001 = vmatpush1.bf16.msra.mxu1 %v10428_v0  ;;  %3042 = vmatpush1.bf16.msra.mxu0 %v10430_v14  ;;  %11759 = vst [vmem:[#allocation43_spill] sm:$0xff] %v10449_v2 }
 0x432   :  { %v2445_v38 = vrot.slane %v2437_v60, %v10163_v57  ;;  %v2452_v37 = vrot.slane %v2438_v34, %v10163_v57  ;;  %3002 = vmatprep.subr.bf16.mxu1 %v10434_v63  ;;  %3043 = vmatprep.subr.bf16.mxu0 %v10436_v4  ;;  %v10451_v32 = vld [vmem:[#allocation10 + $0x1ec] ss:$16 sps:$4 sm:$0xff]   ;;  %v10458_v34 = vld [vmem:[#allocation10 + $0x1e0] ss:$16 sps:$4 sm:$0xff]   ;;  %v10460_v60 = vld [vmem:[#allocation10 + $0x1e8] ss:$16 sps:$4 sm:$0xff]  }
 0x433   :  { %11760 = vst [vmem:[#allocation44_spill] sm:$0xff] %v10451_v32  ;;  %v8069_v5 = vld [vmem:[%s11481_s5 + $0x4] sm:$0xf]  ;;  %v2390_v7 = vpop.f32.mrf.mxu1  ;;  %v2431_v8 = vpop.f32.mrf.mxu0  ;;  %11761 = vst [vmem:[#allocation45_spill] sm:$0xff] %v10458_v34  ;;  %v10465_v63 = vld [vmem:[#allocation10 + $0x1c4] ss:$16 sps:$4 sm:$0xff]  }
 0x434   :  { %v2453_v39 = vcombine.low %v2445_v38, %v2452_v37  ;;  %11762 = vst [vmem:[#allocation46_spill] sm:$0xff] %v10460_v60  ;;  %v2157_v1 = vadd.f32 %v8069_v5, %v2155_v62  ;;  %11763 = vst [vmem:[#allocation47_spill] sm:$0xff] %v10465_v63  ;;  %v10467_v7 = vld [vmem:[#allocation10 + $0x1cc] ss:$16 sps:$4 sm:$0xff]   ;;  %v10473_v38 = vld [vmem:[#allocation10 + $0x1c0] ss:$16 sps:$4 sm:$0xff]  }
 0x435   :  { %3003 = vmatpush1.bf16.msra.mxu1 %v10440_v6  ;;  %3044 = vmatpush1.bf16.msra.mxu0 %v10442_v36  ;;  %11764 = vst [vmem:[#allocation48_spill] sm:$0xff] %v10467_v7  ;;  %11765 = vst [vmem:[#allocation49_spill] sm:$0xff] %v10473_v38  ;;  %v10475_v62 = vld [vmem:[#allocation10 + $0x1c8] ss:$16 sps:$4 sm:$0xff]   ;;  %v10479_v5 = vld [vmem:[#allocation10 + $0x1a4] ss:$16 sps:$4 sm:$0xff]  }
 0x436   :  { %v2460_v4 = vrot.slane %v2453_v39, %v10163_v57  ;;  %3293 = vmatprep.subr.bf16.mxu1 %v10449_v2  ;;  %3334 = vmatprep.subr.bf16.mxu0 %v10451_v32  ;;  %11766 = vst [vmem:[#allocation50_spill] sm:$0xff] %v10475_v62  ;;  %11767 = vst [vmem:[#allocation51_spill] sm:$0xff] %v10479_v5  ;;  %v10489_v8 = vld [vmem:[#allocation10 + $0x1a8] ss:$16 sps:$4 sm:$0xff]   ;;  %v10493_v39 = vld [vmem:[#allocation10 + $0x184] ss:$16 sps:$4 sm:$0xff]  }
 0x437   :  { %11770 = vst [vmem:[#allocation54_spill] sm:$0xff] %v10489_v8  ;;  %11771 = vst [vmem:[#allocation55_spill] sm:$0xff] %v10493_v39 }
 0x438   :  { %v2462_v37 = vadd.f32 %v2460_v4, %v2157_v1  ;;  %3021 = vmatmul.mubr.bf16.vlgmr.msra.gmra.mxu1 %v10354_v11  ;;  %3062 = vmatmul.mubr.bf16.vlgmr.msra.gmra.mxu0 %v10354_v11  ;;  %v10481_v4 = vld [vmem:[#allocation10 + $0x1ac] ss:$16 sps:$4 sm:$0xff]   ;;  %v10487_v11 = vld [vmem:[#allocation10 + $0x1a0] ss:$16 sps:$4 sm:$0xff]  }
 0x439   :  { %3294 = vmatpush1.bf16.msra.mxu1 %v10458_v34  ;;  %3335 = vmatpush1.bf16.msra.mxu0 %v10460_v60  ;;  %11768 = vst [vmem:[#allocation52_spill] sm:$0xff] %v10481_v4  ;;  %11769 = vst [vmem:[#allocation53_spill] sm:$0xff] %v10487_v11  ;;  %v10495_v1 = vld [vmem:[#allocation10 + $0x18c] ss:$16 sps:$4 sm:$0xff]  }
 0x43a   :  { %9395 = vtanh.f32 %v2462_v37  ;;  %3295 = vmatprep.subr.bf16.mxu1 %v10465_v63  ;;  %3336 = vmatprep.subr.bf16.mxu0 %v10467_v7  ;;  %11772 = vst [vmem:[#allocation56_spill] sm:$0xff] %v10495_v1  ;;  %v10499_v37 = vld [vmem:[#allocation10 + $0x180] ss:$16 sps:$4 sm:$0xff]  }
 0x43b   :  { %3325 = vmatprep.mubr.bf16.mxu1 %v11679_v48  ;;  %3366 = vmatprep.mubr.bf16.mxu0 %v11679_v48  ;;  %11773 = vst [vmem:[#allocation57_spill] sm:$0xff] %v10499_v37 }
 0x43d   :  { %3296 = vmatpush1.bf16.msra.mxu1 %v10473_v38  ;;  %3337 = vmatpush1.bf16.msra.mxu0 %v10475_v62  ;;  %v10501_v38 = vld [vmem:[#allocation10 + $0x188] ss:$16 sps:$4 sm:$0xff]   ;;  %v10505_v62 = vld [vmem:[#allocation10 + $0x164] ss:$16 sps:$4 sm:$0xff]  }
 0x43e   :  { %3297 = vmatprep.subr.bf16.mxu1 %v10479_v5  ;;  %3338 = vmatprep.subr.bf16.mxu0 %v10481_v4  ;;  %11774 = vst [vmem:[#allocation58_spill] sm:$0xff] %v10501_v38  ;;  %11775 = vst [vmem:[#allocation59_spill] sm:$0xff] %v10505_v62  ;;  %v10507_v5 = vld [vmem:[#allocation10 + $0x16c] ss:$16 sps:$4 sm:$0xff]   ;;  %v10511_v4 = vld [vmem:[#allocation10 + $0x160] ss:$16 sps:$4 sm:$0xff]  }
 0x43f   :  { %11776 = vst [vmem:[#allocation60_spill] sm:$0xff] %v10507_v5  ;;  %11777 = vst [vmem:[#allocation61_spill] sm:$0xff] %v10511_v4 }
 0x441   :  { %3298 = vmatpush1.bf16.msra.mxu1 %v10487_v11  ;;  %3339 = vmatpush1.bf16.msra.mxu0 %v10489_v8  ;;  %v10513_v11 = vld [vmem:[#allocation10 + $0x168] ss:$16 sps:$4 sm:$0xff]   ;;  %v10517_v8 = vld [vmem:[#allocation10 + $0x144] ss:$16 sps:$4 sm:$0xff]  }
 0x442   :  { %3299 = vmatprep.subr.bf16.mxu1 %v10493_v39  ;;  %3340 = vmatprep.subr.bf16.mxu0 %v10495_v1  ;;  %11778 = vst [vmem:[#allocation62_spill] sm:$0xff] %v10513_v11  ;;  %11779 = vst [vmem:[#allocation63_spill] sm:$0xff] %v10517_v8  ;;  %v10519_v39 = vld [vmem:[#allocation10 + $0x14c] ss:$16 sps:$4 sm:$0xff]  }
 0x443   :  { %11780 = vst [vmem:[#allocation64_spill] sm:$0xff] %v10519_v39 }
 0x445   :  { %3300 = vmatpush1.bf16.msra.mxu1 %v10499_v37  ;;  %3341 = vmatpush1.bf16.msra.mxu0 %v10501_v38  ;;  %v10523_v38 = vld [vmem:[#allocation10 + $0x140] ss:$16 sps:$4 sm:$0xff]   ;;  %v10525_v37 = vld [vmem:[#allocation10 + $0x148] ss:$16 sps:$4 sm:$0xff]  }
 0x446   :  { %3301 = vmatprep.subr.bf16.mxu1 %v10505_v62  ;;  %3342 = vmatprep.subr.bf16.mxu0 %v10507_v5  ;;  %11781 = vst [vmem:[#allocation65_spill] sm:$0xff] %v10523_v38  ;;  %11782 = vst [vmem:[#allocation66_spill] sm:$0xff] %v10525_v37  ;;  %v10529_v5 = vld [vmem:[#allocation10 + $0x124] ss:$16 sps:$4 sm:$0xff]   ;;  %v10531_v62 = vld [vmem:[#allocation10 + $0x12c] ss:$16 sps:$4 sm:$0xff]  }
 0x447   :  { %v9396_v1 = vpop.eup %9395 }
 0x448   :  { %v2482_v7 = vmul.f32 0.5, %v9396_v1  ;;  %v2485_v63 = vrot.slane %v9396_v1, 1  ;;  %v2494_v2 = vrot.slane %v9396_v1, 2 }
 0x449   :  { %3302 = vmatpush1.bf16.msra.mxu1 %v10511_v4  ;;  %3343 = vmatpush1.bf16.msra.mxu0 %v10513_v11  ;;  %v10535_v11 = vld [vmem:[#allocation10 + $0x120] ss:$16 sps:$4 sm:$0xff]   ;;  %v10537_v4 = vld [vmem:[#allocation10 + $0x128] ss:$16 sps:$4 sm:$0xff]  }
 0x44a   :  { %3303 = vmatprep.subr.bf16.mxu1 %v10517_v8  ;;  %3344 = vmatprep.subr.bf16.mxu0 %v10519_v39  ;;  %v2483_v60 = vadd.f32 0.5, %v2482_v7  ;;  %v2487_v34 = vmul.f32 0.5, %v2485_v63  ;;  %v10541_v39 = vld [vmem:[#allocation10 + $0x104] ss:$16 sps:$4 sm:$0xff]   ;;  %v10543_v8 = vld [vmem:[#allocation10 + $0x10c] ss:$16 sps:$4 sm:$0xff]  }
 0x44c   :  { %v2488_v32 = vadd.f32 0.5, %v2487_v34  ;;  %v2496_v34 = vmul.f32 %v2494_v2, %v2483_v60 }
 0x44d   :  { %3304 = vmatpush1.bf16.msra.mxu1 %v10523_v38  ;;  %3345 = vmatpush1.bf16.msra.mxu0 %v10525_v37  ;;  %v10550_v37 = vld [vmem:[#allocation10 + $0x100] ss:$16 sps:$4 sm:$0xff]   ;;  %v10552_v38 = vld [vmem:[#allocation10 + $0x108] ss:$16 sps:$4 sm:$0xff]  }
 0x44e   :  { %3305 = vmatprep.subr.bf16.mxu1 %v10529_v5  ;;  %3346 = vmatprep.subr.bf16.mxu0 %v10531_v62  ;;  %v2493_v63 = vmul.f32 %v2488_v32, %v10225_v3  ;;  %v2489_v3 = vrot.slane %v9396_v1, 3 }
 0x450   :  { %v10546_v7 = vadd.f32 %v2496_v34, %v2493_v63  ;;  %v2491_v2 = vmul.f32 0.5, %v2489_v3 }
 0x451   :  { %3306 = vmatpush1.bf16.msra.mxu1 %v10535_v11  ;;  %3347 = vmatpush1.bf16.msra.mxu0 %v10537_v4 }
 0x452   :  { %3307 = vmatprep.subr.bf16.mxu1 %v10541_v39  ;;  %3348 = vmatprep.subr.bf16.mxu0 %v10543_v8  ;;  %9397 = vtanh.f32 %v10546_v7  ;;  %v2492_v32 = vadd.f32 0.5, %v2491_v2 }
 0x455   :  { %3308 = vmatpush1.bf16.msra.mxu1 %v10550_v37  ;;  %3349 = vmatpush1.bf16.msra.mxu0 %v10552_v38 }
 0x456   :  { %3641 = vmatprep.subr.bf16.mxu1 %v10240_v45  ;;  %3682 = vmatprep.subr.bf16.mxu0 %v10242_v54 }
 0x45f   :  { %v9398_v60 = vpop.eup %9397 }
 0x460   :  { %v2499_v63 = vmul.f32 %v9398_v60, %v2492_v32 }
 0x462   :  { %2500 = vst [vmem:[#allocation11 + $0x1] sm:$0x1] %v2499_v63  ;;  %v3100_v34 = vpack.c.bf16 %v2499_v63, %v2499_v63 }
 0x464   :  { %3326 = vmatmul.mubr.bf16.vlgmr.msra.gmra.mxu1 %v3100_v34  ;;  %3367 = vmatmul.mubr.bf16.vlgmr.msra.gmra.mxu0 %v3100_v34 }
 0x465   :  { %3642 = vmatpush1.bf16.msra.mxu1 %v10244_v42  ;;  %3683 = vmatpush1.bf16.msra.mxu0 %v10246_v27 }
 0x466   :  { %3643 = vmatprep.subr.bf16.mxu1 %v10252_v46  ;;  %3684 = vmatprep.subr.bf16.mxu0 %v10254_v21 }
 0x467   :  { %3673 = vmatprep.mubr.bf16.mxu1 %v11679_v48  ;;  %3714 = vmatprep.mubr.bf16.mxu0 %v11679_v48 }
 0x469   :  { %3644 = vmatpush1.bf16.msra.mxu1 %v10256_v12  ;;  %3685 = vmatpush1.bf16.msra.mxu0 %v10258_v13 }
 0x46a   :  { %3645 = vmatprep.subr.bf16.mxu1 %v10264_v15  ;;  %3686 = vmatprep.subr.bf16.mxu0 %v10266_v16 }
 0x46d   :  { %3646 = vmatpush1.bf16.msra.mxu1 %v10268_v17  ;;  %3687 = vmatpush1.bf16.msra.mxu0 %v10270_v18 }
 0x46e   :  { %3647 = vmatprep.subr.bf16.mxu1 %v10276_v19  ;;  %3688 = vmatprep.subr.bf16.mxu0 %v10278_v22 }
 0x471   :  { %3648 = vmatpush1.bf16.msra.mxu1 %v10280_v23  ;;  %3689 = vmatpush1.bf16.msra.mxu0 %v10282_v41 }
 0x472   :  { %3649 = vmatprep.subr.bf16.mxu1 %v10288_v49  ;;  %3690 = vmatprep.subr.bf16.mxu0 %v10290_v43 }
 0x475   :  { %3650 = vmatpush1.bf16.msra.mxu1 %v10292_v44  ;;  %3691 = vmatpush1.bf16.msra.mxu0 %v10294_v52 }
 0x476   :  { %3651 = vmatprep.subr.bf16.mxu1 %v10300_v35  ;;  %3692 = vmatprep.subr.bf16.mxu0 %v10302_v53 }
 0x479   :  { %3652 = vmatpush1.bf16.msra.mxu1 %v10304_v56  ;;  %3693 = vmatpush1.bf16.msra.mxu0 %v10306_v58  ;;  %v3416_v56 = vrot.slane %v10347_v61, 7 }
 0x47a   :  { %3653 = vmatprep.subr.bf16.mxu1 %v10312_v59  ;;  %3694 = vmatprep.subr.bf16.mxu0 %v10314_v55 }
 0x47d   :  { %3654 = vmatpush1.bf16.msra.mxu1 %v10316_v20  ;;  %3695 = vmatpush1.bf16.msra.mxu0 %v10318_v24 }
 0x47e   :  { %3655 = vmatprep.subr.bf16.mxu1 %v10326_v29  ;;  %3696 = vmatprep.subr.bf16.mxu0 %v10330_v26 }
 0x481   :  { %3656 = vmatpush1.bf16.msra.mxu1 %v10324_v28  ;;  %3697 = vmatpush1.bf16.msra.mxu0 %v10328_v33 }
 0x482   :  { %3932 = vmatprep.subr.bf16.mxu1 %v10332_v31  ;;  %3973 = vmatprep.subr.bf16.mxu0 %v10335_v25 }
 0x4d8   :  { %v2731_v45 = vpop.f32.mrf.mxu1  ;;  %v2772_v54 = vpop.f32.mrf.mxu0 }
 0x4d9   :  { %v2783_v42 = vrot.slane %v2731_v45, 5  ;;  %v2785_v12 = vrot.slane %v2772_v54, 5  ;;  %v11783_v54 = vld [vmem:[#allocation20_spill] sm:$0xff] }
 0x4da   :  { %v2733_v27 = vpop.f32.mrf.mxu1  ;;  %v2774_v46 = vpop.f32.mrf.mxu0 }
 0x4db   :  { %v2791_v21 = vadd.f32 %v2783_v42, %v9886_v40  ;;  %v2784_v13 = vrot.slane %v2733_v27, 5  ;;  %v2793_v22 = vadd.f32 %v2785_v12, %v9891_v51  ;;  %v2786_v23 = vrot.slane %v2774_v46, 5  ;;  %v11784_v42 = vld [vmem:[#allocation21_spill] sm:$0xff]  ;;  %v11785_v27 = vld [vmem:[#allocation22_spill] sm:$0xff]  ;;  %v11786_v46 = vld [vmem:[#allocation23_spill] sm:$0xff] }
 0x4dc   :  { %v2735_v15 = vpop.f32.mrf.mxu1  ;;  %v2776_v16 = vpop.f32.mrf.mxu0  ;;  %v11788_v12 = vld [vmem:[#allocation25_spill] sm:$0xff] }
 0x4dd   :  { %9399 = vtanh.f32 %v2791_v21  ;;  %v2792_v17 = vadd.f32 %v2784_v13, %v9888_v47  ;;  %v2794_v41 = vadd.f32 %v2786_v23, %v9896_v30  ;;  %v11787_v21 = vld [vmem:[#allocation24_spill] sm:$0xff]  ;;  %v11792_v13 = vld [vmem:[#allocation29_spill] sm:$0xff]  ;;  %v11793_v15 = vld [vmem:[#allocation30_spill] sm:$0xff] }
 0x4de   :  { %v2736_v18 = vpop.f32.mrf.mxu1  ;;  %v2777_v19 = vpop.f32.mrf.mxu0  ;;  %v11794_v16 = vld [vmem:[#allocation31_spill] sm:$0xff] }
 0x4df   :  { %9401 = vtanh.f32 %v2792_v17  ;;  %v11795_v17 = vld [vmem:[#allocation32_spill] sm:$0xff]  ;;  %v11796_v18 = vld [vmem:[#allocation33_spill] sm:$0xff]  ;;  %v11797_v19 = vld [vmem:[#allocation34_spill] sm:$0xff] }
 0x4e0   :  { %9403 = vtanh.f32 %v2793_v22 }
 0x4e1   :  { %9405 = vtanh.f32 %v2794_v41  ;;  %v11798_v41 = vld [vmem:[#allocation35_spill] sm:$0xff] }
 0x4ea   :  { %v9400_v49 = vpop.eup %9399 }
 0x4eb   :  { %v3409_v43 = vmul.f32 0.5, %v9400_v49  ;;  %v11799_v49 = vld [vmem:[#allocation36_spill] sm:$0xff] }
 0x4ec   :  { %v9402_v44 = vpop.eup %9401 }
 0x4ed   :  { %v3410_v52 = vadd.f32 0.5, %v3409_v43  ;;  %v3411_v35 = vmul.f32 0.5, %v9402_v44  ;;  %v9404_v58 = vpop.eup %9403  ;;  %v11800_v43 = vld [vmem:[#allocation37_spill] sm:$0xff]  ;;  %v11801_v44 = vld [vmem:[#allocation38_spill] sm:$0xff] }
 0x4ee   :  { %v9406_v29 = vpop.eup %9405 }
 0x4ef   :  { %v3412_v53 = vadd.f32 0.5, %v3411_v35  ;;  %v3419_v55 = vmul.f32 %v9404_v58, %v3410_v52  ;;  %v3413_v1 = vmul.f32 0.5, %v9406_v29 }
 0x4f1   :  { %v3418_v59 = vmul.f32 %v3416_v56, %v3412_v53  ;;  %v3414_v32 = vadd.f32 0.5, %v3413_v1  ;;  %v11802_v53 = vld [vmem:[#allocation39_spill] sm:$0xff]  ;;  %v11803_v56 = vld [vmem:[#allocation40_spill] sm:$0xff] }
 0x4f3   :  { %v10600_v20 = vadd.f32 %v3419_v55, %v3418_v59 }
 0x4f5   :  { %9407 = vtanh.f32 %v10600_v20 }
 0x4f8   :  { %v3022_v24 = vpop.f32.mrf.mxu1  ;;  %v3063_v28 = vpop.f32.mrf.mxu0 }
 0x4fa   :  { %v3024_v33 = vpop.f32.mrf.mxu1  ;;  %v3065_v26 = vpop.f32.mrf.mxu0 }
 0x4fb   :  { %v3074_v22 = vcombine.low %v3022_v24, %v3024_v33  ;;  %v3075_v23 = vcombine.low %v3063_v28, %v3065_v26  ;;  %v11804_v24 = vld [vmem:[#allocation41_spill] sm:$0xff]  ;;  %v11805_v28 = vld [vmem:[#allocation42_spill] sm:$0xff] }
 0x4fc   :  { %v3026_v31 = vpop.f32.mrf.mxu1  ;;  %v3067_v25 = vpop.f32.mrf.mxu0 }
 0x4fd   :  { %v3082_v52 = vrot.slane %v3074_v22, %v10163_v57  ;;  %v3089_v35 = vrot.slane %v3075_v23, %v10163_v57  ;;  %v11823_v22 = vld [vmem:[#allocation60_spill] sm:$0xff]  ;;  %v11824_v23 = vld [vmem:[#allocation61_spill] sm:$0xff] }
 0x4fe   :  { %v3027_v3 = vpop.f32.mrf.mxu1  ;;  %v3068_v2 = vpop.f32.mrf.mxu0 }
 0x4ff   :  { %v3090_v55 = vcombine.low %v3082_v52, %v3089_v35  ;;  %v11806_v2 = vld [vmem:[#allocation43_spill] sm:$0xff] }
 0x501   :  { %v3097_v3 = vrot.slane %v3090_v55, %v10163_v57 }
 0x502   :  { %v9408_v60 = vpop.eup %9407 }
 0x503   :  { %v3422_v61 = vmul.f32 %v9408_v60, %v3414_v32  ;;  %v11807_v32 = vld [vmem:[#allocation44_spill] sm:$0xff]  ;;  %v8166_v60 = vld [vmem:[%s11481_s5 + $0x4] sm:$0xf] }
 0x505   :  { %v3443_v63 = vpack.c.bf16 %v3422_v61, %v3422_v61 }
 0x507   :  { %v3477_v34 = vshrl.u32 %v3443_v63, 16 }
 0x509   :  { %v3479_v45 = vrot.slane %v3477_v34, 1 }
 0x50b   :  { %3674 = vmatmul.mubr.bf16.vlgmr.msra.gmra.mxu1 %v3479_v45  ;;  %3715 = vmatmul.mubr.bf16.vlgmr.msra.gmra.mxu0 %v3479_v45 }
 0x50c   :  { %3933 = vmatpush1.bf16.msra.mxu1 %v10350_v9  ;;  %3974 = vmatpush1.bf16.msra.mxu0 %v10352_v10  ;;  %v11789_v9 = vld [vmem:[#allocation26_spill] sm:$0xff]  ;;  %v11790_v10 = vld [vmem:[#allocation27_spill] sm:$0xff] }
 0x50d   :  { %3934 = vmatprep.subr.bf16.mxu1 %v10356_v50  ;;  %3975 = vmatprep.subr.bf16.mxu0 %v11783_v54  ;;  %v11791_v50 = vld [vmem:[#allocation28_spill] sm:$0xff]  ;;  %v3099_v54 = vadd.f32 %v8166_v60, %v3097_v3  ;;  %v10702_v3 = vld [vmem:[#allocation10 + $0xc8] ss:$16 sps:$4 sm:$0xff]   ;;  %v10720_v60 = vld [vmem:[#allocation10 + $0x84] ss:$16 sps:$4 sm:$0xff]  }
 0x50e   :  { %3964 = vmatprep.mubr.bf16.mxu1 %v11679_v48  ;;  %4005 = vmatprep.mubr.bf16.mxu0 %v11679_v48 }
 0x510   :  { %3935 = vmatpush1.bf16.msra.mxu1 %v11784_v42  ;;  %3976 = vmatpush1.bf16.msra.mxu0 %v11785_v27  ;;  %v11810_v27 = vld [vmem:[#allocation47_spill] sm:$0xff] }
 0x511   :  { %3936 = vmatprep.subr.bf16.mxu1 %v11786_v46  ;;  %3977 = vmatprep.subr.bf16.mxu0 %v11787_v21  ;;  %v11811_v46 = vld [vmem:[#allocation48_spill] sm:$0xff] }
 0x514   :  { %3937 = vmatpush1.bf16.msra.mxu1 %v11788_v12  ;;  %3978 = vmatpush1.bf16.msra.mxu0 %v11789_v9  ;;  %v11812_v12 = vld [vmem:[#allocation49_spill] sm:$0xff]  ;;  %v11813_v9 = vld [vmem:[#allocation50_spill] sm:$0xff] }
 0x515   :  { %3938 = vmatprep.subr.bf16.mxu1 %v11790_v10  ;;  %3979 = vmatprep.subr.bf16.mxu0 %v11791_v50  ;;  %v11815_v10 = vld [vmem:[#allocation52_spill] sm:$0xff]  ;;  %v11816_v50 = vld [vmem:[#allocation53_spill] sm:$0xff] }
 0x518   :  { %3939 = vmatpush1.bf16.msra.mxu1 %v11792_v13  ;;  %3980 = vmatpush1.bf16.msra.mxu0 %v11793_v15  ;;  %v11817_v13 = vld [vmem:[#allocation54_spill] sm:$0xff]  ;;  %v11818_v15 = vld [vmem:[#allocation55_spill] sm:$0xff] }
 0x519   :  { %3940 = vmatprep.subr.bf16.mxu1 %v11794_v16  ;;  %3981 = vmatprep.subr.bf16.mxu0 %v11795_v17  ;;  %v11819_v16 = vld [vmem:[#allocation56_spill] sm:$0xff]  ;;  %v11820_v17 = vld [vmem:[#allocation57_spill] sm:$0xff] }
 0x51c   :  { %3941 = vmatpush1.bf16.msra.mxu1 %v11796_v18  ;;  %3982 = vmatpush1.bf16.msra.mxu0 %v11797_v19  ;;  %v11821_v18 = vld [vmem:[#allocation58_spill] sm:$0xff]  ;;  %v11822_v19 = vld [vmem:[#allocation59_spill] sm:$0xff] }
 0x51d   :  { %3942 = vmatprep.subr.bf16.mxu1 %v11798_v41  ;;  %3983 = vmatprep.subr.bf16.mxu0 %v11799_v49  ;;  %v11825_v41 = vld [vmem:[#allocation62_spill] sm:$0xff]  ;;  %v11826_v49 = vld [vmem:[#allocation63_spill] sm:$0xff] }
 0x520   :  { %3943 = vmatpush1.bf16.msra.mxu1 %v11800_v43  ;;  %3984 = vmatpush1.bf16.msra.mxu0 %v11801_v44  ;;  %v11827_v43 = vld [vmem:[#allocation64_spill] sm:$0xff] }
 0x521   :  { %3944 = vmatprep.subr.bf16.mxu1 %v11802_v53  ;;  %3985 = vmatprep.subr.bf16.mxu0 %v11803_v56  ;;  %v11828_v53 = vld [vmem:[#allocation65_spill] sm:$0xff]  ;;  %v11829_v56 = vld [vmem:[#allocation66_spill] sm:$0xff] }
 0x524   :  { %v3327_v58 = vpop.f32.mrf.mxu1  ;;  %v3368_v59 = vpop.f32.mrf.mxu0  ;;  %3945 = vmatpush1.bf16.msra.mxu1 %v10428_v0  ;;  %3986 = vmatpush1.bf16.msra.mxu0 %v10430_v14 }
 0x525   :  { %3946 = vmatprep.subr.bf16.mxu1 %v11804_v24  ;;  %3987 = vmatprep.subr.bf16.mxu0 %v11805_v28 }
 0x526   :  { %v3329_v29 = vpop.f32.mrf.mxu1  ;;  %v3370_v33 = vpop.f32.mrf.mxu0 }
 0x527   :  { %v3379_v26 = vcombine.low %v3327_v58, %v3329_v29  ;;  %v3380_v31 = vcombine.low %v3368_v59, %v3370_v33 }
 0x528   :  { %v3331_v25 = vpop.f32.mrf.mxu1  ;;  %v3372_v1 = vpop.f32.mrf.mxu0  ;;  %3947 = vmatpush1.bf16.msra.mxu1 %v10440_v6  ;;  %3988 = vmatpush1.bf16.msra.mxu0 %v10442_v36  ;;  %v11808_v6 = vld [vmem:[#allocation45_spill] sm:$0xff]  ;;  %v11809_v36 = vld [vmem:[#allocation46_spill] sm:$0xff] }
 0x529   :  { %v3387_v0 = vrot.slane %v3379_v26, %v10163_v57  ;;  %v3394_v14 = vrot.slane %v3380_v31, %v10163_v57  ;;  %4237 = vmatprep.subr.bf16.mxu1 %v11806_v2  ;;  %4278 = vmatprep.subr.bf16.mxu0 %v11807_v32  ;;  %v10682_v31 = vld [vmem:[#allocation10 + $0xe4] ss:$16 sps:$4 sm:$0xff]   ;;  %v10696_v25 = vld [vmem:[#allocation10 + $0xcc] ss:$16 sps:$4 sm:$0xff]   ;;  %v10700_v1 = vld [vmem:[#allocation10 + $0xc0] ss:$16 sps:$4 sm:$0xff]  }
 0x52a   :  { %v3332_v61 = vpop.f32.mrf.mxu1  ;;  %v3373_v63 = vpop.f32.mrf.mxu0  ;;  %v10712_v2 = vld [vmem:[#allocation10 + $0xa0] ss:$16 sps:$4 sm:$0xff]   ;;  %v10714_v32 = vld [vmem:[#allocation10 + $0xa8] ss:$16 sps:$4 sm:$0xff]  }
 0x52b   :  { %v3395_v34 = vcombine.low %v3387_v0, %v3394_v14  ;;  %3965 = vmatmul.mubr.bf16.vlgmr.msra.gmra.mxu1 %v3479_v45  ;;  %4006 = vmatmul.mubr.bf16.vlgmr.msra.gmra.mxu0 %v3479_v45  ;;  %v11814_v45 = vld [vmem:[#allocation51_spill] sm:$0xff]  ;;  %v10710_v14 = vld [vmem:[#allocation10 + $0xac] ss:$16 sps:$4 sm:$0xff]   ;;  %v10724_v63 = vld [vmem:[#allocation10 + $0x80] ss:$16 sps:$4 sm:$0xff]  }
 0x52c   :  { %4238 = vmatpush1.bf16.msra.mxu1 %v11808_v6  ;;  %4279 = vmatpush1.bf16.msra.mxu0 %v11809_v36  ;;  %v10708_v0 = vld [vmem:[#allocation10 + $0xa4] ss:$16 sps:$4 sm:$0xff]   ;;  %v10722_v61 = vld [vmem:[#allocation10 + $0x8c] ss:$16 sps:$4 sm:$0xff]  }
 0x52d   :  { %v3402_v42 = vrot.slane %v3395_v34, %v10163_v57  ;;  %4239 = vmatprep.subr.bf16.mxu1 %v11810_v27  ;;  %4280 = vmatprep.subr.bf16.mxu0 %v11811_v46  ;;  %v10726_v34 = vld [vmem:[#allocation10 + $0x88] ss:$16 sps:$4 sm:$0xff]   ;;  %v10732_v6 = vld [vmem:[#allocation10 + $0x64] ss:$16 sps:$4 sm:$0xff]   ;;  %v10734_v36 = vld [vmem:[#allocation10 + $0x6c] ss:$16 sps:$4 sm:$0xff]  }
 0x52e   :  { %4269 = vmatprep.mubr.bf16.mxu1 %v11679_v48  ;;  %4310 = vmatprep.mubr.bf16.mxu0 %v11679_v48  ;;  %v10744_v27 = vld [vmem:[#allocation10 + $0x44] ss:$16 sps:$4 sm:$0xff]   ;;  %v10746_v46 = vld [vmem:[#allocation10 + $0x4c] ss:$16 sps:$4 sm:$0xff]  }
 0x52f   :  { %v3404_v21 = vadd.f32 %v3402_v42, %v3099_v54  ;;  %v10736_v54 = vld [vmem:[#allocation10 + $0x60] ss:$16 sps:$4 sm:$0xff]   ;;  %v10738_v42 = vld [vmem:[#allocation10 + $0x68] ss:$16 sps:$4 sm:$0xff]  }
 0x530   :  { %4240 = vmatpush1.bf16.msra.mxu1 %v11812_v12  ;;  %4281 = vmatpush1.bf16.msra.mxu0 %v11813_v9  ;;  %v10750_v12 = vld [vmem:[#allocation10 + $0x48] ss:$16 sps:$4 sm:$0xff]   ;;  %v10756_v9 = vld [vmem:[#allocation10 + $0x24] ss:$16 sps:$4 sm:$0xff]  }
 0x531   :  { %9409 = vtanh.f32 %v3404_v21  ;;  %4241 = vmatprep.subr.bf16.mxu1 %v11814_v45  ;;  %4282 = vmatprep.subr.bf16.mxu0 %v11815_v10  ;;  %v10748_v21 = vld [vmem:[#allocation10 + $0x40] ss:$16 sps:$4 sm:$0xff]   ;;  %v10758_v45 = vld [vmem:[#allocation10 + $0x2c] ss:$16 sps:$4 sm:$0xff]  }
 0x532   :  { %v10760_v10 = vld [vmem:[#allocation10 + $0x20] ss:$16 sps:$4 sm:$0xff]  }
 0x534   :  { %4242 = vmatpush1.bf16.msra.mxu1 %v11816_v50  ;;  %4283 = vmatpush1.bf16.msra.mxu0 %v11817_v13  ;;  %v10762_v50 = vld [vmem:[#allocation10 + $0x28] ss:$16 sps:$4 sm:$0xff]   ;;  %v10768_v13 = vld [vmem:[#allocation10] ss:$16 sps:$4 sm:$0xff]  }
 0x535   :  { %4243 = vmatprep.subr.bf16.mxu1 %v11818_v15  ;;  %4284 = vmatprep.subr.bf16.mxu0 %v11819_v16  ;;  %v10770_v15 = vld [vmem:[#allocation10 + $0x4] ss:$16 sps:$4 sm:$0xff]   ;;  %v10772_v16 = vld [vmem:[#allocation10 + $0x8] ss:$16 sps:$4 sm:$0xff]  }
 0x538   :  { %4244 = vmatpush1.bf16.msra.mxu1 %v11820_v17  ;;  %4285 = vmatpush1.bf16.msra.mxu0 %v11821_v18  ;;  %v10774_v17 = vld [vmem:[#allocation10 + $0xc] ss:$16 sps:$4 sm:$0xff]   ;;  %v10776_v18 = vld [vmem:[#allocation8 + $0x1e4] ss:$16 sps:$4 sm:$0xff]  }
 0x539   :  { %4245 = vmatprep.subr.bf16.mxu1 %v11822_v19  ;;  %4286 = vmatprep.subr.bf16.mxu0 %v11823_v22  ;;  %v10779_v19 = vld [vmem:[#allocation8 + $0x1ec] ss:$16 sps:$4 sm:$0xff]  }
 0x53c   :  { %4246 = vmatpush1.bf16.msra.mxu1 %v11824_v23  ;;  %4287 = vmatpush1.bf16.msra.mxu0 %v11825_v41 }
 0x53d   :  { %4247 = vmatprep.subr.bf16.mxu1 %v11826_v49  ;;  %4288 = vmatprep.subr.bf16.mxu0 %v11827_v43 }
 0x53e   :  { %v9410_v44 = vpop.eup %9409 }
 0x53f   :  { %v3424_v52 = vmul.f32 0.5, %v9410_v44  ;;  %v3427_v35 = vrot.slane %v9410_v44, 1  ;;  %v3436_v24 = vrot.slane %v9410_v44, 2 }
 0x540   :  { %4248 = vmatpush1.bf16.msra.mxu1 %v11828_v53  ;;  %4289 = vmatpush1.bf16.msra.mxu0 %v11829_v56 }
 0x541   :  { %4249 = vmatprep.subr.bf16.mxu1 %v10529_v5  ;;  %4290 = vmatprep.subr.bf16.mxu0 %v10531_v62  ;;  %v3425_v58 = vadd.f32 0.5, %v3424_v52  ;;  %v3429_v59 = vmul.f32 0.5, %v3427_v35  ;;  %v3431_v62 = vrot.slane %v9410_v44, 3 }
 0x543   :  { %v3430_v55 = vadd.f32 0.5, %v3429_v59  ;;  %v3438_v29 = vmul.f32 %v3436_v24, %v3425_v58  ;;  %v3433_v5 = vmul.f32 0.5, %v3431_v62 }
 0x544   :  { %4250 = vmatpush1.bf16.msra.mxu1 %v10535_v11  ;;  %4291 = vmatpush1.bf16.msra.mxu0 %v10537_v4 }
 0x545   :  { %4251 = vmatprep.subr.bf16.mxu1 %v10541_v39  ;;  %4292 = vmatprep.subr.bf16.mxu0 %v10543_v8  ;;  %v3435_v28 = vmul.f32 %v3430_v55, %v10546_v7  ;;  %v3434_v11 = vadd.f32 0.5, %v3433_v5  ;;  %v10684_v8 = vld [vmem:[#allocation10 + $0xec] ss:$16 sps:$4 sm:$0xff]   ;;  %v10686_v7 = vld [vmem:[#allocation10 + $0xe0] ss:$16 sps:$4 sm:$0xff]  }
 0x547   :  { %v10677_v33 = vadd.f32 %v3438_v29, %v3435_v28 }
 0x548   :  { %4252 = vmatpush1.bf16.msra.mxu1 %v10550_v37  ;;  %4293 = vmatpush1.bf16.msra.mxu0 %v10552_v38  ;;  %v10688_v37 = vld [vmem:[#allocation10 + $0xe8] ss:$16 sps:$4 sm:$0xff]   ;;  %v10694_v38 = vld [vmem:[#allocation10 + $0xc4] ss:$16 sps:$4 sm:$0xff]  }
 0x549   :  { %9411 = vtanh.f32 %v10677_v33  ;;  %4583 = vmatprep.subr.bf16.mxu1 %v10682_v31  ;;  %4624 = vmatprep.subr.bf16.mxu0 %v10684_v8 }
 0x556   :  { %v9412_v26 = vpop.eup %9411 }
 0x557   :  { %v3441_v4 = vmul.f32 %v9412_v26, %v3434_v11 }
 0x559   :  { %3442 = vst [vmem:[#allocation11 + $0x2] sm:$0x1] %v3441_v4  ;;  %v4044_v39 = vpack.c.bf16 %v3441_v4, %v3441_v4 }
 0x55b   :  { %4270 = vmatmul.mubr.bf16.vlgmr.msra.gmra.mxu1 %v4044_v39  ;;  %4311 = vmatmul.mubr.bf16.vlgmr.msra.gmra.mxu0 %v4044_v39 }
 0x55c   :  { %4584 = vmatpush1.bf16.msra.mxu1 %v10686_v7  ;;  %4625 = vmatpush1.bf16.msra.mxu0 %v10688_v37 }
 0x55d   :  { %4615 = vmatprep.mubr.bf16.mxu1 %v11679_v48  ;;  %4656 = vmatprep.mubr.bf16.mxu0 %v11679_v48 }
 0x55e   :  { %4585 = vmatprep.subr.bf16.mxu1 %v10694_v38  ;;  %4626 = vmatprep.subr.bf16.mxu0 %v10696_v25 }
 0x560   :  { %4586 = vmatpush1.bf16.msra.mxu1 %v10700_v1  ;;  %4627 = vmatpush1.bf16.msra.mxu0 %v10702_v3 }
 0x561   :  { %4587 = vmatprep.subr.bf16.mxu1 %v10708_v0  ;;  %4628 = vmatprep.subr.bf16.mxu0 %v10710_v14 }
 0x564   :  { %4588 = vmatpush1.bf16.msra.mxu1 %v10712_v2  ;;  %4629 = vmatpush1.bf16.msra.mxu0 %v10714_v32 }
 0x565   :  { %4589 = vmatprep.subr.bf16.mxu1 %v10720_v60  ;;  %4630 = vmatprep.subr.bf16.mxu0 %v10722_v61 }
 0x568   :  { %4590 = vmatpush1.bf16.msra.mxu1 %v10724_v63  ;;  %4631 = vmatpush1.bf16.msra.mxu0 %v10726_v34 }
 0x569   :  { %4591 = vmatprep.subr.bf16.mxu1 %v10732_v6  ;;  %4632 = vmatprep.subr.bf16.mxu0 %v10734_v36 }
 0x56c   :  { %4592 = vmatpush1.bf16.msra.mxu1 %v10736_v54  ;;  %4633 = vmatpush1.bf16.msra.mxu0 %v10738_v42 }
 0x56d   :  { %4593 = vmatprep.subr.bf16.mxu1 %v10744_v27  ;;  %4634 = vmatprep.subr.bf16.mxu0 %v10746_v46 }
 0x570   :  { %4594 = vmatpush1.bf16.msra.mxu1 %v10748_v21  ;;  %4635 = vmatpush1.bf16.msra.mxu0 %v10750_v12 }
 0x571   :  { %4595 = vmatprep.subr.bf16.mxu1 %v10756_v9  ;;  %4636 = vmatprep.subr.bf16.mxu0 %v10758_v45 }
 0x574   :  { %4596 = vmatpush1.bf16.msra.mxu1 %v10760_v10  ;;  %4637 = vmatpush1.bf16.msra.mxu0 %v10762_v50 }
 0x575   :  { %4597 = vmatprep.subr.bf16.mxu1 %v10770_v15  ;;  %4638 = vmatprep.subr.bf16.mxu0 %v10774_v17 }
 0x578   :  { %4598 = vmatpush1.bf16.msra.mxu1 %v10768_v13  ;;  %4639 = vmatpush1.bf16.msra.mxu0 %v10772_v16 }
 0x579   :  { %4874 = vmatprep.subr.bf16.mxu1 %v10776_v18  ;;  %4915 = vmatprep.subr.bf16.mxu0 %v10779_v19 }
 0x5cb   :  { %v3675_v22 = vpop.f32.mrf.mxu1  ;;  %v3716_v23 = vpop.f32.mrf.mxu0 }
 0x5cc   :  { %v3727_v41 = vrot.slane %v3675_v22, 4  ;;  %v3729_v52 = vrot.slane %v3716_v23, 4  ;;  %v4360_v22 = vrot.slane %v10600_v20, 7 }
 0x5cd   :  { %v3677_v49 = vpop.f32.mrf.mxu1  ;;  %v3718_v43 = vpop.f32.mrf.mxu0 }
 0x5ce   :  { %v3735_v44 = vadd.f32 %v3727_v41, %v9886_v40  ;;  %v3728_v35 = vrot.slane %v3677_v49, 4  ;;  %v3737_v24 = vadd.f32 %v3729_v52, %v9891_v51  ;;  %v3730_v28 = vrot.slane %v3718_v43, 4 }
 0x5cf   :  { %v3679_v53 = vpop.f32.mrf.mxu1  ;;  %v3720_v56 = vpop.f32.mrf.mxu0 }
 0x5d0   :  { %9413 = vtanh.f32 %v3735_v44  ;;  %v3736_v58 = vadd.f32 %v3728_v35, %v9888_v47  ;;  %v3738_v29 = vadd.f32 %v3730_v28, %v9896_v30 }
 0x5d1   :  { %v3680_v59 = vpop.f32.mrf.mxu1  ;;  %v3721_v55 = vpop.f32.mrf.mxu0 }
 0x5d2   :  { %9415 = vtanh.f32 %v3736_v58 }
 0x5d3   :  { %9417 = vtanh.f32 %v3737_v24 }
 0x5d4   :  { %9419 = vtanh.f32 %v3738_v29 }
 0x5dd   :  { %v9414_v62 = vpop.eup %9413 }
 0x5de   :  { %v4353_v5 = vmul.f32 0.5, %v9414_v62 }
 0x5df   :  { %v9416_v11 = vpop.eup %9415 }
 0x5e0   :  { %v4354_v26 = vadd.f32 0.5, %v4353_v5  ;;  %v4355_v4 = vmul.f32 0.5, %v9416_v11  ;;  %v9418_v23 = vpop.eup %9417  ;;  %v10802_v11 = vld [vmem:[#allocation8 + $0x1e0] ss:$16 sps:$4 sm:$0xff]  }
 0x5e1   :  { %v9420_v35 = vpop.eup %9419 }
 0x5e2   :  { %v4356_v39 = vadd.f32 0.5, %v4355_v4  ;;  %v4363_v49 = vmul.f32 %v9418_v23, %v4354_v26  ;;  %v4357_v55 = vmul.f32 0.5, %v9420_v35  ;;  %v10804_v26 = vld [vmem:[#allocation8 + $0x1e8] ss:$16 sps:$4 sm:$0xff]   ;;  %v10816_v23 = vld [vmem:[#allocation8 + $0x1c0] ss:$16 sps:$4 sm:$0xff]  }
 0x5e3   :  { %v10824_v35 = vld [vmem:[#allocation8 + $0x1ac] ss:$16 sps:$4 sm:$0xff]  }
 0x5e4   :  { %v4362_v41 = vmul.f32 %v4360_v22, %v4356_v39  ;;  %v4358_v28 = vadd.f32 0.5, %v4357_v55  ;;  %v10808_v39 = vld [vmem:[#allocation8 + $0x1c4] ss:$16 sps:$4 sm:$0xff]   ;;  %v10810_v22 = vld [vmem:[#allocation8 + $0x1cc] ss:$16 sps:$4 sm:$0xff]   ;;  %11832 = vst [vmem:[#allocation22_spill] sm:$0xff] %v10824_v35 }
 0x5e5   :  { %v10836_v55 = vld [vmem:[#allocation8 + $0x184] ss:$16 sps:$4 sm:$0xff]  }
 0x5e6   :  { %v10791_v44 = vadd.f32 %v4363_v49, %v4362_v41  ;;  %v10818_v41 = vld [vmem:[#allocation8 + $0x1c8] ss:$16 sps:$4 sm:$0xff]   ;;  %v10822_v49 = vld [vmem:[#allocation8 + $0x1a4] ss:$16 sps:$4 sm:$0xff]   ;;  %11835 = vst [vmem:[#allocation25_spill] sm:$0xff] %v10836_v55 }
 0x5e7   :  { %11830 = vst [vmem:[#allocation20_spill] sm:$0xff] %v10818_v41  ;;  %11831 = vst [vmem:[#allocation21_spill] sm:$0xff] %v10822_v49 }
 0x5e8   :  { %9421 = vtanh.f32 %v10791_v44 }
 0x5eb   :  { %v10794_v52 = vpop.f32.mrf.mxu1  ;;  %v10796_v43 = vpop.f32.mrf.mxu0 }
 0x5ed   :  { %v10798_v53 = vpop.f32.mrf.mxu1  ;;  %v10800_v56 = vpop.f32.mrf.mxu0 }
 0x5ef   :  { %v3970_v58 = vpop.f32.mrf.mxu1  ;;  %v4011_v59 = vpop.f32.mrf.mxu0 }
 0x5f0   :  { %v10830_v58 = vld [vmem:[#allocation8 + $0x1a0] ss:$16 sps:$4 sm:$0xff]   ;;  %v10832_v59 = vld [vmem:[#allocation8 + $0x1a8] ss:$16 sps:$4 sm:$0xff]  }
 0x5f1   :  { %v3971_v20 = vpop.f32.mrf.mxu1  ;;  %v4012_v24 = vpop.f32.mrf.mxu0  ;;  %11833 = vst [vmem:[#allocation23_spill] sm:$0xff] %v10830_v58  ;;  %11834 = vst [vmem:[#allocation24_spill] sm:$0xff] %v10832_v59 }
 0x5f2   :  { %v10838_v20 = vld [vmem:[#allocation8 + $0x18c] ss:$16 sps:$4 sm:$0xff]   ;;  %v10842_v24 = vld [vmem:[#allocation8 + $0x180] ss:$16 sps:$4 sm:$0xff]  }
 0x5f3   :  { %11836 = vst [vmem:[#allocation26_spill] sm:$0xff] %v10838_v20  ;;  %11837 = vst [vmem:[#allocation27_spill] sm:$0xff] %v10842_v24 }
 0x5f5   :  { %v9422_v29 = vpop.eup %9421 }
 0x5f6   :  { %v4366_v62 = vmul.f32 %v9422_v29, %v4358_v28  ;;  %v10844_v28 = vld [vmem:[#allocation8 + $0x188] ss:$16 sps:$4 sm:$0xff]   ;;  %v10848_v29 = vld [vmem:[#allocation8 + $0x164] ss:$16 sps:$4 sm:$0xff]  }
 0x5f7   :  { %11838 = vst [vmem:[#allocation28_spill] sm:$0xff] %v10844_v28  ;;  %11839 = vst [vmem:[#allocation29_spill] sm:$0xff] %v10848_v29 }
 0x5f8   :  { %v4387_v5 = vpack.c.bf16 %v4366_v62, %v4366_v62  ;;  %v10850_v62 = vld [vmem:[#allocation8 + $0x16c] ss:$16 sps:$4 sm:$0xff]  }
 0x5f9   :  { %11840 = vst [vmem:[#allocation30_spill] sm:$0xff] %v10850_v62 }
 0x5fa   :  { %v10806_v4 = vrot.slane %v4387_v5, 2  ;;  %v10854_v5 = vld [vmem:[#allocation8 + $0x160] ss:$16 sps:$4 sm:$0xff]  }
 0x5fb   :  { %11841 = vst [vmem:[#allocation31_spill] sm:$0xff] %v10854_v5 }
 0x5fc   :  { %4616 = vmatmul.mubr.bf16.vlgmr.msra.gmra.mxu1 %v10806_v4  ;;  %4657 = vmatmul.mubr.bf16.vlgmr.msra.gmra.mxu0 %v10806_v4 }
 0x5fd   :  { %4875 = vmatpush1.bf16.msra.mxu1 %v10802_v11  ;;  %4916 = vmatpush1.bf16.msra.mxu0 %v10804_v26 }
 0x5fe   :  { %4876 = vmatprep.subr.bf16.mxu1 %v10808_v39  ;;  %4917 = vmatprep.subr.bf16.mxu0 %v10810_v22 }
 0x5ff   :  { %4906 = vmatprep.mubr.bf16.mxu1 %v11679_v48  ;;  %4947 = vmatprep.mubr.bf16.mxu0 %v11679_v48 }
 0x601   :  { %4877 = vmatpush1.bf16.msra.mxu1 %v10816_v23  ;;  %4918 = vmatpush1.bf16.msra.mxu0 %v10818_v41 }
 0x602   :  { %4878 = vmatprep.subr.bf16.mxu1 %v10822_v49  ;;  %4919 = vmatprep.subr.bf16.mxu0 %v10824_v35  ;;  %v10896_v35 = vld [vmem:[#allocation8 + $0x108] ss:$16 sps:$4 sm:$0xff]  }
 0x603   :  { %11854 = vst [vmem:[#allocation44_spill] sm:$0xff] %v10896_v35 }
 0x605   :  { %4879 = vmatpush1.bf16.msra.mxu1 %v10830_v58  ;;  %4920 = vmatpush1.bf16.msra.mxu0 %v10832_v59  ;;  %v10856_v58 = vld [vmem:[#allocation8 + $0x168] ss:$16 sps:$4 sm:$0xff]   ;;  %v10860_v59 = vld [vmem:[#allocation8 + $0x144] ss:$16 sps:$4 sm:$0xff]  }
 0x606   :  { %4880 = vmatprep.subr.bf16.mxu1 %v10836_v55  ;;  %4921 = vmatprep.subr.bf16.mxu0 %v10838_v20  ;;  %11842 = vst [vmem:[#allocation32_spill] sm:$0xff] %v10856_v58  ;;  %11843 = vst [vmem:[#allocation33_spill] sm:$0xff] %v10860_v59  ;;  %v10862_v55 = vld [vmem:[#allocation8 + $0x14c] ss:$16 sps:$4 sm:$0xff]   ;;  %v10866_v20 = vld [vmem:[#allocation8 + $0x140] ss:$16 sps:$4 sm:$0xff]  }
 0x607   :  { %11844 = vst [vmem:[#allocation34_spill] sm:$0xff] %v10862_v55  ;;  %11845 = vst [vmem:[#allocation35_spill] sm:$0xff] %v10866_v20 }
 0x609   :  { %4881 = vmatpush1.bf16.msra.mxu1 %v10842_v24  ;;  %4922 = vmatpush1.bf16.msra.mxu0 %v10844_v28  ;;  %v10868_v24 = vld [vmem:[#allocation8 + $0x148] ss:$16 sps:$4 sm:$0xff]   ;;  %v10872_v28 = vld [vmem:[#allocation8 + $0x124] ss:$16 sps:$4 sm:$0xff]  }
 0x60a   :  { %4882 = vmatprep.subr.bf16.mxu1 %v10848_v29  ;;  %4923 = vmatprep.subr.bf16.mxu0 %v10850_v62  ;;  %11846 = vst [vmem:[#allocation36_spill] sm:$0xff] %v10868_v24  ;;  %11847 = vst [vmem:[#allocation37_spill] sm:$0xff] %v10872_v28  ;;  %v10874_v29 = vld [vmem:[#allocation8 + $0x12c] ss:$16 sps:$4 sm:$0xff]   ;;  %v10878_v62 = vld [vmem:[#allocation8 + $0x120] ss:$16 sps:$4 sm:$0xff]  }
 0x60b   :  { %11848 = vst [vmem:[#allocation38_spill] sm:$0xff] %v10874_v29  ;;  %11849 = vst [vmem:[#allocation39_spill] sm:$0xff] %v10878_v62 }
 0x60d   :  { %4883 = vmatpush1.bf16.msra.mxu1 %v10854_v5  ;;  %4924 = vmatpush1.bf16.msra.mxu0 %v10856_v58  ;;  %v10880_v5 = vld [vmem:[#allocation8 + $0x128] ss:$16 sps:$4 sm:$0xff]   ;;  %v10884_v58 = vld [vmem:[#allocation8 + $0x104] ss:$16 sps:$4 sm:$0xff]  }
 0x60e   :  { %4884 = vmatprep.subr.bf16.mxu1 %v10860_v59  ;;  %4925 = vmatprep.subr.bf16.mxu0 %v10862_v55  ;;  %11850 = vst [vmem:[#allocation40_spill] sm:$0xff] %v10880_v5  ;;  %11851 = vst [vmem:[#allocation41_spill] sm:$0xff] %v10884_v58  ;;  %v10886_v59 = vld [vmem:[#allocation8 + $0x10c] ss:$16 sps:$4 sm:$0xff]   ;;  %v4018_v55 = vcombine.low %v10794_v52, %v10798_v53  ;;  %v10908_v53 = vld [vmem:[#allocation10 + $0x1e0] ss:$16 sps:$4 sm:$0xff]  }
 0x60f   :  { %11852 = vst [vmem:[#allocation42_spill] sm:$0xff] %v10886_v59  ;;  %11857 = vst [vmem:[#allocation47_spill] sm:$0xff] %v10908_v53 }
 0x610   :  { %v4026_v52 = vrot.slane %v4018_v55, %v10163_v57 }
 0x611   :  { %4885 = vmatpush1.bf16.msra.mxu1 %v10866_v20  ;;  %4926 = vmatpush1.bf16.msra.mxu0 %v10868_v24  ;;  %v4019_v20 = vcombine.low %v10796_v43, %v10800_v56  ;;  %v10894_v24 = vld [vmem:[#allocation8 + $0x100] ss:$16 sps:$4 sm:$0xff]   ;;  %v10910_v56 = vld [vmem:[#allocation10 + $0x1e8] ss:$16 sps:$4 sm:$0xff]  }
 0x612   :  { %4886 = vmatprep.subr.bf16.mxu1 %v10872_v28  ;;  %4927 = vmatprep.subr.bf16.mxu0 %v10874_v29  ;;  %11853 = vst [vmem:[#allocation43_spill] sm:$0xff] %v10894_v24  ;;  %v10900_v29 = vld [vmem:[#allocation10 + $0x1e4] ss:$16 sps:$4 sm:$0xff]   ;;  %v10902_v28 = vld [vmem:[#allocation10 + $0x1ec] ss:$16 sps:$4 sm:$0xff]   ;;  %11858 = vst [vmem:[#allocation48_spill] sm:$0xff] %v10910_v56 }
 0x613   :  { %11855 = vst [vmem:[#allocation45_spill] sm:$0xff] %v10900_v29  ;;  %11856 = vst [vmem:[#allocation46_spill] sm:$0xff] %v10902_v28  ;;  %v4033_v43 = vrot.slane %v4019_v20, %v10163_v57 }
 0x615   :  { %4887 = vmatpush1.bf16.msra.mxu1 %v10878_v62  ;;  %4928 = vmatpush1.bf16.msra.mxu0 %v10880_v5  ;;  %v4034_v62 = vcombine.low %v4026_v52, %v4033_v43  ;;  %v10928_v52 = vld [vmem:[#allocation10 + $0x1a4] ss:$16 sps:$4 sm:$0xff]   ;;  %v10930_v43 = vld [vmem:[#allocation10 + $0x1ac] ss:$16 sps:$4 sm:$0xff]  }
 0x616   :  { %4888 = vmatprep.subr.bf16.mxu1 %v10884_v58  ;;  %4929 = vmatprep.subr.bf16.mxu0 %v10886_v59  ;;  %v10914_v59 = vld [vmem:[#allocation10 + $0x1c4] ss:$16 sps:$4 sm:$0xff]   ;;  %v10916_v58 = vld [vmem:[#allocation10 + $0x1cc] ss:$16 sps:$4 sm:$0xff]   ;;  %11861 = vst [vmem:[#allocation51_spill] sm:$0xff] %v10930_v43 }
 0x617   :  { %11859 = vst [vmem:[#allocation49_spill] sm:$0xff] %v10916_v58 }
 0x619   :  { %4889 = vmatpush1.bf16.msra.mxu1 %v10894_v24  ;;  %4930 = vmatpush1.bf16.msra.mxu0 %v10896_v35 }
 0x61a   :  { %5179 = vmatprep.subr.bf16.mxu1 %v10900_v29  ;;  %5220 = vmatprep.subr.bf16.mxu0 %v10902_v28  ;;  %v10922_v29 = vld [vmem:[#allocation10 + $0x1c0] ss:$16 sps:$4 sm:$0xff]   ;;  %v10924_v28 = vld [vmem:[#allocation10 + $0x1c8] ss:$16 sps:$4 sm:$0xff]  }
 0x61b   :  { %v4271_v5 = vpop.f32.mrf.mxu1  ;;  %v4312_v55 = vpop.f32.mrf.mxu0  ;;  %11860 = vst [vmem:[#allocation50_spill] sm:$0xff] %v10924_v28 }
 0x61c   :  { %4907 = vmatmul.mubr.bf16.vlgmr.msra.gmra.mxu1 %v10806_v4  ;;  %4948 = vmatmul.mubr.bf16.vlgmr.msra.gmra.mxu0 %v10806_v4 }
 0x61d   :  { %v4273_v20 = vpop.f32.mrf.mxu1  ;;  %v4314_v35 = vpop.f32.mrf.mxu0  ;;  %5180 = vmatpush1.bf16.msra.mxu1 %v10908_v53  ;;  %5221 = vmatpush1.bf16.msra.mxu0 %v10910_v56  ;;  %v4041_v56 = vrot.slane %v4034_v62, %v10163_v57 }
 0x61e   :  { %v4323_v24 = vcombine.low %v4271_v5, %v4273_v20  ;;  %v4324_v49 = vcombine.low %v4312_v55, %v4314_v35  ;;  %5181 = vmatprep.subr.bf16.mxu1 %v10914_v59  ;;  %5222 = vmatprep.subr.bf16.mxu0 %v10916_v58  ;;  %v8263_v5 = vld [vmem:[%s11481_s5 + $0x4] sm:$0xf] }
 0x61f   :  { %v4275_v4 = vpop.f32.mrf.mxu1  ;;  %v4316_v41 = vpop.f32.mrf.mxu0  ;;  %5211 = vmatprep.mubr.bf16.mxu1 %v11679_v48  ;;  %5252 = vmatprep.mubr.bf16.mxu0 %v11679_v48  ;;  %v4043_v62 = vadd.f32 %v8263_v5, %v4041_v56  ;;  %v10969_v56 = vld [vmem:[#allocation10 + $0x168] ss:$16 sps:$4 sm:$0xff]   ;;  %v10973_v5 = vld [vmem:[#allocation10 + $0x144] ss:$16 sps:$4 sm:$0xff]  }
 0x620   :  { %v4331_v53 = vrot.slane %v4323_v24, %v10163_v57  ;;  %v4338_v35 = vrot.slane %v4324_v49, %v10163_v57  ;;  %v10942_v41 = vld [vmem:[#allocation10 + $0x1a0] ss:$16 sps:$4 sm:$0xff]   ;;  %v10944_v4 = vld [vmem:[#allocation10 + $0x1a8] ss:$16 sps:$4 sm:$0xff]   ;;  %v10948_v49 = vld [vmem:[#allocation10 + $0x184] ss:$16 sps:$4 sm:$0xff]  }
 0x621   :  { %v4276_v55 = vpop.f32.mrf.mxu1  ;;  %v4317_v20 = vpop.f32.mrf.mxu0  ;;  %5182 = vmatpush1.bf16.msra.mxu1 %v10922_v29  ;;  %5223 = vmatpush1.bf16.msra.mxu0 %v10924_v28  ;;  %11862 = vst [vmem:[#allocation52_spill] sm:$0xff] %v10942_v41  ;;  %11863 = vst [vmem:[#allocation53_spill] sm:$0xff] %v10944_v4  ;;  %v10950_v24 = vld [vmem:[#allocation10 + $0x18c] ss:$16 sps:$4 sm:$0xff]   ;;  %v10957_v28 = vld [vmem:[#allocation10 + $0x188] ss:$16 sps:$4 sm:$0xff]  }
 0x622   :  { %v4339_v58 = vcombine.low %v4331_v53, %v4338_v35  ;;  %5183 = vmatprep.subr.bf16.mxu1 %v10928_v52  ;;  %5224 = vmatprep.subr.bf16.mxu0 %v10930_v43  ;;  %11864 = vst [vmem:[#allocation54_spill] sm:$0xff] %v10948_v49  ;;  %11865 = vst [vmem:[#allocation55_spill] sm:$0xff] %v10950_v24  ;;  %v10955_v20 = vld [vmem:[#allocation10 + $0x180] ss:$16 sps:$4 sm:$0xff]   ;;  %v10961_v35 = vld [vmem:[#allocation10 + $0x164] ss:$16 sps:$4 sm:$0xff]  }
 0x623   :  { %11866 = vst [vmem:[#allocation56_spill] sm:$0xff] %v10955_v20  ;;  %11867 = vst [vmem:[#allocation57_spill] sm:$0xff] %v10957_v28  ;;  %v10963_v43 = vld [vmem:[#allocation10 + $0x16c] ss:$16 sps:$4 sm:$0xff]  }
 0x624   :  { %v4346_v55 = vrot.slane %v4339_v58, %v10163_v57  ;;  %11868 = vst [vmem:[#allocation58_spill] sm:$0xff] %v10961_v35  ;;  %11869 = vst [vmem:[#allocation59_spill] sm:$0xff] %v10963_v43  ;;  %v10967_v58 = vld [vmem:[#allocation10 + $0x160] ss:$16 sps:$4 sm:$0xff]  }
 0x625   :  { %5184 = vmatpush1.bf16.msra.mxu1 %v10942_v41  ;;  %5225 = vmatpush1.bf16.msra.mxu0 %v10944_v4  ;;  %11870 = vst [vmem:[#allocation60_spill] sm:$0xff] %v10967_v58  ;;  %11871 = vst [vmem:[#allocation61_spill] sm:$0xff] %v10969_v56 }
 0x626   :  { %v4348_v53 = vadd.f32 %v4346_v55, %v4043_v62  ;;  %5185 = vmatprep.subr.bf16.mxu1 %v10948_v49  ;;  %5226 = vmatprep.subr.bf16.mxu0 %v10950_v24  ;;  %11872 = vst [vmem:[#allocation62_spill] sm:$0xff] %v10973_v5  ;;  %v10975_v62 = vld [vmem:[#allocation10 + $0x14c] ss:$16 sps:$4 sm:$0xff]   ;;  %v10979_v55 = vld [vmem:[#allocation10 + $0x140] ss:$16 sps:$4 sm:$0xff]  }
 0x627   :  { %11873 = vst [vmem:[#allocation63_spill] sm:$0xff] %v10975_v62  ;;  %11874 = vst [vmem:[#allocation64_spill] sm:$0xff] %v10979_v55 }
 0x628   :  { %9423 = vtanh.f32 %v4348_v53  ;;  %v10981_v53 = vld [vmem:[#allocation10 + $0x148] ss:$16 sps:$4 sm:$0xff]  }
 0x629   :  { %5186 = vmatpush1.bf16.msra.mxu1 %v10955_v20  ;;  %5227 = vmatpush1.bf16.msra.mxu0 %v10957_v28  ;;  %11875 = vst [vmem:[#allocation65_spill] sm:$0xff] %v10981_v53  ;;  %v10985_v28 = vld [vmem:[#allocation10 + $0x124] ss:$16 sps:$4 sm:$0xff]  }
 0x62a   :  { %5187 = vmatprep.subr.bf16.mxu1 %v10961_v35  ;;  %5228 = vmatprep.subr.bf16.mxu0 %v10963_v43  ;;  %11876 = vst [vmem:[#allocation66_spill] sm:$0xff] %v10985_v28  ;;  %v10987_v35 = vld [vmem:[#allocation10 + $0x12c] ss:$16 sps:$4 sm:$0xff]   ;;  %v10991_v43 = vld [vmem:[#allocation10 + $0x120] ss:$16 sps:$4 sm:$0xff]  }
 0x62b   :  { %11877 = vst [vmem:[#allocation67_spill] sm:$0xff] %v10987_v35  ;;  %11878 = vst [vmem:[#allocation68_spill] sm:$0xff] %v10991_v43 }
 0x62d   :  { %5188 = vmatpush1.bf16.msra.mxu1 %v10967_v58  ;;  %5229 = vmatpush1.bf16.msra.mxu0 %v10969_v56  ;;  %v10993_v58 = vld [vmem:[#allocation10 + $0x128] ss:$16 sps:$4 sm:$0xff]   ;;  %v10997_v56 = vld [vmem:[#allocation10 + $0x104] ss:$16 sps:$4 sm:$0xff]  }
 0x62e   :  { %5189 = vmatprep.subr.bf16.mxu1 %v10973_v5  ;;  %5230 = vmatprep.subr.bf16.mxu0 %v10975_v62  ;;  %11879 = vst [vmem:[#allocation69_spill] sm:$0xff] %v10993_v58  ;;  %11880 = vst [vmem:[#allocation70_spill] sm:$0xff] %v10997_v56  ;;  %v10999_v5 = vld [vmem:[#allocation10 + $0x10c] ss:$16 sps:$4 sm:$0xff]  }
 0x62f   :  { %11881 = vst [vmem:[#allocation71_spill] sm:$0xff] %v10999_v5 }
 0x631   :  { %5190 = vmatpush1.bf16.msra.mxu1 %v10979_v55  ;;  %5231 = vmatpush1.bf16.msra.mxu0 %v10981_v53  ;;  %v11003_v55 = vld [vmem:[#allocation10 + $0x100] ss:$16 sps:$4 sm:$0xff]   ;;  %v11005_v53 = vld [vmem:[#allocation10 + $0x108] ss:$16 sps:$4 sm:$0xff]  }
 0x632   :  { %5191 = vmatprep.subr.bf16.mxu1 %v10985_v28  ;;  %5232 = vmatprep.subr.bf16.mxu0 %v10987_v35  ;;  %11882 = vst [vmem:[#allocation72_spill] sm:$0xff] %v11003_v55  ;;  %11883 = vst [vmem:[#allocation73_spill] sm:$0xff] %v11005_v53 }
 0x635   :  { %v9424_v62 = vpop.eup %9423  ;;  %5192 = vmatpush1.bf16.msra.mxu1 %v10991_v43  ;;  %5233 = vmatpush1.bf16.msra.mxu0 %v10993_v58 }
 0x636   :  { %5193 = vmatprep.subr.bf16.mxu1 %v10997_v56  ;;  %5234 = vmatprep.subr.bf16.mxu0 %v10999_v5  ;;  %v4368_v28 = vmul.f32 0.5, %v9424_v62  ;;  %v4371_v20 = vrot.slane %v9424_v62, 1  ;;  %v4380_v43 = vrot.slane %v9424_v62, 2  ;;  %v4375_v5 = vrot.slane %v9424_v62, 3  ;;  %v11885_v62 = vld [vmem:[#allocation21_spill] sm:$0xff] }
 0x638   :  { %v4369_v35 = vadd.f32 0.5, %v4368_v28  ;;  %v4373_v24 = vmul.f32 0.5, %v4371_v20  ;;  %v4377_v28 = vmul.f32 0.5, %v4375_v5  ;;  %v11884_v5 = vld [vmem:[#allocation20_spill] sm:$0xff] }
 0x639   :  { %5194 = vmatpush1.bf16.msra.mxu1 %v11003_v55  ;;  %5235 = vmatpush1.bf16.msra.mxu0 %v11005_v53 }
 0x63a   :  { %v4374_v49 = vadd.f32 0.5, %v4373_v24  ;;  %5527 = vmatprep.subr.bf16.mxu1 %v10682_v31  ;;  %5568 = vmatprep.subr.bf16.mxu0 %v10684_v8  ;;  %v4382_v4 = vmul.f32 %v4380_v43, %v4369_v35  ;;  %v4378_v20 = vadd.f32 0.5, %v4377_v28  ;;  %v11892_v28 = vld [vmem:[#allocation28_spill] sm:$0xff] }
 0x63c   :  { %v4379_v58 = vmul.f32 %v4374_v49, %v10677_v33 }
 0x63e   :  { %v11014_v56 = vadd.f32 %v4382_v4, %v4379_v58 }
 0x640   :  { %9425 = vtanh.f32 %v11014_v56 }
 0x64d   :  { %v9426_v41 = vpop.eup %9425 }
 0x64e   :  { %v4385_v55 = vmul.f32 %v9426_v41, %v4378_v20  ;;  %v11893_v20 = vld [vmem:[#allocation29_spill] sm:$0xff] }
 0x650   :  { %4386 = vst [vmem:[#allocation11 + $0x3] sm:$0x1] %v4385_v55  ;;  %v4986_v53 = vpack.c.bf16 %v4385_v55, %v4385_v55  ;;  %v11886_v55 = vld [vmem:[#allocation22_spill] sm:$0xff] }
 0x652   :  { %5212 = vmatmul.mubr.bf16.vlgmr.msra.gmra.mxu1 %v4986_v53  ;;  %5253 = vmatmul.mubr.bf16.vlgmr.msra.gmra.mxu0 %v4986_v53  ;;  %v11887_v53 = vld [vmem:[#allocation23_spill] sm:$0xff] }
 0x653   :  { %5528 = vmatpush1.bf16.msra.mxu1 %v10686_v7  ;;  %5569 = vmatpush1.bf16.msra.mxu0 %v10688_v37 }
 0x654   :  { %5529 = vmatprep.subr.bf16.mxu1 %v10694_v38  ;;  %5570 = vmatprep.subr.bf16.mxu0 %v10696_v25 }
 0x655   :  { %5559 = vmatprep.mubr.bf16.mxu1 %v11679_v48  ;;  %5600 = vmatprep.mubr.bf16.mxu0 %v11679_v48 }
 0x657   :  { %5530 = vmatpush1.bf16.msra.mxu1 %v10700_v1  ;;  %5571 = vmatpush1.bf16.msra.mxu0 %v10702_v3 }
 0x658   :  { %5531 = vmatprep.subr.bf16.mxu1 %v10708_v0  ;;  %5572 = vmatprep.subr.bf16.mxu0 %v10710_v14 }
 0x65b   :  { %5532 = vmatpush1.bf16.msra.mxu1 %v10712_v2  ;;  %5573 = vmatpush1.bf16.msra.mxu0 %v10714_v32 }
 0x65c   :  { %5533 = vmatprep.subr.bf16.mxu1 %v10720_v60  ;;  %5574 = vmatprep.subr.bf16.mxu0 %v10722_v61 }
 0x65f   :  { %5534 = vmatpush1.bf16.msra.mxu1 %v10724_v63  ;;  %5575 = vmatpush1.bf16.msra.mxu0 %v10726_v34 }
 0x660   :  { %5535 = vmatprep.subr.bf16.mxu1 %v10732_v6  ;;  %5576 = vmatprep.subr.bf16.mxu0 %v10734_v36 }
 0x663   :  { %5536 = vmatpush1.bf16.msra.mxu1 %v10736_v54  ;;  %5577 = vmatpush1.bf16.msra.mxu0 %v10738_v42 }
 0x664   :  { %5537 = vmatprep.subr.bf16.mxu1 %v10744_v27  ;;  %5578 = vmatprep.subr.bf16.mxu0 %v10746_v46  ;;  %v5302_v46 = vrot.slane %v10791_v44, 7 }
 0x667   :  { %5538 = vmatpush1.bf16.msra.mxu1 %v10748_v21  ;;  %5579 = vmatpush1.bf16.msra.mxu0 %v10750_v12 }
 0x668   :  { %5539 = vmatprep.subr.bf16.mxu1 %v10756_v9  ;;  %5580 = vmatprep.subr.bf16.mxu0 %v10758_v45 }
 0x66b   :  { %5540 = vmatpush1.bf16.msra.mxu1 %v10760_v10  ;;  %5581 = vmatpush1.bf16.msra.mxu0 %v10762_v50 }
 0x66c   :  { %5541 = vmatprep.subr.bf16.mxu1 %v10770_v15  ;;  %5582 = vmatprep.subr.bf16.mxu0 %v10774_v17 }
 0x66f   :  { %5542 = vmatpush1.bf16.msra.mxu1 %v10768_v13  ;;  %5583 = vmatpush1.bf16.msra.mxu0 %v10772_v16 }
 0x670   :  { %5818 = vmatprep.subr.bf16.mxu1 %v10776_v18  ;;  %5859 = vmatprep.subr.bf16.mxu0 %v10779_v19 }
 0x6bc   :  { %v4617_v33 = vpop.f32.mrf.mxu1  ;;  %v4658_v31 = vpop.f32.mrf.mxu0 }
 0x6bd   :  { %v4669_v8 = vrot.slane %v4617_v33, 3  ;;  %v4671_v25 = vrot.slane %v4658_v31, 3  ;;  %v11895_v33 = vld [vmem:[#allocation31_spill] sm:$0xff]  ;;  %v11896_v31 = vld [vmem:[#allocation32_spill] sm:$0xff] }
 0x6be   :  { %v4619_v7 = vpop.f32.mrf.mxu1  ;;  %v4660_v37 = vpop.f32.mrf.mxu0 }
 0x6bf   :  { %v4677_v38 = vadd.f32 %v4669_v8, %v9886_v40  ;;  %v4670_v1 = vrot.slane %v4619_v7, 3  ;;  %v4679_v60 = vadd.f32 %v4671_v25, %v9891_v51  ;;  %v4672_v61 = vrot.slane %v4660_v37, 3  ;;  %v11897_v8 = vld [vmem:[#allocation33_spill] sm:$0xff]  ;;  %v11898_v7 = vld [vmem:[#allocation34_spill] sm:$0xff]  ;;  %v11899_v37 = vld [vmem:[#allocation35_spill] sm:$0xff] }
 0x6c0   :  { %v4621_v3 = vpop.f32.mrf.mxu1  ;;  %v4662_v0 = vpop.f32.mrf.mxu0  ;;  %v11901_v25 = vld [vmem:[#allocation37_spill] sm:$0xff] }
 0x6c1   :  { %9427 = vtanh.f32 %v4677_v38  ;;  %v4678_v14 = vadd.f32 %v4670_v1, %v9888_v47  ;;  %v4680_v63 = vadd.f32 %v4672_v61, %v9896_v30  ;;  %v11900_v38 = vld [vmem:[#allocation36_spill] sm:$0xff]  ;;  %v11902_v1 = vld [vmem:[#allocation38_spill] sm:$0xff]  ;;  %v11903_v3 = vld [vmem:[#allocation39_spill] sm:$0xff] }
 0x6c2   :  { %v4622_v2 = vpop.f32.mrf.mxu1  ;;  %v4663_v32 = vpop.f32.mrf.mxu0  ;;  %v11904_v0 = vld [vmem:[#allocation40_spill] sm:$0xff]  ;;  %v11907_v61 = vld [vmem:[#allocation43_spill] sm:$0xff] }
 0x6c3   :  { %9429 = vtanh.f32 %v4678_v14  ;;  %v11905_v14 = vld [vmem:[#allocation41_spill] sm:$0xff]  ;;  %v11906_v2 = vld [vmem:[#allocation42_spill] sm:$0xff] }
 0x6c4   :  { %9431 = vtanh.f32 %v4679_v60 }
 0x6c5   :  { %9433 = vtanh.f32 %v4680_v63  ;;  %v11908_v63 = vld [vmem:[#allocation44_spill] sm:$0xff] }
 0x6ce   :  { %v9428_v34 = vpop.eup %9427 }
 0x6cf   :  { %v5295_v6 = vmul.f32 0.5, %v9428_v34  ;;  %v11909_v34 = vld [vmem:[#allocation45_spill] sm:$0xff] }
 0x6d0   :  { %v9430_v36 = vpop.eup %9429 }
 0x6d1   :  { %v5296_v54 = vadd.f32 0.5, %v5295_v6  ;;  %v5297_v42 = vmul.f32 0.5, %v9430_v36  ;;  %v9432_v21 = vpop.eup %9431  ;;  %v11910_v6 = vld [vmem:[#allocation46_spill] sm:$0xff] }
 0x6d2   :  { %v9434_v13 = vpop.eup %9433 }
 0x6d3   :  { %v5298_v27 = vadd.f32 0.5, %v5297_v42  ;;  %v5305_v9 = vmul.f32 %v9432_v21, %v5296_v54  ;;  %v5299_v19 = vmul.f32 0.5, %v9434_v13  ;;  %v11911_v42 = vld [vmem:[#allocation47_spill] sm:$0xff]  ;;  %v11914_v13 = vld [vmem:[#allocation50_spill] sm:$0xff] }
 0x6d5   :  { %v5304_v12 = vmul.f32 %v5302_v46, %v5298_v27  ;;  %v5300_v4 = vadd.f32 0.5, %v5299_v19  ;;  %v11912_v27 = vld [vmem:[#allocation48_spill] sm:$0xff]  ;;  %v11913_v46 = vld [vmem:[#allocation49_spill] sm:$0xff] }
 0x6d7   :  { %v11056_v45 = vadd.f32 %v5305_v9, %v5304_v12 }
 0x6d9   :  { %9435 = vtanh.f32 %v11056_v45 }
 0x6dc   :  { %v4908_v10 = vpop.f32.mrf.mxu1  ;;  %v4949_v50 = vpop.f32.mrf.mxu0 }
 0x6de   :  { %v4910_v15 = vpop.f32.mrf.mxu1  ;;  %v4951_v16 = vpop.f32.mrf.mxu0 }
 0x6df   :  { %v4960_v32 = vcombine.low %v4908_v10, %v4910_v15  ;;  %v4961_v60 = vcombine.low %v4949_v50, %v4951_v16 }
 0x6e0   :  { %v4912_v17 = vpop.f32.mrf.mxu1  ;;  %v4953_v18 = vpop.f32.mrf.mxu0 }
 0x6e1   :  { %v4968_v36 = vrot.slane %v4960_v32, %v10163_v57  ;;  %v4975_v54 = vrot.slane %v4961_v60, %v10163_v57 }
 0x6e2   :  { %v4913_v43 = vpop.f32.mrf.mxu1  ;;  %v4954_v41 = vpop.f32.mrf.mxu0 }
 0x6e3   :  { %v4976_v9 = vcombine.low %v4968_v36, %v4975_v54 }
 0x6e5   :  { %v4983_v19 = vrot.slane %v4976_v9, %v10163_v57 }
 0x6e6   :  { %v9436_v49 = vpop.eup %9435 }
 0x6e7   :  { %v5308_v44 = vmul.f32 %v9436_v49, %v5300_v4 }
 0x6e9   :  { %v5329_v24 = vpack.c.bf16 %v5308_v44, %v5308_v44  ;;  %v11916_v44 = vld [vmem:[#allocation52_spill] sm:$0xff] }
 0x6eb   :  { %v5363_v35 = vshrl.u32 %v5329_v24, 16  ;;  %v11917_v24 = vld [vmem:[#allocation53_spill] sm:$0xff] }
 0x6ed   :  { %v5365_v58 = vrot.slane %v5363_v35, 2  ;;  %v11918_v35 = vld [vmem:[#allocation54_spill] sm:$0xff] }
 0x6ef   :  { %5560 = vmatmul.mubr.bf16.vlgmr.msra.gmra.mxu1 %v5365_v58  ;;  %5601 = vmatmul.mubr.bf16.vlgmr.msra.gmra.mxu0 %v5365_v58 }
 0x6f0   :  { %5819 = vmatpush1.bf16.msra.mxu1 %v10802_v11  ;;  %5860 = vmatpush1.bf16.msra.mxu0 %v10804_v26  ;;  %v11888_v11 = vld [vmem:[#allocation24_spill] sm:$0xff]  ;;  %v11889_v26 = vld [vmem:[#allocation25_spill] sm:$0xff] }
 0x6f1   :  { %5820 = vmatprep.subr.bf16.mxu1 %v10808_v39  ;;  %5861 = vmatprep.subr.bf16.mxu0 %v10810_v22  ;;  %v11890_v39 = vld [vmem:[#allocation26_spill] sm:$0xff]  ;;  %v11891_v22 = vld [vmem:[#allocation27_spill] sm:$0xff] }
 0x6f2   :  { %5850 = vmatprep.mubr.bf16.mxu1 %v11679_v48  ;;  %5891 = vmatprep.mubr.bf16.mxu0 %v11679_v48 }
 0x6f4   :  { %5821 = vmatpush1.bf16.msra.mxu1 %v10816_v23  ;;  %5862 = vmatpush1.bf16.msra.mxu0 %v11884_v5  ;;  %v11894_v23 = vld [vmem:[#allocation30_spill] sm:$0xff] }
 0x6f5   :  { %5822 = vmatprep.subr.bf16.mxu1 %v11885_v62  ;;  %5863 = vmatprep.subr.bf16.mxu0 %v11886_v55  ;;  %v11920_v55 = vld [vmem:[#allocation56_spill] sm:$0xff] }
 0x6f8   :  { %5823 = vmatpush1.bf16.msra.mxu1 %v11887_v53  ;;  %5864 = vmatpush1.bf16.msra.mxu0 %v11888_v11  ;;  %v11921_v53 = vld [vmem:[#allocation57_spill] sm:$0xff] }
 0x6f9   :  { %5824 = vmatprep.subr.bf16.mxu1 %v11889_v26  ;;  %5865 = vmatprep.subr.bf16.mxu0 %v11890_v39  ;;  %v11922_v26 = vld [vmem:[#allocation58_spill] sm:$0xff]  ;;  %v11923_v39 = vld [vmem:[#allocation59_spill] sm:$0xff] }
 0x6fc   :  { %5825 = vmatpush1.bf16.msra.mxu1 %v11891_v22  ;;  %5866 = vmatpush1.bf16.msra.mxu0 %v11892_v28  ;;  %v11924_v22 = vld [vmem:[#allocation60_spill] sm:$0xff]  ;;  %v11925_v28 = vld [vmem:[#allocation61_spill] sm:$0xff] }
 0x6fd   :  { %5826 = vmatprep.subr.bf16.mxu1 %v11893_v20  ;;  %5867 = vmatprep.subr.bf16.mxu0 %v11894_v23  ;;  %v11926_v20 = vld [vmem:[#allocation62_spill] sm:$0xff]  ;;  %v11927_v23 = vld [vmem:[#allocation63_spill] sm:$0xff] }
 0x700   :  { %5827 = vmatpush1.bf16.msra.mxu1 %v11895_v33  ;;  %5868 = vmatpush1.bf16.msra.mxu0 %v11896_v31  ;;  %v11928_v33 = vld [vmem:[#allocation64_spill] sm:$0xff]  ;;  %v11929_v31 = vld [vmem:[#allocation65_spill] sm:$0xff] }
 0x701   :  { %5828 = vmatprep.subr.bf16.mxu1 %v11897_v8  ;;  %5869 = vmatprep.subr.bf16.mxu0 %v11898_v7  ;;  %v11930_v8 = vld [vmem:[#allocation66_spill] sm:$0xff]  ;;  %v11931_v7 = vld [vmem:[#allocation67_spill] sm:$0xff] }
 0x704   :  { %5829 = vmatpush1.bf16.msra.mxu1 %v11899_v37  ;;  %5870 = vmatpush1.bf16.msra.mxu0 %v11900_v38  ;;  %v11932_v37 = vld [vmem:[#allocation68_spill] sm:$0xff]  ;;  %v11933_v38 = vld [vmem:[#allocation69_spill] sm:$0xff] }
 0x705   :  { %5830 = vmatprep.subr.bf16.mxu1 %v11901_v25  ;;  %5871 = vmatprep.subr.bf16.mxu0 %v11902_v1  ;;  %v11934_v25 = vld [vmem:[#allocation70_spill] sm:$0xff]  ;;  %v11935_v1 = vld [vmem:[#allocation71_spill] sm:$0xff] }
 0x708   :  { %5831 = vmatpush1.bf16.msra.mxu1 %v11903_v3  ;;  %5872 = vmatpush1.bf16.msra.mxu0 %v11904_v0  ;;  %v11936_v0 = vld [vmem:[#allocation72_spill] sm:$0xff] }
 0x709   :  { %5832 = vmatprep.subr.bf16.mxu1 %v11905_v14  ;;  %5873 = vmatprep.subr.bf16.mxu0 %v11906_v2  ;;  %v11937_v14 = vld [vmem:[#allocation73_spill] sm:$0xff] }
 0x70c   :  { %5833 = vmatpush1.bf16.msra.mxu1 %v11907_v61  ;;  %5874 = vmatpush1.bf16.msra.mxu0 %v11908_v63 }
 0x70d   :  { %6123 = vmatprep.subr.bf16.mxu1 %v11909_v34  ;;  %6164 = vmatprep.subr.bf16.mxu0 %v11910_v6 }
 0x70f   :  { %5851 = vmatmul.mubr.bf16.vlgmr.msra.gmra.mxu1 %v5365_v58  ;;  %5892 = vmatmul.mubr.bf16.vlgmr.msra.gmra.mxu0 %v5365_v58  ;;  %v11919_v58 = vld [vmem:[#allocation55_spill] sm:$0xff] }
 0x710   :  { %6124 = vmatpush1.bf16.msra.mxu1 %v11911_v42  ;;  %6165 = vmatpush1.bf16.msra.mxu0 %v11912_v27  ;;  %v9219_v27 = vld [vmem:[#allocation10 + $0xe4] ss:$16 sps:$4 sm:$0xff]  }
 0x711   :  { %6125 = vmatprep.subr.bf16.mxu1 %v10914_v59  ;;  %6166 = vmatprep.subr.bf16.mxu0 %v11913_v46  ;;  %v11915_v59 = vld [vmem:[#allocation51_spill] sm:$0xff]  ;;  %v9222_v46 = vld [vmem:[#allocation10 + $0xec] ss:$16 sps:$4 sm:$0xff]  }
 0x712   :  { %v5213_v21 = vpop.f32.mrf.mxu1  ;;  %v5254_v12 = vpop.f32.mrf.mxu0  ;;  %6155 = vmatprep.mubr.bf16.mxu1 %v11679_v48  ;;  %6196 = vmatprep.mubr.bf16.mxu0 %v11679_v48 }
 0x714   :  { %v5215_v10 = vpop.f32.mrf.mxu1  ;;  %v5256_v50 = vpop.f32.mrf.mxu0  ;;  %6126 = vmatpush1.bf16.msra.mxu1 %v10922_v29  ;;  %6167 = vmatpush1.bf16.msra.mxu0 %v11914_v13  ;;  %v8360_v29 = vld [vmem:[%s11481_s5 + $0x4] sm:$0xf] }
 0x715   :  { %v5265_v15 = vcombine.low %v5213_v21, %v5215_v10  ;;  %v5266_v16 = vcombine.low %v5254_v12, %v5256_v50  ;;  %6127 = vmatprep.subr.bf16.mxu1 %v10928_v52  ;;  %6168 = vmatprep.subr.bf16.mxu0 %v11915_v59  ;;  %v4985_v5 = vadd.f32 %v8360_v29, %v4983_v19  ;;  %v9217_v50 = vld [vmem:[#allocation10 + $0xe0] ss:$16 sps:$4 sm:$0xff]   ;;  %v9220_v13 = vld [vmem:[#allocation10 + $0xe8] ss:$16 sps:$4 sm:$0xff]   ;;  %v9234_v19 = vld [vmem:[#allocation10 + $0xac] ss:$16 sps:$4 sm:$0xff]  }
 0x716   :  { %v5217_v17 = vpop.f32.mrf.mxu1  ;;  %v5258_v18 = vpop.f32.mrf.mxu0  ;;  %v9223_v59 = vld [vmem:[#allocation10 + $0xc0] ss:$16 sps:$4 sm:$0xff]   ;;  %v9237_v29 = vld [vmem:[#allocation10 + $0x84] ss:$16 sps:$4 sm:$0xff]  }
 0x717   :  { %v5273_v43 = vrot.slane %v5265_v15, %v10163_v57  ;;  %v5280_v41 = vrot.slane %v5266_v16, %v10163_v57  ;;  %v9225_v16 = vld [vmem:[#allocation10 + $0xc4] ss:$16 sps:$4 sm:$0xff]   ;;  %v9226_v17 = vld [vmem:[#allocation10 + $0xc8] ss:$16 sps:$4 sm:$0xff]  }
 0x718   :  { %v5218_v4 = vpop.f32.mrf.mxu1  ;;  %v5259_v49 = vpop.f32.mrf.mxu0  ;;  %6128 = vmatpush1.bf16.msra.mxu1 %v11916_v44  ;;  %6169 = vmatpush1.bf16.msra.mxu0 %v11917_v24  ;;  %v9231_v18 = vld [vmem:[#allocation10 + $0xa4] ss:$16 sps:$4 sm:$0xff]   ;;  %v9238_v44 = vld [vmem:[#allocation10 + $0x88] ss:$16 sps:$4 sm:$0xff]  }
 0x719   :  { %v5281_v52 = vcombine.low %v5273_v43, %v5280_v41  ;;  %6129 = vmatprep.subr.bf16.mxu1 %v11918_v35  ;;  %6170 = vmatprep.subr.bf16.mxu0 %v11919_v58  ;;  %v9229_v43 = vld [vmem:[#allocation10 + $0xa0] ss:$16 sps:$4 sm:$0xff]   ;;  %v9232_v41 = vld [vmem:[#allocation10 + $0xa8] ss:$16 sps:$4 sm:$0xff]   ;;  %v9240_v4 = vld [vmem:[#allocation10 + $0x8c] ss:$16 sps:$4 sm:$0xff]  }
 0x71a   :  { %v9235_v49 = vld [vmem:[#allocation10 + $0x80] ss:$16 sps:$4 sm:$0xff]   ;;  %v9243_v24 = vld [vmem:[#allocation10 + $0x64] ss:$16 sps:$4 sm:$0xff]   ;;  %v9244_v58 = vld [vmem:[#allocation10 + $0x68] ss:$16 sps:$4 sm:$0xff]  }
 0x71b   :  { %v5288_v62 = vrot.slane %v5281_v52, %v10163_v57  ;;  %v9246_v52 = vld [vmem:[#allocation10 + $0x6c] ss:$16 sps:$4 sm:$0xff]   ;;  %v9241_v35 = vld [vmem:[#allocation10 + $0x60] ss:$16 sps:$4 sm:$0xff]  }
 0x71c   :  { %6130 = vmatpush1.bf16.msra.mxu1 %v11920_v55  ;;  %6171 = vmatpush1.bf16.msra.mxu0 %v11921_v53  ;;  %v9247_v55 = vld [vmem:[#allocation10 + $0x40] ss:$16 sps:$4 sm:$0xff]   ;;  %v9250_v53 = vld [vmem:[#allocation10 + $0x48] ss:$16 sps:$4 sm:$0xff]  }
 0x71d   :  { %v5290_v11 = vadd.f32 %v5288_v62, %v4985_v5  ;;  %6131 = vmatprep.subr.bf16.mxu1 %v11922_v26  ;;  %6172 = vmatprep.subr.bf16.mxu0 %v11923_v39  ;;  %v9249_v5 = vld [vmem:[#allocation10 + $0x44] ss:$16 sps:$4 sm:$0xff]   ;;  %v9252_v62 = vld [vmem:[#allocation10 + $0x4c] ss:$16 sps:$4 sm:$0xff]   ;;  %v9253_v39 = vld [vmem:[#allocation10 + $0x20] ss:$16 sps:$4 sm:$0xff]  }
 0x71e   :  { %v9258_v26 = vld [vmem:[#allocation10 + $0x2c] ss:$16 sps:$4 sm:$0xff]  }
 0x71f   :  { %9437 = vtanh.f32 %v5290_v11  ;;  %v9255_v11 = vld [vmem:[#allocation10 + $0x24] ss:$16 sps:$4 sm:$0xff]  }
 0x720   :  { %6132 = vmatpush1.bf16.msra.mxu1 %v11924_v22  ;;  %6173 = vmatpush1.bf16.msra.mxu0 %v11925_v28  ;;  %v9256_v22 = vld [vmem:[#allocation10 + $0x28] ss:$16 sps:$4 sm:$0xff]   ;;  %v9261_v28 = vld [vmem:[#allocation10 + $0x4] ss:$16 sps:$4 sm:$0xff]  }
 0x721   :  { %6133 = vmatprep.subr.bf16.mxu1 %v11926_v20  ;;  %6174 = vmatprep.subr.bf16.mxu0 %v11927_v23  ;;  %v9264_v20 = vld [vmem:[#allocation10 + $0xc] ss:$16 sps:$4 sm:$0xff]   ;;  %v9259_v23 = vld [vmem:[#allocation10] ss:$16 sps:$4 sm:$0xff]  }
 0x724   :  { %6134 = vmatpush1.bf16.msra.mxu1 %v11928_v33  ;;  %6175 = vmatpush1.bf16.msra.mxu0 %v11929_v31  ;;  %v9262_v33 = vld [vmem:[#allocation10 + $0x8] ss:$16 sps:$4 sm:$0xff]   ;;  %v11140_v31 = vld [vmem:[#allocation8 + $0x1e4] ss:$16 sps:$4 sm:$0xff]  }
 0x725   :  { %6135 = vmatprep.subr.bf16.mxu1 %v11930_v8  ;;  %6176 = vmatprep.subr.bf16.mxu0 %v11931_v7  ;;  %v11142_v8 = vld [vmem:[#allocation8 + $0x1ec] ss:$16 sps:$4 sm:$0xff]  }
 0x728   :  { %6136 = vmatpush1.bf16.msra.mxu1 %v11932_v37  ;;  %6177 = vmatpush1.bf16.msra.mxu0 %v11933_v38 }
 0x729   :  { %6137 = vmatprep.subr.bf16.mxu1 %v11934_v25  ;;  %6178 = vmatprep.subr.bf16.mxu0 %v11935_v1 }
 0x72c   :  { %v9438_v3 = vpop.eup %9437  ;;  %6138 = vmatpush1.bf16.msra.mxu1 %v11936_v0  ;;  %6179 = vmatpush1.bf16.msra.mxu0 %v11937_v14 }
 0x72d   :  { %v5310_v2 = vmul.f32 0.5, %v9438_v3  ;;  %v5313_v32 = vrot.slane %v9438_v3, 1  ;;  %v5322_v34 = vrot.slane %v9438_v3, 2  ;;  %v5317_v42 = vrot.slane %v9438_v3, 3  ;;  %6469 = vmatprep.subr.bf16.mxu1 %v9219_v27  ;;  %6510 = vmatprep.subr.bf16.mxu0 %v9222_v46 }
 0x72f   :  { %v5311_v60 = vadd.f32 0.5, %v5310_v2  ;;  %v5315_v61 = vmul.f32 0.5, %v5313_v32  ;;  %v5319_v21 = vmul.f32 0.5, %v5317_v42 }
 0x731   :  { %v5316_v63 = vadd.f32 0.5, %v5315_v61  ;;  %v5324_v36 = vmul.f32 %v5322_v34, %v5311_v60  ;;  %v5320_v12 = vadd.f32 0.5, %v5319_v21 }
 0x733   :  { %v5321_v6 = vmul.f32 %v5316_v63, %v11014_v56  ;;  %v9228_v56 = vld [vmem:[#allocation10 + $0xcc] ss:$16 sps:$4 sm:$0xff]  }
 0x735   :  { %v11135_v54 = vadd.f32 %v5324_v36, %v5321_v6 }
 0x737   :  { %9439 = vtanh.f32 %v11135_v54 }
 0x744   :  { %v9440_v9 = vpop.eup %9439 }
 0x745   :  { %v5327_v10 = vmul.f32 %v9440_v9, %v5320_v12 }
 0x747   :  { %5328 = vst [vmem:[#allocation11 + $0x4] sm:$0x1] %v5327_v10  ;;  %v5930_v15 = vpack.c.bf16 %v5327_v10, %v5327_v10  ;;  %v6246_v10 = vrot.slane %v11056_v45, 7 }
 0x749   :  { %6156 = vmatmul.mubr.bf16.vlgmr.msra.gmra.mxu1 %v5930_v15  ;;  %6197 = vmatmul.mubr.bf16.vlgmr.msra.gmra.mxu0 %v5930_v15 }
 0x74a   :  { %6470 = vmatpush1.bf16.msra.mxu1 %v9217_v50  ;;  %6511 = vmatpush1.bf16.msra.mxu0 %v9220_v13 }
 0x74b   :  { %6471 = vmatprep.subr.bf16.mxu1 %v9225_v16  ;;  %6512 = vmatprep.subr.bf16.mxu0 %v9228_v56 }
 0x74c   :  { %6501 = vmatprep.mubr.bf16.mxu1 %v11679_v48  ;;  %6542 = vmatprep.mubr.bf16.mxu0 %v11679_v48 }
 0x74e   :  { %6472 = vmatpush1.bf16.msra.mxu1 %v9223_v59  ;;  %6513 = vmatpush1.bf16.msra.mxu0 %v9226_v17 }
 0x74f   :  { %6473 = vmatprep.subr.bf16.mxu1 %v9231_v18  ;;  %6514 = vmatprep.subr.bf16.mxu0 %v9234_v19 }
 0x752   :  { %6474 = vmatpush1.bf16.msra.mxu1 %v9229_v43  ;;  %6515 = vmatpush1.bf16.msra.mxu0 %v9232_v41 }
 0x753   :  { %6475 = vmatprep.subr.bf16.mxu1 %v9237_v29  ;;  %6516 = vmatprep.subr.bf16.mxu0 %v9240_v4 }
 0x756   :  { %6476 = vmatpush1.bf16.msra.mxu1 %v9235_v49  ;;  %6517 = vmatpush1.bf16.msra.mxu0 %v9238_v44 }
 0x757   :  { %6477 = vmatprep.subr.bf16.mxu1 %v9243_v24  ;;  %6518 = vmatprep.subr.bf16.mxu0 %v9246_v52 }
 0x75a   :  { %6478 = vmatpush1.bf16.msra.mxu1 %v9241_v35  ;;  %6519 = vmatpush1.bf16.msra.mxu0 %v9244_v58  ;;  %v11162_v35 = vld [vmem:[#allocation8 + $0x1e0] ss:$16 sps:$4 sm:$0xff]   ;;  %v11164_v58 = vld [vmem:[#allocation8 + $0x1e8] ss:$16 sps:$4 sm:$0xff]  }
 0x75b   :  { %6479 = vmatprep.subr.bf16.mxu1 %v9249_v5  ;;  %6520 = vmatprep.subr.bf16.mxu0 %v9252_v62  ;;  %v11168_v62 = vld [vmem:[#allocation8 + $0x1c4] ss:$16 sps:$4 sm:$0xff]  }
 0x75e   :  { %6480 = vmatpush1.bf16.msra.mxu1 %v9247_v55  ;;  %6521 = vmatpush1.bf16.msra.mxu0 %v9250_v53  ;;  %v11170_v55 = vld [vmem:[#allocation8 + $0x1cc] ss:$16 sps:$4 sm:$0xff]   ;;  %v11176_v53 = vld [vmem:[#allocation8 + $0x1c0] ss:$16 sps:$4 sm:$0xff]  }
 0x75f   :  { %6481 = vmatprep.subr.bf16.mxu1 %v9255_v11  ;;  %6522 = vmatprep.subr.bf16.mxu0 %v9258_v26  ;;  %v11178_v11 = vld [vmem:[#allocation8 + $0x1c8] ss:$16 sps:$4 sm:$0xff]   ;;  %v11182_v26 = vld [vmem:[#allocation8 + $0x1a4] ss:$16 sps:$4 sm:$0xff]  }
 0x762   :  { %6482 = vmatpush1.bf16.msra.mxu1 %v9253_v39  ;;  %6523 = vmatpush1.bf16.msra.mxu0 %v9256_v22  ;;  %v11184_v39 = vld [vmem:[#allocation8 + $0x1ac] ss:$16 sps:$4 sm:$0xff]   ;;  %v11190_v22 = vld [vmem:[#allocation8 + $0x1a0] ss:$16 sps:$4 sm:$0xff]  }
 0x763   :  { %6483 = vmatprep.subr.bf16.mxu1 %v9261_v28  ;;  %6524 = vmatprep.subr.bf16.mxu0 %v9264_v20  ;;  %v11192_v28 = vld [vmem:[#allocation8 + $0x1a8] ss:$16 sps:$4 sm:$0xff]   ;;  %v11196_v20 = vld [vmem:[#allocation8 + $0x184] ss:$16 sps:$4 sm:$0xff]  }
 0x766   :  { %6484 = vmatpush1.bf16.msra.mxu1 %v9259_v23  ;;  %6525 = vmatpush1.bf16.msra.mxu0 %v9262_v33  ;;  %v11198_v23 = vld [vmem:[#allocation8 + $0x18c] ss:$16 sps:$4 sm:$0xff]   ;;  %v11202_v33 = vld [vmem:[#allocation8 + $0x180] ss:$16 sps:$4 sm:$0xff]  }
 0x767   :  { %6760 = vmatprep.subr.bf16.mxu1 %v11140_v31  ;;  %6801 = vmatprep.subr.bf16.mxu0 %v11142_v8 }
 0x7af   :  { %v5561_v7 = vpop.f32.mrf.mxu1  ;;  %v5602_v37 = vpop.f32.mrf.mxu0 }
 0x7b0   :  { %v5613_v38 = vrot.slane %v5561_v7, 2  ;;  %v5615_v0 = vrot.slane %v5602_v37, 2  ;;  %v11204_v7 = vld [vmem:[#allocation8 + $0x188] ss:$16 sps:$4 sm:$0xff]   ;;  %v11208_v37 = vld [vmem:[#allocation8 + $0x164] ss:$16 sps:$4 sm:$0xff]  }
 0x7b1   :  { %v5563_v25 = vpop.f32.mrf.mxu1  ;;  %v5604_v1 = vpop.f32.mrf.mxu0 }
 0x7b2   :  { %v5621_v3 = vadd.f32 %v5613_v38, %v9886_v40  ;;  %v5614_v14 = vrot.slane %v5563_v25, 2  ;;  %v5623_v34 = vadd.f32 %v5615_v0, %v9891_v51  ;;  %v5616_v6 = vrot.slane %v5604_v1, 2  ;;  %v11210_v38 = vld [vmem:[#allocation8 + $0x16c] ss:$16 sps:$4 sm:$0xff]   ;;  %v11214_v25 = vld [vmem:[#allocation8 + $0x160] ss:$16 sps:$4 sm:$0xff]  }
 0x7b3   :  { %v5565_v2 = vpop.f32.mrf.mxu1  ;;  %v5606_v32 = vpop.f32.mrf.mxu0  ;;  %v11216_v1 = vld [vmem:[#allocation8 + $0x168] ss:$16 sps:$4 sm:$0xff]   ;;  %v11222_v0 = vld [vmem:[#allocation8 + $0x14c] ss:$16 sps:$4 sm:$0xff]  }
 0x7b4   :  { %9441 = vtanh.f32 %v5621_v3  ;;  %v5622_v60 = vadd.f32 %v5614_v14, %v9888_v47  ;;  %v5624_v36 = vadd.f32 %v5616_v6, %v9896_v30  ;;  %v11220_v3 = vld [vmem:[#allocation8 + $0x144] ss:$16 sps:$4 sm:$0xff]   ;;  %v11226_v14 = vld [vmem:[#allocation8 + $0x140] ss:$16 sps:$4 sm:$0xff]   ;;  %v11228_v2 = vld [vmem:[#allocation8 + $0x148] ss:$16 sps:$4 sm:$0xff]  }
 0x7b5   :  { %v5566_v61 = vpop.f32.mrf.mxu1  ;;  %v5607_v63 = vpop.f32.mrf.mxu0  ;;  %v11232_v32 = vld [vmem:[#allocation8 + $0x124] ss:$16 sps:$4 sm:$0xff]   ;;  %v11246_v6 = vld [vmem:[#allocation8 + $0x10c] ss:$16 sps:$4 sm:$0xff]  }
 0x7b6   :  { %9443 = vtanh.f32 %v5622_v60  ;;  %v11234_v60 = vld [vmem:[#allocation8 + $0x12c] ss:$16 sps:$4 sm:$0xff]   ;;  %v11238_v61 = vld [vmem:[#allocation8 + $0x120] ss:$16 sps:$4 sm:$0xff]   ;;  %v11240_v63 = vld [vmem:[#allocation8 + $0x128] ss:$16 sps:$4 sm:$0xff]  }
 0x7b7   :  { %9445 = vtanh.f32 %v5623_v34  ;;  %v11244_v34 = vld [vmem:[#allocation8 + $0x104] ss:$16 sps:$4 sm:$0xff]  }
 0x7b8   :  { %9447 = vtanh.f32 %v5624_v36  ;;  %v11250_v36 = vld [vmem:[#allocation8 + $0x100] ss:$16 sps:$4 sm:$0xff]  }
 0x7c1   :  { %v9442_v42 = vpop.eup %9441 }
 0x7c2   :  { %v6239_v27 = vmul.f32 0.5, %v9442_v42  ;;  %v11252_v42 = vld [vmem:[#allocation8 + $0x108] ss:$16 sps:$4 sm:$0xff]  }
 0x7c3   :  { %v9444_v46 = vpop.eup %9443 }
 0x7c4   :  { %v6240_v21 = vadd.f32 0.5, %v6239_v27  ;;  %v6241_v12 = vmul.f32 0.5, %v9444_v46  ;;  %v9446_v50 = vpop.eup %9445  ;;  %v11256_v27 = vld [vmem:[#allocation10 + $0x1e4] ss:$16 sps:$4 sm:$0xff]   ;;  %v11258_v46 = vld [vmem:[#allocation10 + $0x1ec] ss:$16 sps:$4 sm:$0xff]  }
 0x7c5   :  { %v9448_v17 = vpop.eup %9447 }
 0x7c6   :  { %v6242_v9 = vadd.f32 0.5, %v6241_v12  ;;  %v6249_v15 = vmul.f32 %v9446_v50, %v6240_v21  ;;  %v6243_v29 = vmul.f32 0.5, %v9448_v17  ;;  %v11262_v21 = vld [vmem:[#allocation10 + $0x1e0] ss:$16 sps:$4 sm:$0xff]   ;;  %v11264_v12 = vld [vmem:[#allocation10 + $0x1e8] ss:$16 sps:$4 sm:$0xff]  }
 0x7c7   :  { %v11276_v50 = vld [vmem:[#allocation10 + $0x1c0] ss:$16 sps:$4 sm:$0xff]  }
 0x7c8   :  { %v6248_v13 = vmul.f32 %v6246_v10, %v6242_v9  ;;  %v6244_v49 = vadd.f32 0.5, %v6243_v29  ;;  %v11268_v9 = vld [vmem:[#allocation10 + $0x1c4] ss:$16 sps:$4 sm:$0xff]   ;;  %v11270_v10 = vld [vmem:[#allocation10 + $0x1cc] ss:$16 sps:$4 sm:$0xff]   ;;  %11938 = vst [vmem:[#allocation20_spill] sm:$0xff] %v11276_v50 }
 0x7c9   :  { %v11302_v29 = vld [vmem:[#allocation10 + $0x184] ss:$16 sps:$4 sm:$0xff]  }
 0x7ca   :  { %v11151_v16 = vadd.f32 %v6249_v15, %v6248_v13  ;;  %v11278_v13 = vld [vmem:[#allocation10 + $0x1c8] ss:$16 sps:$4 sm:$0xff]   ;;  %11944 = vst [vmem:[#allocation26_spill] sm:$0xff] %v11302_v29 }
 0x7cb   :  { %11939 = vst [vmem:[#allocation21_spill] sm:$0xff] %v11278_v13 }
 0x7cc   :  { %9449 = vtanh.f32 %v11151_v16 }
 0x7cf   :  { %v11154_v56 = vpop.f32.mrf.mxu1  ;;  %v11156_v59 = vpop.f32.mrf.mxu0 }
 0x7d1   :  { %v11158_v18 = vpop.f32.mrf.mxu1  ;;  %v11160_v19 = vpop.f32.mrf.mxu0 }
 0x7d2   :  { %v5904_v15 = vcombine.low %v11154_v56, %v11158_v18  ;;  %v5905_v17 = vcombine.low %v11156_v59, %v11160_v19  ;;  %v11294_v56 = vld [vmem:[#allocation10 + $0x1a0] ss:$16 sps:$4 sm:$0xff]   ;;  %v11296_v18 = vld [vmem:[#allocation10 + $0x1a8] ss:$16 sps:$4 sm:$0xff]  }
 0x7d3   :  { %v5856_v43 = vpop.f32.mrf.mxu1  ;;  %v5897_v41 = vpop.f32.mrf.mxu0  ;;  %11942 = vst [vmem:[#allocation24_spill] sm:$0xff] %v11294_v56  ;;  %11943 = vst [vmem:[#allocation25_spill] sm:$0xff] %v11296_v18 }
 0x7d4   :  { %v11286_v43 = vld [vmem:[#allocation10 + $0x1a4] ss:$16 sps:$4 sm:$0xff]   ;;  %v11288_v41 = vld [vmem:[#allocation10 + $0x1ac] ss:$16 sps:$4 sm:$0xff]   ;;  %v5912_v59 = vrot.slane %v5904_v15, %v10163_v57  ;;  %v5919_v19 = vrot.slane %v5905_v17, %v10163_v57 }
 0x7d5   :  { %v5857_v45 = vpop.f32.mrf.mxu1  ;;  %v5898_v4 = vpop.f32.mrf.mxu0  ;;  %11940 = vst [vmem:[#allocation22_spill] sm:$0xff] %v11286_v43  ;;  %11941 = vst [vmem:[#allocation23_spill] sm:$0xff] %v11288_v41  ;;  %v11316_v15 = vld [vmem:[#allocation10 + $0x16c] ss:$16 sps:$4 sm:$0xff]  }
 0x7d6   :  { %v11304_v45 = vld [vmem:[#allocation10 + $0x18c] ss:$16 sps:$4 sm:$0xff]   ;;  %11947 = vst [vmem:[#allocation29_spill] sm:$0xff] %v11316_v15 }
 0x7d7   :  { %11945 = vst [vmem:[#allocation27_spill] sm:$0xff] %v11304_v45 }
 0x7d9   :  { %v9450_v44 = vpop.eup %9449 }
 0x7da   :  { %v6252_v24 = vmul.f32 %v9450_v44, %v6244_v49  ;;  %v11308_v44 = vld [vmem:[#allocation10 + $0x180] ss:$16 sps:$4 sm:$0xff]  }
 0x7dc   :  { %v6273_v52 = vpack.c.bf16 %v6252_v24, %v6252_v24  ;;  %v11310_v24 = vld [vmem:[#allocation10 + $0x188] ss:$16 sps:$4 sm:$0xff]  }
 0x7de   :  { %v11166_v5 = vrot.slane %v6273_v52, 3  ;;  %v5920_v52 = vcombine.low %v5912_v59, %v5919_v19  ;;  %v11322_v59 = vld [vmem:[#allocation10 + $0x168] ss:$16 sps:$4 sm:$0xff]  }
 0x7e0   :  { %6502 = vmatmul.mubr.bf16.vlgmr.msra.gmra.mxu1 %v11166_v5  ;;  %6543 = vmatmul.mubr.bf16.vlgmr.msra.gmra.mxu0 %v11166_v5  ;;  %v5927_v19 = vrot.slane %v5920_v52, %v10163_v57 }
 0x7e1   :  { %6761 = vmatpush1.bf16.msra.mxu1 %v11162_v35  ;;  %6802 = vmatpush1.bf16.msra.mxu0 %v11164_v58 }
 0x7e2   :  { %6762 = vmatprep.subr.bf16.mxu1 %v11168_v62  ;;  %6803 = vmatprep.subr.bf16.mxu0 %v11170_v55 }
 0x7e3   :  { %6792 = vmatprep.mubr.bf16.mxu1 %v11679_v48  ;;  %6833 = vmatprep.mubr.bf16.mxu0 %v11679_v48 }
 0x7e5   :  { %6763 = vmatpush1.bf16.msra.mxu1 %v11176_v53  ;;  %6804 = vmatpush1.bf16.msra.mxu0 %v11178_v11 }
 0x7e6   :  { %6764 = vmatprep.subr.bf16.mxu1 %v11182_v26  ;;  %6805 = vmatprep.subr.bf16.mxu0 %v11184_v39 }
 0x7e9   :  { %6765 = vmatpush1.bf16.msra.mxu1 %v11190_v22  ;;  %6806 = vmatpush1.bf16.msra.mxu0 %v11192_v28 }
 0x7ea   :  { %6766 = vmatprep.subr.bf16.mxu1 %v11196_v20  ;;  %6807 = vmatprep.subr.bf16.mxu0 %v11198_v23 }
 0x7ed   :  { %6767 = vmatpush1.bf16.msra.mxu1 %v11202_v33  ;;  %6808 = vmatpush1.bf16.msra.mxu0 %v11204_v7 }
 0x7ee   :  { %6768 = vmatprep.subr.bf16.mxu1 %v11208_v37  ;;  %6809 = vmatprep.subr.bf16.mxu0 %v11210_v38 }
 0x7f1   :  { %6769 = vmatpush1.bf16.msra.mxu1 %v11214_v25  ;;  %6810 = vmatpush1.bf16.msra.mxu0 %v11216_v1 }
 0x7f2   :  { %6770 = vmatprep.subr.bf16.mxu1 %v11220_v3  ;;  %6811 = vmatprep.subr.bf16.mxu0 %v11222_v0 }
 0x7f5   :  { %6771 = vmatpush1.bf16.msra.mxu1 %v11226_v14  ;;  %6812 = vmatpush1.bf16.msra.mxu0 %v11228_v2 }
 0x7f6   :  { %6772 = vmatprep.subr.bf16.mxu1 %v11232_v32  ;;  %6813 = vmatprep.subr.bf16.mxu0 %v11234_v60 }
 0x7f9   :  { %6773 = vmatpush1.bf16.msra.mxu1 %v11238_v61  ;;  %6814 = vmatpush1.bf16.msra.mxu0 %v11240_v63 }
 0x7fa   :  { %6774 = vmatprep.subr.bf16.mxu1 %v11244_v34  ;;  %6815 = vmatprep.subr.bf16.mxu0 %v11246_v6 }
 0x7fd   :  { %6775 = vmatpush1.bf16.msra.mxu1 %v11250_v36  ;;  %6816 = vmatpush1.bf16.msra.mxu0 %v11252_v42 }
 0x7fe   :  { %7065 = vmatprep.subr.bf16.mxu1 %v11256_v27  ;;  %7106 = vmatprep.subr.bf16.mxu0 %v11258_v46 }
 0x800   :  { %6793 = vmatmul.mubr.bf16.vlgmr.msra.gmra.mxu1 %v11166_v5  ;;  %6834 = vmatmul.mubr.bf16.vlgmr.msra.gmra.mxu0 %v11166_v5  ;;  %v11314_v5 = vld [vmem:[#allocation10 + $0x164] ss:$16 sps:$4 sm:$0xff]  }
 0x801   :  { %7066 = vmatpush1.bf16.msra.mxu1 %v11262_v21  ;;  %7107 = vmatpush1.bf16.msra.mxu0 %v11264_v12  ;;  %11946 = vst [vmem:[#allocation28_spill] sm:$0xff] %v11314_v5 }
 0x802   :  { %7067 = vmatprep.subr.bf16.mxu1 %v11268_v9  ;;  %7108 = vmatprep.subr.bf16.mxu0 %v11270_v10 }
 0x803   :  { %7097 = vmatprep.mubr.bf16.mxu1 %v11679_v48  ;;  %7138 = vmatprep.mubr.bf16.mxu0 %v11679_v48 }
 0x805   :  { %7068 = vmatpush1.bf16.msra.mxu1 %v11276_v50  ;;  %7109 = vmatpush1.bf16.msra.mxu0 %v11278_v13 }
 0x806   :  { %7069 = vmatprep.subr.bf16.mxu1 %v11286_v43  ;;  %7110 = vmatprep.subr.bf16.mxu0 %v11288_v41 }
 0x809   :  { %v6157_v4 = vpop.f32.mrf.mxu1  ;;  %v6198_v49 = vpop.f32.mrf.mxu0  ;;  %7070 = vmatpush1.bf16.msra.mxu1 %v11294_v56  ;;  %7111 = vmatpush1.bf16.msra.mxu0 %v11296_v18  ;;  %v11320_v18 = vld [vmem:[#allocation10 + $0x160] ss:$16 sps:$4 sm:$0xff]  }
 0x80a   :  { %7071 = vmatprep.subr.bf16.mxu1 %v11302_v29  ;;  %7112 = vmatprep.subr.bf16.mxu0 %v11304_v45 }
 0x80b   :  { %v6159_v17 = vpop.f32.mrf.mxu1  ;;  %v6200_v41 = vpop.f32.mrf.mxu0 }
 0x80c   :  { %v6209_v43 = vcombine.low %v6157_v4, %v6159_v17  ;;  %v6210_v13 = vcombine.low %v6198_v49, %v6200_v41  ;;  %v11329_v41 = vld [vmem:[#allocation10 + $0x144] ss:$16 sps:$4 sm:$0xff]  }
 0x80d   :  { %v6161_v56 = vpop.f32.mrf.mxu1  ;;  %v6202_v50 = vpop.f32.mrf.mxu0  ;;  %7072 = vmatpush1.bf16.msra.mxu1 %v11308_v44  ;;  %7113 = vmatpush1.bf16.msra.mxu0 %v11310_v24  ;;  %11948 = vst [vmem:[#allocation30_spill] sm:$0xff] %v11329_v41 }
 0x80e   :  { %v6217_v45 = vrot.slane %v6209_v43, %v10163_v57  ;;  %v6224_v29 = vrot.slane %v6210_v13, %v10163_v57  ;;  %7073 = vmatprep.subr.bf16.mxu1 %v11314_v5  ;;  %7114 = vmatprep.subr.bf16.mxu0 %v11316_v15  ;;  %v11331_v50 = vld [vmem:[#allocation10 + $0x14c] ss:$16 sps:$4 sm:$0xff]   ;;  %v11338_v13 = vld [vmem:[#allocation10 + $0x140] ss:$16 sps:$4 sm:$0xff]   ;;  %v11340_v43 = vld [vmem:[#allocation10 + $0x148] ss:$16 sps:$4 sm:$0xff]  }
 0x80f   :  { %11949 = vst [vmem:[#allocation31_spill] sm:$0xff] %v11331_v50  ;;  %v8457_v56 = vld [vmem:[%s11481_s5 + $0x4] sm:$0xf]  ;;  %v6162_v4 = vpop.f32.mrf.mxu1  ;;  %v6203_v49 = vpop.f32.mrf.mxu0  ;;  %11950 = vst [vmem:[#allocation32_spill] sm:$0xff] %v11338_v13  ;;  %v11345_v5 = vld [vmem:[#allocation10 + $0x124] ss:$16 sps:$4 sm:$0xff]  }
 0x810   :  { %v6225_v17 = vcombine.low %v6217_v45, %v6224_v29  ;;  %11951 = vst [vmem:[#allocation33_spill] sm:$0xff] %v11340_v43  ;;  %v5929_v52 = vadd.f32 %v8457_v56, %v5927_v19  ;;  %11952 = vst [vmem:[#allocation34_spill] sm:$0xff] %v11345_v5  ;;  %v11347_v4 = vld [vmem:[#allocation10 + $0x12c] ss:$16 sps:$4 sm:$0xff]   ;;  %v11351_v45 = vld [vmem:[#allocation10 + $0x120] ss:$16 sps:$4 sm:$0xff]  }
 0x811   :  { %7074 = vmatpush1.bf16.msra.mxu1 %v11320_v18  ;;  %7115 = vmatpush1.bf16.msra.mxu0 %v11322_v59  ;;  %11953 = vst [vmem:[#allocation35_spill] sm:$0xff] %v11347_v4  ;;  %11954 = vst [vmem:[#allocation36_spill] sm:$0xff] %v11351_v45  ;;  %v11353_v49 = vld [vmem:[#allocation10 + $0x128] ss:$16 sps:$4 sm:$0xff]   ;;  %v11357_v19 = vld [vmem:[#allocation10 + $0x104] ss:$16 sps:$4 sm:$0xff]  }
 0x812   :  { %v6232_v15 = vrot.slane %v6225_v17, %v10163_v57  ;;  %7075 = vmatprep.subr.bf16.mxu1 %v11329_v41  ;;  %7116 = vmatprep.subr.bf16.mxu0 %v11331_v50  ;;  %11955 = vst [vmem:[#allocation37_spill] sm:$0xff] %v11353_v49  ;;  %11956 = vst [vmem:[#allocation38_spill] sm:$0xff] %v11357_v19  ;;  %v11359_v56 = vld [vmem:[#allocation10 + $0x10c] ss:$16 sps:$4 sm:$0xff]   ;;  %v11365_v17 = vld [vmem:[#allocation10 + $0x108] ss:$16 sps:$4 sm:$0xff]  }
 0x813   :  { %11957 = vst [vmem:[#allocation39_spill] sm:$0xff] %v11359_v56  ;;  %11959 = vst [vmem:[#allocation41_spill] sm:$0xff] %v11365_v17 }
 0x814   :  { %v6234_v29 = vadd.f32 %v6232_v15, %v5929_v52  ;;  %v11363_v15 = vld [vmem:[#allocation10 + $0x100] ss:$16 sps:$4 sm:$0xff]  }
 0x815   :  { %7076 = vmatpush1.bf16.msra.mxu1 %v11338_v13  ;;  %7117 = vmatpush1.bf16.msra.mxu0 %v11340_v43  ;;  %11958 = vst [vmem:[#allocation40_spill] sm:$0xff] %v11363_v15 }
 0x816   :  { %9451 = vtanh.f32 %v6234_v29  ;;  %7077 = vmatprep.subr.bf16.mxu1 %v11345_v5  ;;  %7118 = vmatprep.subr.bf16.mxu0 %v11347_v4 }
 0x819   :  { %7078 = vmatpush1.bf16.msra.mxu1 %v11351_v45  ;;  %7119 = vmatpush1.bf16.msra.mxu0 %v11353_v49 }
 0x81a   :  { %7079 = vmatprep.subr.bf16.mxu1 %v11357_v19  ;;  %7120 = vmatprep.subr.bf16.mxu0 %v11359_v56 }
 0x81d   :  { %7080 = vmatpush1.bf16.msra.mxu1 %v11363_v15  ;;  %7121 = vmatpush1.bf16.msra.mxu0 %v11365_v17 }
 0x81e   :  { %7414 = vmatprep.subr.bf16.mxu1 %v11140_v31  ;;  %7455 = vmatprep.subr.bf16.mxu0 %v11142_v8 }
 0x823   :  { %v9452_v52 = vpop.eup %9451 }
 0x824   :  { %v6254_v29 = vmul.f32 0.5, %v9452_v52  ;;  %v6257_v45 = vrot.slane %v9452_v52, 1  ;;  %v6266_v43 = vrot.slane %v9452_v52, 2  ;;  %v6261_v15 = vrot.slane %v9452_v52, 3  ;;  %v11961_v52 = vld [vmem:[#allocation21_spill] sm:$0xff] }
 0x826   :  { %v6255_v49 = vadd.f32 0.5, %v6254_v29  ;;  %v6259_v4 = vmul.f32 0.5, %v6257_v45  ;;  %v6263_v17 = vmul.f32 0.5, %v6261_v15  ;;  %v11962_v29 = vld [vmem:[#allocation22_spill] sm:$0xff] }
 0x828   :  { %v6260_v5 = vadd.f32 0.5, %v6259_v4  ;;  %v6268_v19 = vmul.f32 %v6266_v43, %v6255_v49  ;;  %v6264_v56 = vadd.f32 0.5, %v6263_v17  ;;  %v11960_v17 = vld [vmem:[#allocation20_spill] sm:$0xff] }
 0x82a   :  { %v6265_v13 = vmul.f32 %v6260_v5, %v11135_v54 }
 0x82c   :  { %v11374_v50 = vadd.f32 %v6268_v19, %v6265_v13 }
 0x82e   :  { %9453 = vtanh.f32 %v11374_v50 }
 0x83b   :  { %v9454_v31 = vpop.eup %9453 }
 0x83c   :  { %v6271_v41 = vmul.f32 %v9454_v31, %v6264_v56  ;;  %v11963_v31 = vld [vmem:[#allocation23_spill] sm:$0xff] }
 0x83e   :  { %6272 = vst [vmem:[#allocation11 + $0x5] sm:$0x1] %v6271_v41  ;;  %v6872_v8 = vpack.c.bf16 %v6271_v41, %v6271_v41 }
 0x840   :  { %7098 = vmatmul.mubr.bf16.vlgmr.msra.gmra.mxu1 %v6872_v8  ;;  %7139 = vmatmul.mubr.bf16.vlgmr.msra.gmra.mxu0 %v6872_v8  ;;  %v11964_v8 = vld [vmem:[#allocation24_spill] sm:$0xff] }
 0x841   :  { %7415 = vmatpush1.bf16.msra.mxu1 %v11162_v35  ;;  %7456 = vmatpush1.bf16.msra.mxu0 %v11164_v58 }
 0x842   :  { %7416 = vmatprep.subr.bf16.mxu1 %v11168_v62  ;;  %7457 = vmatprep.subr.bf16.mxu0 %v11170_v55 }
 0x843   :  { %7446 = vmatprep.mubr.bf16.mxu1 %v11679_v48  ;;  %7487 = vmatprep.mubr.bf16.mxu0 %v11679_v48 }
 0x845   :  { %7417 = vmatpush1.bf16.msra.mxu1 %v11176_v53  ;;  %7458 = vmatpush1.bf16.msra.mxu0 %v11178_v11 }
 0x846   :  { %7418 = vmatprep.subr.bf16.mxu1 %v11182_v26  ;;  %7459 = vmatprep.subr.bf16.mxu0 %v11184_v39 }
 0x849   :  { %7419 = vmatpush1.bf16.msra.mxu1 %v11190_v22  ;;  %7460 = vmatpush1.bf16.msra.mxu0 %v11192_v28 }
 0x84a   :  { %7420 = vmatprep.subr.bf16.mxu1 %v11196_v20  ;;  %7461 = vmatprep.subr.bf16.mxu0 %v11198_v23 }
 0x84d   :  { %7421 = vmatpush1.bf16.msra.mxu1 %v11202_v33  ;;  %7462 = vmatpush1.bf16.msra.mxu0 %v11204_v7 }
 0x84e   :  { %7422 = vmatprep.subr.bf16.mxu1 %v11208_v37  ;;  %7463 = vmatprep.subr.bf16.mxu0 %v11210_v38 }
 0x851   :  { %7423 = vmatpush1.bf16.msra.mxu1 %v11214_v25  ;;  %7464 = vmatpush1.bf16.msra.mxu0 %v11216_v1 }
 0x852   :  { %7424 = vmatprep.subr.bf16.mxu1 %v11220_v3  ;;  %7465 = vmatprep.subr.bf16.mxu0 %v11222_v0 }
 0x855   :  { %7425 = vmatpush1.bf16.msra.mxu1 %v11226_v14  ;;  %7466 = vmatpush1.bf16.msra.mxu0 %v11228_v2  ;;  %v7188_v14 = vrot.slane %v11151_v16, 7 }
 0x856   :  { %7426 = vmatprep.subr.bf16.mxu1 %v11232_v32  ;;  %7467 = vmatprep.subr.bf16.mxu0 %v11234_v60 }
 0x859   :  { %7427 = vmatpush1.bf16.msra.mxu1 %v11238_v61  ;;  %7468 = vmatpush1.bf16.msra.mxu0 %v11240_v63 }
 0x85a   :  { %7428 = vmatprep.subr.bf16.mxu1 %v11244_v34  ;;  %7469 = vmatprep.subr.bf16.mxu0 %v11246_v6 }
 0x85d   :  { %7429 = vmatpush1.bf16.msra.mxu1 %v11250_v36  ;;  %7470 = vmatpush1.bf16.msra.mxu0 %v11252_v42 }
 0x85e   :  { %7719 = vmatprep.subr.bf16.mxu1 %v11256_v27  ;;  %7760 = vmatprep.subr.bf16.mxu0 %v11258_v46 }
 0x8a0   :  { %v6503_v54 = vpop.f32.mrf.mxu1  ;;  %v6544_v35 = vpop.f32.mrf.mxu0 }
 0x8a1   :  { %v6555_v58 = vrot.slane %v6503_v54, 1  ;;  %v6557_v11 = vrot.slane %v6544_v35, 1  ;;  %v11970_v54 = vld [vmem:[#allocation30_spill] sm:$0xff]  ;;  %v11971_v35 = vld [vmem:[#allocation31_spill] sm:$0xff] }
 0x8a2   :  { %v6505_v62 = vpop.f32.mrf.mxu1  ;;  %v6546_v55 = vpop.f32.mrf.mxu0 }
 0x8a3   :  { %v6563_v53 = vadd.f32 %v6555_v58, %v9886_v40  ;;  %v6556_v26 = vrot.slane %v6505_v62, 1  ;;  %v6565_v33 = vadd.f32 %v6557_v11, %v9891_v51  ;;  %v6558_v7 = vrot.slane %v6546_v55, 1  ;;  %v11972_v58 = vld [vmem:[#allocation32_spill] sm:$0xff]  ;;  %v11973_v62 = vld [vmem:[#allocation33_spill] sm:$0xff]  ;;  %v11974_v55 = vld [vmem:[#allocation34_spill] sm:$0xff] }
 0x8a4   :  { %v6507_v39 = vpop.f32.mrf.mxu1  ;;  %v6548_v22 = vpop.f32.mrf.mxu0  ;;  %v11978_v11 = vld [vmem:[#allocation38_spill] sm:$0xff] }
 0x8a5   :  { %9455 = vtanh.f32 %v6563_v53  ;;  %v6564_v28 = vadd.f32 %v6556_v26, %v9888_v47  ;;  %v6566_v37 = vadd.f32 %v6558_v7, %v9896_v30  ;;  %v11977_v53 = vld [vmem:[#allocation37_spill] sm:$0xff] }
 0x8a6   :  { %v6508_v20 = vpop.f32.mrf.mxu1  ;;  %v6549_v23 = vpop.f32.mrf.mxu0  ;;  %v11981_v26 = vld [vmem:[#allocation41_spill] sm:$0xff] }
 0x8a7   :  { %9457 = vtanh.f32 %v6564_v28 }
 0x8a8   :  { %9459 = vtanh.f32 %v6565_v33 }
 0x8a9   :  { %9461 = vtanh.f32 %v6566_v37 }
 0x8b2   :  { %v9456_v38 = vpop.eup %9455 }
 0x8b3   :  { %v7181_v25 = vmul.f32 0.5, %v9456_v38 }
 0x8b4   :  { %v9458_v1 = vpop.eup %9457 }
 0x8b5   :  { %v7182_v40 = vadd.f32 0.5, %v7181_v25  ;;  %v7183_v3 = vmul.f32 0.5, %v9458_v1  ;;  %v9460_v2 = vpop.eup %9459 }
 0x8b6   :  { %v9462_v63 = vpop.eup %9461 }
 0x8b7   :  { %v7184_v0 = vadd.f32 0.5, %v7183_v3  ;;  %v7191_v32 = vmul.f32 %v9460_v2, %v7182_v40  ;;  %v7185_v46 = vmul.f32 0.5, %v9462_v63  ;;  %v8554_v40 = vld [vmem:[%s11481_s5 + $0x4] sm:$0xf] }
 0x8b9   :  { %v7190_v47 = vmul.f32 %v7188_v14, %v7184_v0  ;;  %v7186_v4 = vadd.f32 0.5, %v7185_v46 }
 0x8bb   :  { %v7192_v60 = vadd.f32 %v7191_v32, %v7190_v47 }
 0x8bd   :  { %9463 = vtanh.f32 %v7192_v60  ;;  %7852 = vst [vmem:[#allocation14 - $0x7] sm:$0x80] %v7192_v60 }
 0x8c0   :  { %v6794_v51 = vpop.f32.mrf.mxu1  ;;  %v6835_v61 = vpop.f32.mrf.mxu0 }
 0x8c2   :  { %v6796_v34 = vpop.f32.mrf.mxu1  ;;  %v6837_v30 = vpop.f32.mrf.mxu0 }
 0x8c3   :  { %v6846_v6 = vcombine.low %v6794_v51, %v6796_v34  ;;  %v6847_v36 = vcombine.low %v6835_v61, %v6837_v30 }
 0x8c4   :  { %v6798_v42 = vpop.f32.mrf.mxu1  ;;  %v6839_v27 = vpop.f32.mrf.mxu0 }
 0x8c5   :  { %v6854_v5 = vrot.slane %v6846_v6, %v10163_v57  ;;  %v6861_v16 = vrot.slane %v6847_v36, %v10163_v57 }
 0x8c6   :  { %v6799_v41 = vpop.f32.mrf.mxu1  ;;  %v6840_v13 = vpop.f32.mrf.mxu0 }
 0x8c7   :  { %v6862_v43 = vcombine.low %v6854_v5, %v6861_v16 }
 0x8c9   :  { %v6869_v38 = vrot.slane %v6862_v43, %v10163_v57 }
 0x8ca   :  { %v9464_v45 = vpop.eup %9463 }
 0x8cb   :  { %v7194_v49 = vmul.f32 %v9464_v45, %v7186_v4  ;;  %v6871_v2 = vadd.f32 %v8554_v40, %v6869_v38 }
 0x8cd   :  { %7851 = vst [vmem:[#allocation12 - $0x7] sm:$0x80] %v7194_v49  ;;  %v7216_v19 = vpack.c.bf16 %v7194_v49, %v7194_v49 }
 0x8cf   :  { %v7250_v56 = vshrl.u32 %v7216_v19, 16 }
 0x8d1   :  { %v7252_v15 = vrot.slane %v7250_v56, 3 }
 0x8d3   :  { %7447 = vmatmul.mubr.bf16.vlgmr.msra.gmra.mxu1 %v7252_v15  ;;  %7488 = vmatmul.mubr.bf16.vlgmr.msra.gmra.mxu0 %v7252_v15 }
 0x8d4   :  { %7720 = vmatpush1.bf16.msra.mxu1 %v11262_v21  ;;  %7761 = vmatpush1.bf16.msra.mxu0 %v11264_v12  ;;  %v11965_v21 = vld [vmem:[#allocation25_spill] sm:$0xff]  ;;  %v11966_v12 = vld [vmem:[#allocation26_spill] sm:$0xff] }
 0x8d5   :  { %7721 = vmatprep.subr.bf16.mxu1 %v11268_v9  ;;  %7762 = vmatprep.subr.bf16.mxu0 %v11270_v10  ;;  %v11967_v9 = vld [vmem:[#allocation27_spill] sm:$0xff]  ;;  %v11969_v10 = vld [vmem:[#allocation29_spill] sm:$0xff] }
 0x8d6   :  { %7751 = vmatprep.mubr.bf16.mxu1 %v11679_v48  ;;  %7792 = vmatprep.mubr.bf16.mxu0 %v11679_v48  ;;  %v11968_v48 = vld [vmem:[#allocation28_spill] sm:$0xff] }
 0x8d8   :  { %7722 = vmatpush1.bf16.msra.mxu1 %v11960_v17  ;;  %7763 = vmatpush1.bf16.msra.mxu0 %v11961_v52 }
 0x8d9   :  { %7723 = vmatprep.subr.bf16.mxu1 %v11962_v29  ;;  %7764 = vmatprep.subr.bf16.mxu0 %v11963_v31 }
 0x8dc   :  { %7724 = vmatpush1.bf16.msra.mxu1 %v11964_v8  ;;  %7765 = vmatpush1.bf16.msra.mxu0 %v11965_v21 }
 0x8dd   :  { %7725 = vmatprep.subr.bf16.mxu1 %v11966_v12  ;;  %7766 = vmatprep.subr.bf16.mxu0 %v11967_v9 }
 0x8e0   :  { %7726 = vmatpush1.bf16.msra.mxu1 %v11308_v44  ;;  %7767 = vmatpush1.bf16.msra.mxu0 %v11310_v24  ;;  %v11975_v44 = vld [vmem:[#allocation35_spill] sm:$0xff]  ;;  %v11976_v24 = vld [vmem:[#allocation36_spill] sm:$0xff] }
 0x8e1   :  { %7727 = vmatprep.subr.bf16.mxu1 %v11968_v48  ;;  %7768 = vmatprep.subr.bf16.mxu0 %v11969_v10 }
 0x8e4   :  { %7728 = vmatpush1.bf16.msra.mxu1 %v11320_v18  ;;  %7769 = vmatpush1.bf16.msra.mxu0 %v11322_v59  ;;  %v11979_v18 = vld [vmem:[#allocation39_spill] sm:$0xff]  ;;  %v11980_v59 = vld [vmem:[#allocation40_spill] sm:$0xff] }
 0x8e5   :  { %7729 = vmatprep.subr.bf16.mxu1 %v11970_v54  ;;  %7770 = vmatprep.subr.bf16.mxu0 %v11971_v35 }
 0x8e8   :  { %7730 = vmatpush1.bf16.msra.mxu1 %v11972_v58  ;;  %7771 = vmatpush1.bf16.msra.mxu0 %v11973_v62 }
 0x8e9   :  { %7731 = vmatprep.subr.bf16.mxu1 %v11974_v55  ;;  %7772 = vmatprep.subr.bf16.mxu0 %v11975_v44 }
 0x8ec   :  { %7732 = vmatpush1.bf16.msra.mxu1 %v11976_v24  ;;  %7773 = vmatpush1.bf16.msra.mxu0 %v11977_v53  ;;  %v8619_v53 = vld [vmem:[%s11481_s5 + $0x4] sm:$0xf]  ;;  %s9656_s5 = smov [#allocation12]  }
 0x8ed   :  { %7733 = vmatprep.subr.bf16.mxu1 %v11978_v11  ;;  %7774 = vmatprep.subr.bf16.mxu0 %v11979_v18  ;;  %s7871_s19 = sshll.u32 %s9656_s5, 4  ;;  %s7872_s19 = int_to_ptr.vmem [resolvable:$true] %s7871_s19 }
 0x8ee   :  { %s9573_s22 = scalar_lea.vmem %s7872_s19, 32  ;;  %p9578_p12 = scmp.lt.s32.totalorder %s7872_s19, %s7872_s19 }
 0x8ef   :  { %p9574_p11 = scmp.ne.s32.totalorder %s7872_s19, %s9573_s22  ;;  %p9579_p13 = scmp.lt.s32.totalorder %s9573_s22, %s9573_s22 }
 0x8f0   :  { %7734 = vmatpush1.bf16.msra.mxu1 %v11980_v59  ;;  %7775 = vmatpush1.bf16.msra.mxu0 %v11981_v26 }
 0x8f1   :  { %p9580_p0 = por %p9579_p13, %p9578_p12 }
 0x8f3   :  { %p9581_p1 = pnand %p9580_p0, %p9574_p11 }
 0x900   :  { %v7099_v39 = vpop.f32.mrf.mxu1  ;;  %v7140_v22 = vpop.f32.mrf.mxu0 }
 0x902   :  { %v7101_v28 = vpop.f32.mrf.mxu1  ;;  %v7142_v20 = vpop.f32.mrf.mxu0 }
 0x903   :  { %v7151_v23 = vcombine.low %v7099_v39, %v7101_v28  ;;  %v7152_v33 = vcombine.low %v7140_v22, %v7142_v20 }
 0x904   :  { %v7103_v7 = vpop.f32.mrf.mxu1  ;;  %v7144_v37 = vpop.f32.mrf.mxu0 }
 0x905   :  { %v7159_v25 = vrot.slane %v7151_v23, %v10163_v57  ;;  %v7166_v1 = vrot.slane %v7152_v33, %v10163_v57 }
 0x906   :  { %v7104_v3 = vpop.f32.mrf.mxu1  ;;  %v7145_v0 = vpop.f32.mrf.mxu0 }
 0x907   :  { %v7167_v14 = vcombine.low %v7159_v25, %v7166_v1 }
 0x909   :  { %v7174_v47 = vrot.slane %v7167_v14, %v10163_v57 }
 0x90b   :  { %v7176_v32 = vadd.f32 %v7174_v47, %v6871_v2 }
 0x90d   :  { %9465 = vtanh.f32 %v7176_v32 }
 0x91a   :  { %v9466_v60 = vpop.eup %9465 }
 0x91b   :  { %v7196_v51 = vmul.f32 0.5, %v9466_v60  ;;  %v7199_v61 = vrot.slane %v9466_v60, 1  ;;  %v7208_v6 = vrot.slane %v9466_v60, 2  ;;  %v7203_v46 = vrot.slane %v9466_v60, 3 }
 0x91d   :  { %v7197_v63 = vadd.f32 0.5, %v7196_v51  ;;  %v7201_v34 = vmul.f32 0.5, %v7199_v61  ;;  %v7205_v5 = vmul.f32 0.5, %v7203_v46 }
 0x91f   :  { %v7202_v30 = vadd.f32 0.5, %v7201_v34  ;;  %v7210_v42 = vmul.f32 %v7208_v6, %v7197_v63  ;;  %v7206_v16 = vadd.f32 0.5, %v7205_v5 }
 0x921   :  { %v7207_v36 = vmul.f32 %v7202_v30, %v11374_v50 }
 0x923   :  { %v7211_v27 = vadd.f32 %v7210_v42, %v7207_v36 }
 0x925   :  { %9467 = vtanh.f32 %v7211_v27 }
 0x932   :  { %v9468_v41 = vpop.eup %9467 }
 0x933   :  { %v7213_v13 = vmul.f32 %v9468_v41, %v7206_v16 }
 0x935   :  { %7214 = vst [vmem:[#allocation11 + $0x6] sm:$0x1] %v7213_v13  ;;  %v7526_v43 = vpack.c.bf16 %v7213_v13, %v7213_v13 }
 0x937   :  { %7752 = vmatmul.mubr.bf16.vlgmr.msra.gmra.mxu1 %v7526_v43  ;;  %7793 = vmatmul.mubr.bf16.vlgmr.msra.gmra.mxu0 %v7526_v43 }
 0x993   :  { %v7448_v4 = vpop.f32.mrf.mxu1  ;;  %v7489_v45 = vpop.f32.mrf.mxu0 }
 0x995   :  { %v7450_v49 = vpop.f32.mrf.mxu1  ;;  %v7491_v19 = vpop.f32.mrf.mxu0 }
 0x996   :  { %v7500_v56 = vcombine.low %v7448_v4, %v7450_v49  ;;  %v7501_v15 = vcombine.low %v7489_v45, %v7491_v19 }
 0x997   :  { %v7452_v17 = vpop.f32.mrf.mxu1  ;;  %v7493_v50 = vpop.f32.mrf.mxu0 }
 0x998   :  { %v7508_v52 = vrot.slane %v7500_v56, %v10163_v57  ;;  %v7515_v29 = vrot.slane %v7501_v15, %v10163_v57 }
 0x999   :  { %v7453_v31 = vpop.f32.mrf.mxu1  ;;  %v7494_v8 = vpop.f32.mrf.mxu0 }
 0x99a   :  { %v7516_v21 = vcombine.low %v7508_v52, %v7515_v29 }
 0x99c   :  { %v7523_v55 = vrot.slane %v7516_v21, %v10163_v57 }
 0x99e   :  { %v7525_v26 = vadd.f32 %v8619_v53, %v7523_v55 }
 0x9f7   :  { %v7753_v12 = vpop.f32.mrf.mxu1  ;;  %v7794_v9 = vpop.f32.mrf.mxu0 }
 0x9f9   :  { %v7755_v48 = vpop.f32.mrf.mxu1  ;;  %v7796_v10 = vpop.f32.mrf.mxu0 }
 0x9fa   :  { %v7805_v54 = vcombine.low %v7753_v12, %v7755_v48  ;;  %v7806_v35 = vcombine.low %v7794_v9, %v7796_v10 }
 0x9fb   :  { %v7757_v58 = vpop.f32.mrf.mxu1  ;;  %v7798_v62 = vpop.f32.mrf.mxu0 }
 0x9fc   :  { %v7813_v44 = vrot.slane %v7805_v54, %v10163_v57  ;;  %v7820_v24 = vrot.slane %v7806_v35, %v10163_v57 }
 0x9fd   :  { %v7758_v11 = vpop.f32.mrf.mxu1  ;;  %v7799_v18 = vpop.f32.mrf.mxu0 }
 0x9fe   :  { %v7821_v59 = vcombine.low %v7813_v44, %v7820_v24 }
 0xa00   :  { %v7828_v39 = vrot.slane %v7821_v59, %v10163_v57 }
 0xa02   :  { %v7830_v22 = vadd.f32 %v7828_v39, %v7525_v26 }
 0xa04   :  { %9469 = vtanh.f32 %v7830_v22 }
 0xa11   :  { %v9470_v28 = vpop.eup %9469 }
 0xa12   :  { %v7832_v20 = vmul.f32 0.5, %v9470_v28  ;;  %v7835_v23 = vrot.slane %v9470_v28, 1  ;;  %v7844_v38 = vrot.slane %v9470_v28, 2  ;;  %v7839_v3 = vrot.slane %v9470_v28, 3 }
 0xa14   :  { %v7833_v33 = vadd.f32 0.5, %v7832_v20  ;;  %v7837_v7 = vmul.f32 0.5, %v7835_v23  ;;  %v7841_v0 = vmul.f32 0.5, %v7839_v3 }
 0xa16   :  { %v7838_v37 = vadd.f32 0.5, %v7837_v7  ;;  %v7846_v1 = vmul.f32 %v7844_v38, %v7833_v33  ;;  %v7842_v14 = vadd.f32 0.5, %v7841_v0 }
 0xa18   :  { %v7843_v25 = vmul.f32 %v7838_v37, %v7211_v27 }
 0xa1a   :  { %v7847_v40 = vadd.f32 %v7846_v1, %v7843_v25 }
 0xa1c   :  { %9471 = vtanh.f32 %v7847_v40  ;;  %7854 = vst [vmem:[#allocation14 + $0x1] sm:$0x1] %v7847_v40 }
 0xa29   :  { %v9472_v57 = vpop.eup %9471 }
 0xa2a   :  { %v7849_v2 = vmul.f32 %v9472_v57, %v7842_v14 }
 0xa2c   :  { %7850 = vst [vmem:[#allocation11 + $0x7] sm:$0x1] %v7849_v2  ;;  %7853 = vst [vmem:[#allocation12 + $0x1] sm:$0x1] %v7849_v2 }
 0xa2d   :  { %9584 = shalt.err (!%p9581_p1)
}
 0xa2e   :  { %7874 = dma.vmem_to_hbm [thread:$0]  %s7872_s19, 32, %s11485_s9, [#allocation13]  }
 0xa2f   :  { %s9593_s25 = scalar_lea.vmem %s7862_s4, 128  ;;  %p9598_p3 = scmp.lt.s32.totalorder %s7862_s4, %s7862_s4 }
 0xa30   :  { %p9594_p2 = scmp.ne.s32.totalorder %s7862_s4, %s9593_s25  ;;  %p9599_p4 = scmp.lt.s32.totalorder %s9593_s25, %s9593_s25 }
 0xa32   :  { %p9600_p5 = por %p9599_p4, %p9598_p3 }
 0xa34   :  { %p9601_p6 = pnand %p9600_p5, %p9594_p2 }
 0xa36   :  { %9604 = shalt.err (!%p9601_p6)
}
 0xa37   :  { %7864 = dma.vmem_to_hbm [thread:$0]  %s7862_s4, 128, %s11484_s8, [#allocation4]  }
 0xa38   :  { %s9613_s1 = scalar_lea.vmem %s7882_s21, 32  ;;  %p9618_p8 = scmp.lt.s32.totalorder %s7882_s21, %s7882_s21 }
 0xa39   :  { %p9614_p7 = scmp.ne.s32.totalorder %s7882_s21, %s9613_s1  ;;  %p9619_p9 = scmp.lt.s32.totalorder %s9613_s1, %s9613_s1 }
 0xa3b   :  { %p9620_p10 = por %p9619_p9, %p9618_p8 }
 0xa3d   :  { %p9621_p11 = pnand %p9620_p10, %p9614_p7 }
 0xa3f   :  { %9624 = shalt.err (!%p9621_p11)
}
 0xa40   :  { %7884 = dma.vmem_to_hbm [thread:$0]  %s7882_s21, 32, %s11486_s10, [#allocation13]  }
 0xa41   :  { %9639 = dma.done.wait [#allocation4], 128  }
 0xa42   :  { %9640 = vsyncadd [#allocation4], 4294967168 }
 0xa43   :  { %9641 = dma.done.wait [#allocation13], 64  }
 0xa44   :  { %9642 = vsyncadd [#allocation13], 4294967232 }
 0xa45   :  { %7894 = vsyncpa [#allocation3], 1 }
 0xa46   :  { %7895 = vsyncpa [#allocation6], 1 }
 0xa47   :  { %7896 = vsyncpa [#allocation9], 1 }
 0xa48   :  { %7897 = vsyncpa [#allocation4], 1 }
 0xa49   :  { %7898 = vsyncpa [#allocation13], 1 }

</bundles_post_ra>
